<compile_context>
chip_gen: v7x
topology: tpu7x:2x2x1
jax: 0.10.0
libtpu: 0.0.40
codegen_flags: <defaults>
</compile_context>

<pallas_src>
import math
import functools

import jax
import jax.numpy as jnp
from jax import lax
from jax.experimental import pallas as pl
from jax.experimental.pallas import tpu as pltpu

LANE = 128
D_CHUNK_MAX = 512               # lanes per in-kernel D chunk (bounds live vregs)
LOG2 = math.log(2.0)
LOG_2PI = math.log(2.0 * math.pi)


def _uni_ll_kernel(x_ref, z_ref, w_ref, b_ref, ww_ref, wb_ref, out_ref, *,
                   bernoulli, tile_n, k_samples, d_real, d_chunk):
    """One grid step = `tile_n` data points x all K prior samples.

    x_ref:  (tile_n, d_pad)   f32  flattened pixels (zero padded)
    z_ref:  (tile_n*K, L)     f32  prior samples, row-flattened
    w_ref:  (L, d_pad)        f32  decoder weight (zero padded columns)
    b_ref:  (1, d_pad)        f32  decoder bias   (zero padded columns)
    ww_ref: (L, L)            f32  W @ W.T   (Normal path only)
    wb_ref: (1, L)            f32  (W @ b.T).T
    out_ref:(tile_n, 128)     f32  per-point ll broadcast across lanes
    """
    rows = tile_n * k_samples
    d_pad = w_ref.shape[1]
    n_chunks = d_pad // d_chunk

    x = x_ref[...]                                               # (tile_n, d_pad)
    z = z_ref[...]                                               # (rows, L)
    z3 = z.reshape(tile_n, k_samples, -1)                        # (tile_n, K, L) K%8==0

    # sum_d x_nd * logits_nkd = z_nk . (W x_n^T) + b . x_n   (MXU, contraction=d_pad)
    xw = lax.dot_general(x, w_ref[...], (((1,), (1,)), ((), ())),
                         preferred_element_type=jnp.float32)     # (tile_n, L)
    xb = jnp.sum(x * b_ref[...], axis=-1, keepdims=True)         # (tile_n, 1)
    xlogits = jnp.sum(z3 * xw[:, None, :], axis=-1) + xb         # (tile_n, K)

    if bernoulli:
        # Bernoulli(sigmoid(logits)).log_prob(x) = x*logits - softplus(logits).
        # Only sum_d softplus(logits) is D-wide; stream it in <=512-lane chunks.
        def sp_chunk(w_c, b_c):
            logits = jnp.dot(z, w_c, preferred_element_type=jnp.float32) + b_c
            sp = jax.nn.softplus(logits).reshape(tile_n, k_samples, -1)
            return jnp.sum(sp, axis=-1)                          # (tile_n, K)

        if n_chunks == 1:
            sp_sum = sp_chunk(w_ref[...], b_ref[...])
        else:
            def body(c, acc):
                start = pl.multiple_of(c * d_chunk, d_chunk)
                return acc + sp_chunk(w_ref[:, pl.ds(start, d_chunk)],
                                      b_ref[:, pl.ds(start, d_chunk)])
            sp_sum = lax.fori_loop(0, n_chunks, body,
                                   jnp.zeros((tile_n, k_samples), jnp.float32))

        # Padded columns have logits exactly 0 (W, b zero padded) and x == 0, so
        # each adds exactly -softplus(0) = -log 2; undo with a static scalar.
        lp = xlogits - sp_sum + float(d_pad - d_real) * LOG2
    else:
        # Normal(mu=logits, scale=1):
        #   sum_d (x-mu)^2 = sum_d x^2 - 2 sum_d x.mu + sum_d mu^2
        #   sum_d mu^2     = z (W W^T) z^T + 2 z (W b^T) + ||b||^2
        # -> no D-wide per-sample work at all.
        xx = jnp.sum(x * x, axis=-1, keepdims=True)               # (tile_n, 1)
        zww = jnp.dot(z, ww_ref[...],
                      preferred_element_type=jnp.float32)         # (rows, L)
        quad = jnp.sum(z3 * zww.reshape(tile_n, k_samples, -1),
                       axis=-1)                                   # (tile_n, K)
        zwb = jnp.sum(z3 * wb_ref[...][None], axis=-1)            # (tile_n, K)
        bb = jnp.sum(b_ref[...] * b_ref[...], axis=-1,
                     keepdims=True)                               # (1, 1)
        mu2 = quad + 2.0 * zwb + bb                               # (tile_n, K)
        sq = xx - 2.0 * xlogits + mu2                             # (tile_n, K)
        lp = -0.5 * sq - 0.5 * LOG_2PI * float(d_real)

    # Single logsumexp over all K samples (chunked logsumexp == one logsumexp).
    m = jnp.max(lp, axis=-1, keepdims=True)
    m_safe = jnp.where(jnp.isfinite(m), m, 0.0)                   # guard all -inf
    s = jnp.sum(jnp.exp(lp - m_safe), axis=-1, keepdims=True)
    ll = m_safe + jnp.log(s) - math.log(float(k_samples))         # (tile_n, 1)

    # Lane-dense store: full (tile_n, 128) block, unmasked on the lane axis.
    out_ref[...] = jnp.broadcast_to(ll, out_ref.shape)


@functools.partial(jax.jit, static_argnames=("bernoulli", "d_chunk", "tile_n"))
def _uni_ll_from_prior_pallas(x_flat, z, w_p, b_p, ww, wb, *,
                              bernoulli, d_chunk, tile_n):
    """ln p(x_i) Monte-Carlo estimates, one per data point i.

    x_flat: (N, D) f32, z: (N, K, L) f32; w_p/b_p/ww/wb precomputed in __init__.
    """
    n, d_real = x_flat.shape
    _, K, L = z.shape
    d_pad = w_p.shape[1]
    assert K % 8 == 0, "K must be a multiple of 8 (sublane-aligned reshape)"
    assert d_pad % d_chunk == 0 and d_chunk % LANE == 0

    n_tiles = -(-n // tile_n)
    n_pad = n_tiles * tile_n
    rows = tile_n * K

    x_p = jnp.pad(x_flat.astype(jnp.float32),
                  ((0, n_pad - n), (0, d_pad - d_real)))
    z_p = jnp.pad(z.astype(jnp.float32), ((0, n_pad - n), (0, 0), (0, 0)))
    z2 = z_p.reshape(n_pad * K, L)
    # NOTE: z uses only 32 of 128 lanes; acceptable at L=32 (few KiB of padding).

    kernel = functools.partial(_uni_ll_kernel, bernoulli=bernoulli, tile_n=tile_n,
                               k_samples=K, d_real=d_real, d_chunk=d_chunk)

    out = pl.pallas_call(
        kernel,
        out_shape=jax.ShapeDtypeStruct((n_pad, LANE), jnp.float32),
        grid_spec=pltpu.PrefetchScalarGridSpec(
            num_scalar_prefetch=0,
            grid=(n_tiles,),
            in_specs=[
                pl.BlockSpec((tile_n, d_pad), lambda i: (i, 0)),   # x tile
                pl.BlockSpec((rows, L), lambda i: (i, 0)),         # z rows
                pl.BlockSpec((L, d_pad), lambda i: (0, 0)),        # decoder W (resident)
                pl.BlockSpec((1, d_pad), lambda i: (0, 0)),        # decoder b
                pl.BlockSpec((L, L), lambda i: (0, 0)),            # W W^T
                pl.BlockSpec((1, L), lambda i: (0, 0)),            # (W b^T)^T
            ],
            out_specs=pl.BlockSpec((tile_n, LANE), lambda i: (i, 0)),
        ),
        compiler_params=pltpu.CompilerParams(
            dimension_semantics=("parallel",)),
    )(x_p, z2, w_p, b_p, ww, wb)

    return out[:n, 0]


def _pick_tile_n(n, K):
    """Fill the MXU M dimension: 128 rows on v5e, 256 on v6e/v7x, but keep at
    least two N tiles so megacore / both v7x TensorCores have work."""
    rows_target = 128
    try:
        kind = jax.devices()[0].device_kind.lower()
        if any(t in kind for t in ("v6", "v7", "trillium")):
            rows_target = 256
    except Exception:
        pass
    tile_n = max(8, rows_target // K)
    if tile_n > 8 and -(-n // tile_n) < 2:
        tile_n = 8
    return tile_n


def uni_ll_from_prior_ref(x_flat, z, w, b, *, bernoulli):
    """Pure-JAX f32 reference in the direct (PyTorch-faithful) form."""
    _, K, _ = z.shape
    logits = jnp.einsum('nkl,ld->nkd', z, w,
                        precision=lax.Precision.HIGHEST) + b[None]
    if bernoulli:
        lp_elem = x_flat[:, None, :] * logits - jax.nn.softplus(logits)
    else:
        lp_elem = -0.5 * (x_flat[:, None, :] - logits) ** 2 - 0.5 * LOG_2PI
    lp = lp_elem.sum(-1)                                           # (N, K)
    return jax.scipy.special.logsumexp(lp, axis=-1) - jnp.log(float(K))


class MultiVAESPallas:
    """Minimal Multi_VAES analogue: standard-normal prior + per-modality linear decoders."""

    def __init__(self, latent_dim, recon_losses, data_shapes, key):
        self.latent_dim = latent_dim
        self.mod = len(recon_losses)
        self.recon_losses = recon_losses          # 'bernoulli' or 'normal'
        self.data_shapes = data_shapes            # list of (C, H, W)
        # pz_params: zeros(1, L), ones(1, L)  (Normal prior)
        self.pz_loc = jnp.zeros((1, latent_dim), jnp.float32)
        self.pz_scale = jnp.ones((1, latent_dim), jnp.float32)
        # Decoder params + everything that depends only on (W, b), computed once.
        self.dec = []
        for (c, h, w) in data_shapes:
            d = c * h * w
            key, kw, kb = jax.random.split(key, 3)
            W = (jax.random.normal(kw, (latent_dim, d), jnp.float32)
                 / math.sqrt(latent_dim))
            b = 0.01 * jax.random.normal(kb, (1, d), jnp.float32)
            d128 = ((d + LANE - 1) // LANE) * LANE
            d_chunk = min(D_CHUNK_MAX, d128)
            d_pad = ((d128 + d_chunk - 1) // d_chunk) * d_chunk
            W_p = jnp.pad(W, ((0, 0), (0, d_pad - d)))             # zero padding is
            b_p = jnp.pad(b, ((0, 0), (0, d_pad - d)))             # load-bearing (mask-free)
            ww = jnp.dot(W_p, W_p.T, precision=lax.Precision.HIGHEST)    # (L, L)
            wb = jnp.dot(W_p, b_p.T, precision=lax.Precision.HIGHEST).T  # (1, L)
            self.dec.append(dict(W=W, b=b, W_p=W_p, b_p=b_p, ww=ww, wb=wb,
                                 d=d, d_pad=d_pad, d_chunk=d_chunk))

    def compute_uni_ll_from_prior(self, data, mod, key, K=16, batch_size_K=8):
        # batch_size_K kept for API compatibility; the kernel folds all K samples
        # into one pass (chunked logsumexp over equal chunks == one logsumexp).
        del batch_size_K
        x = data[mod]                                        # (N, C, H, W)
        n = x.shape[0]
        x_flat = x.reshape(n, -1).astype(jnp.float32)
        # prior.rsample([N, K]).squeeze(-2) with loc=0, scale=1
        z = (self.pz_loc[None, None]
             + self.pz_scale[None, None]
             * jax.random.normal(key, (n, K, 1, self.latent_dim), jnp.float32)
             ).squeeze(-2)                                   # (N, K, L)
        dec = self.dec[mod]
        bern = self.recon_losses[mod] == 'bernoulli'
        tile_n = _pick_tile_n(n, K)
        per_point = _uni_ll_from_prior_pallas(
            x_flat, z, dec['W_p'], dec['b_p'], dec['ww'], dec['wb'],
            bernoulli=bern, d_chunk=dec['d_chunk'], tile_n=tile_n)
        ref = uni_ll_from_prior_ref(x_flat, z, dec['W'], dec['b'], bernoulli=bern)
        return {f'uni_from_prior_{mod}': jnp.sum(per_point) / n}, per_point, ref


if __name__ == "__main__":
    key = jax.random.PRNGKey(0)
    key, k_model, k_x0, k_x1, k_z0, k_z1 = jax.random.split(key, 6)

    N, L, K = 16, 32, 16
    # modality 0: Bernoulli, D=768 (exercises the in-kernel D-chunk loop)
    # modality 1: Normal,    D=192 (algebraic, no D-wide per-sample work)
    shapes = [(3, 16, 16), (3, 8, 8)]
    model = MultiVAESPallas(L, ['bernoulli', 'normal'], shapes, k_model)

    data = [
        (jax.random.uniform(k_x0, (N,) + shapes[0]) > 0.5).astype(jnp.float32),
        jax.random.normal(k_x1, (N,) + shapes[1], jnp.float32),
    ]

    ok = True
    for mod, kz in zip(range(2), [k_z0, k_z1]):
        metrics, per_point, ref = model.compute_uni_ll_from_prior(
            data, mod, kz, K=K, batch_size_K=8)
        per_point = jax.block_until_ready(per_point)
        ref = jax.block_until_ready(ref)
        if not jnp.allclose(per_point, ref, rtol=1e-3, atol=1e-3):
            ok = False

    print("KERNEL_OK" if ok else "KERNEL_MISMATCH")
</pallas_src>

<mosaic_0001>
module attributes {stable_mosaic.version = 11 : i64} {
  func.func @_uni_ll_kernel(%arg0: i32, %arg1: memref<8x1024xf32, #tpu.memory_space<vmem>>, %arg2: memref<128x32xf32, #tpu.memory_space<vmem>>, %arg3: memref<32x1024xf32, #tpu.memory_space<vmem>>, %arg4: memref<1x1024xf32, #tpu.memory_space<vmem>>, %arg5: memref<32x32xf32, #tpu.memory_space<vmem>>, %arg6: memref<1x32xf32, #tpu.memory_space<vmem>>, %arg7: memref<8x128xf32, #tpu.memory_space<vmem>>) attributes {dimension_semantics = [#tpu.dimension_semantics<parallel>], iteration_bounds = array<i64: 2>, scalar_prefetch = 0 : i64, scratch_operands = 0 : i64, tpu.core_type = #tpu.core_type<tc>, window_params = [{transform_indices = @transform_0, window_bounds = array<i64: 8, 1024>}, {transform_indices = @transform_1, window_bounds = array<i64: 128, 32>}, {pipeline_mode = #tpu.pipeline_mode<synchronous>, transform_indices = @transform_2, window_bounds = array<i64: 32, 1024>}, {pipeline_mode = #tpu.pipeline_mode<synchronous>, transform_indices = @transform_3, window_bounds = array<i64: 1, 1024>}, {pipeline_mode = #tpu.pipeline_mode<synchronous>, transform_indices = @transform_4, window_bounds = array<i64: 32, 32>}, {pipeline_mode = #tpu.pipeline_mode<synchronous>, transform_indices = @transform_5, window_bounds = array<i64: 1, 32>}, {transform_indices = @transform_6, window_bounds = array<i64: 8, 128>}]} {
    %c0 = arith.constant 0 : index
    %c0_0 = arith.constant 0 : index
    %0 = vector.load %arg1[%c0, %c0_0] : memref<8x1024xf32, #tpu.memory_space<vmem>>, vector<8x1024xf32>
    %c0_1 = arith.constant 0 : index
    %c0_2 = arith.constant 0 : index
    %1 = vector.load %arg2[%c0_1, %c0_2] : memref<128x32xf32, #tpu.memory_space<vmem>>, vector<128x32xf32>
    %2 = vector.shape_cast %1 : vector<128x32xf32> to vector<8x16x32xf32>
    %c0_3 = arith.constant 0 : index
    %c0_4 = arith.constant 0 : index
    %3 = vector.load %arg3[%c0_3, %c0_4] : memref<32x1024xf32, #tpu.memory_space<vmem>>, vector<32x1024xf32>
    %cst = arith.constant dense<0.000000e+00> : vector<8x32xf32>
    %4 = tpu.matmul %0, %3, %cst {dimension_numbers = #tpu.dot_dimension_numbers<[1], [1], [0], [0], [0, 0, 1, 0], [], []>} : vector<8x1024xf32>, vector<32x1024xf32>, vector<8x32xf32> -> vector<8x32xf32>
    %c0_5 = arith.constant 0 : index
    %c0_6 = arith.constant 0 : index
    %5 = vector.load %arg4[%c0_5, %c0_6] : memref<1x1024xf32, #tpu.memory_space<vmem>>, vector<1x1024xf32>
    %6 = vector.broadcast %5 : vector<1x1024xf32> to vector<8x1024xf32>
    %7 = arith.mulf %0, %6 : vector<8x1024xf32>
    %cst_7 = arith.constant dense<0.000000e+00> : vector<8xf32>
    %8 = vector.multi_reduction <add>, %7, %cst_7 [1] : vector<8x1024xf32> to vector<8xf32>
    %9 = vector.shape_cast %8 : vector<8xf32> to vector<8x1xf32>
    %10 = vector.shape_cast %4 : vector<8x32xf32> to vector<8x1x32xf32>
    %11 = vector.broadcast %10 : vector<8x1x32xf32> to vector<8x16x32xf32>
    %12 = arith.mulf %2, %11 : vector<8x16x32xf32>
    %cst_8 = arith.constant dense<0.000000e+00> : vector<8x16xf32>
    %13 = vector.multi_reduction <add>, %12, %cst_8 [2] : vector<8x16x32xf32> to vector<8x16xf32>
    %14 = vector.broadcast %9 : vector<8x1xf32> to vector<8x16xf32>
    %15 = arith.addf %13, %14 : vector<8x16xf32>
    %cst_9 = arith.constant 0.000000e+00 : f32
    %16 = vector.broadcast %cst_9 : f32 to vector<8x16xf32>
    %c0_i32 = arith.constant 0 : i32
    %c2_i32 = arith.constant 2 : i32
    %17 = arith.addi %c0_i32, %c2_i32 : i32
    %c1_i32 = arith.constant 1 : i32
    %18 = scf.for %arg8 = %c0_i32 to %17 step %c1_i32 iter_args(%arg9 = %16) -> (vector<8x16xf32>)  : i32 {
      %c512_i32 = arith.constant 512 : i32
      %40 = arith.muli %arg8, %c512_i32 : i32
      %41 = tpu.assume_multiple %40, 512 : i32
      %c0_19 = arith.constant 0 : index
      %42 = arith.index_cast %41 : i32 to index
      %43 = vector.load %arg3[%c0_19, %42] : memref<32x1024xf32, #tpu.memory_space<vmem>>, vector<32x512xf32>
      %c0_20 = arith.constant 0 : index
      %44 = arith.index_cast %41 : i32 to index
      %45 = vector.load %arg4[%c0_20, %44] : memref<1x1024xf32, #tpu.memory_space<vmem>>, vector<1x512xf32>
      %cst_21 = arith.constant dense<0.000000e+00> : vector<128x512xf32>
      %46 = tpu.matmul %1, %43, %cst_21 {dimension_numbers = #tpu.dot_dimension_numbers<[1], [0], [0], [1], [0, 0, 1, 1], [], []>} : vector<128x32xf32>, vector<32x512xf32>, vector<128x512xf32> -> vector<128x512xf32>
      %47 = vector.broadcast %45 : vector<1x512xf32> to vector<128x512xf32>
      %48 = arith.addf %46, %47 : vector<128x512xf32>
      %cst_22 = arith.constant 0.000000e+00 : f32
      %49 = vector.broadcast %cst_22 : f32 to vector<128x512xf32>
      %50 = arith.maximumf %48, %49 : vector<128x512xf32>
      %51 = vector.broadcast %cst_22 : f32 to vector<128x512xf32>
      %52 = arith.subf %48, %51 : vector<128x512xf32>
      %53 = arith.cmpf one, %52, %52 : vector<128x512xf32>
      %54 = vector.broadcast %cst_22 : f32 to vector<128x512xf32>
      %55 = arith.addf %48, %54 : vector<128x512xf32>
      %56 = math.absf %52 : vector<128x512xf32>
      %cst_23 = arith.constant 0.000000e+00 : f32
      %57 = vector.broadcast %cst_23 : f32 to vector<128x512xf32>
      %58 = arith.subf %57, %56 : vector<128x512xf32>
      %59 = math.exp %58 : vector<128x512xf32>
      %60 = math.log1p %59 : vector<128x512xf32>
      %61 = arith.addf %50, %60 : vector<128x512xf32>
      %62 = arith.select %53, %55, %61 : vector<128x512xi1>, vector<128x512xf32>
      %63 = vector.shape_cast %62 : vector<128x512xf32> to vector<8x16x512xf32>
      %cst_24 = arith.constant dense<0.000000e+00> : vector<8x16xf32>
      %64 = vector.multi_reduction <add>, %63, %cst_24 [2] : vector<8x16x512xf32> to vector<8x16xf32>
      %65 = arith.addf %arg9, %64 : vector<8x16xf32>
      scf.yield %65 : vector<8x16xf32>
    }
    %c2_i32_10 = arith.constant 2 : i32
    %19 = arith.subf %15, %18 : vector<8x16xf32>
    %cst_11 = arith.constant 177.445679 : f32
    %20 = vector.broadcast %cst_11 : f32 to vector<8x16xf32>
    %21 = arith.addf %19, %20 : vector<8x16xf32>
    %cst_12 = arith.constant dense<0xFF800000> : vector<8xf32>
    %22 = vector.multi_reduction <maximumf>, %21, %cst_12 [1] : vector<8x16xf32> to vector<8xf32>
    %23 = vector.shape_cast %22 : vector<8xf32> to vector<8x1xf32>
    %24 = tpu.weird %23 : vector<8x1xf32> -> vector<8x1xi1>
    %cst_13 = arith.constant dense<true> : vector<8x1xi1>
    %25 = arith.xori %24, %cst_13 : vector<8x1xi1>
    %cst_14 = arith.constant 0.000000e+00 : f32
    %26 = vector.broadcast %cst_14 : f32 to vector<8x1xf32>
    %27 = arith.select %25, %23, %26 : vector<8x1xi1>, vector<8x1xf32>
    %28 = vector.broadcast %27 : vector<8x1xf32> to vector<8x16xf32>
    %29 = arith.subf %21, %28 : vector<8x16xf32>
    %30 = math.exp %29 : vector<8x16xf32>
    %cst_15 = arith.constant dense<0.000000e+00> : vector<8xf32>
    %31 = vector.multi_reduction <add>, %30, %cst_15 [1] : vector<8x16xf32> to vector<8xf32>
    %32 = vector.shape_cast %31 : vector<8xf32> to vector<8x1xf32>
    %33 = math.log %32 : vector<8x1xf32>
    %34 = arith.addf %27, %33 : vector<8x1xf32>
    %cst_16 = arith.constant 2.77258873 : f32
    %35 = vector.broadcast %cst_16 : f32 to vector<8x1xf32>
    %36 = arith.subf %34, %35 : vector<8x1xf32>
    %37 = vector.shape_cast %36 : vector<8x1xf32> to vector<8x1xf32>
    %38 = vector.broadcast %37 : vector<8x1xf32> to vector<8x128xf32>
    %c0_17 = arith.constant 0 : index
    %c0_18 = arith.constant 0 : index
    %39 = vector.load %arg7[%c0_17, %c0_18] : memref<8x128xf32, #tpu.memory_space<vmem>>, vector<8x128xf32>
    tpu.vector_store %arg7[%c0_17, %c0_18], %38 {strides = array<i32>} : memref<8x128xf32, #tpu.memory_space<vmem>>, vector<8x128xf32>,
    return
  }
  func.func @transform_0(%arg0: i32) -> (i32, i32) {
    %c0_i32 = arith.constant 0 : i32
    %c0_i32_0 = arith.constant 0 : i32
    return %arg0, %c0_i32 : i32, i32
  }
  func.func @transform_1(%arg0: i32) -> (i32, i32) {
    %c0_i32 = arith.constant 0 : i32
    %c0_i32_0 = arith.constant 0 : i32
    return %arg0, %c0_i32 : i32, i32
  }
  func.func @transform_2(%arg0: i32) -> (i32, i32) {
    %c0_i32 = arith.constant 0 : i32
    %c0_i32_0 = arith.constant 0 : i32
    %c0_i32_1 = arith.constant 0 : i32
    return %c0_i32, %c0_i32_0 : i32, i32
  }
  func.func @transform_3(%arg0: i32) -> (i32, i32) {
    %c0_i32 = arith.constant 0 : i32
    %c0_i32_0 = arith.constant 0 : i32
    %c0_i32_1 = arith.constant 0 : i32
    return %c0_i32, %c0_i32_0 : i32, i32
  }
  func.func @transform_4(%arg0: i32) -> (i32, i32) {
    %c0_i32 = arith.constant 0 : i32
    %c0_i32_0 = arith.constant 0 : i32
    %c0_i32_1 = arith.constant 0 : i32
    return %c0_i32, %c0_i32_0 : i32, i32
  }
  func.func @transform_5(%arg0: i32) -> (i32, i32) {
    %c0_i32 = arith.constant 0 : i32
    %c0_i32_0 = arith.constant 0 : i32
    %c0_i32_1 = arith.constant 0 : i32
    return %c0_i32, %c0_i32_0 : i32, i32
  }
  func.func @transform_6(%arg0: i32) -> (i32, i32) {
    %c0_i32 = arith.constant 0 : i32
    %c0_i32_0 = arith.constant 0 : i32
    return %arg0, %c0_i32 : i32, i32
  }
}

</mosaic_0001>

<bundles_post_ra>
// kernel: _uni_ll_from_prior_pallas.1
= control target key start
LH: loop header
LB: loop body
LE: loop exit
PB: predicated region body
PF: predicated region fallthrough
CT: control target
= control target key end

     0   :  { %11 = vsyncpa [#allocation3], 0  ;;  %s6600_s0 = inlined_call_operand.vmem [shape: f32[16,1024], index: 0, kind: input, shape index: {}]   ;;  %s6601_s1 = inlined_call_operand.hbm [shape: f32[256,32], index: 1, kind: input, shape index: {}]   ;;  %s6602_s2 = inlined_call_operand.hbm [shape: f32[32,1024], index: 2, kind: input, shape index: {}]   ;;  %s6603_s3 = inlined_call_operand.vmem [shape: f32[1,1024], index: 3, kind: input, shape index: {}]   ;;  %s6604_s4 = inlined_call_operand.vmem [shape: f32[32,32], index: 4, kind: input, shape index: {}]   ;;  %s6605_s5 = inlined_call_operand.vmem [shape: f32[1,32], index: 5, kind: input, shape index: {}]   ;;  %s6606_s6 = inlined_call_operand.vmem [shape: f32[16,128], index: 6, kind: output, shape index: {}]  }
   0x1   :  { %13 = vsyncpa [#allocation3 + $0x1], 0 }
   0x2   :  { %14 = vsyncpa [#allocation5], 0  ;;  %s4045_s21 = smov 0   ;;  %s4047_s22 = smov 0  }
   0x3   :  { %s4049_s23 = smov 0   ;;  %s4051_s24 = smov 0  }
   0x4 LB: > { %s4064_s4 = sadd.s32 4294967295, %s3930_s24   ;;  %p66_p0 = scmp.ne.s32.totalorder %s3922_s22, %s3918_s21  ;;  %s3930_s24 = sphi %s4051_s24, %s7297_s24   ;;  %s3926_s23 = sphi %s4049_s23, %s7296_s23   ;;  %s3922_s22 = sphi %s4047_s22, %s7295_s22   ;;  %s3918_s21 = sphi %s4045_s21, %s7294_s21  }
   0x5   : > { %p6607_p1 = scmp.eq.s32.totalorder %s4064_s4, 0  ;;  %p3176_p2 = scmp.ge.s32.totalorder %s3930_s24, 1 }
   0x6   : > { %p187_p3 = scmp.lt.s32.totalorder %s3930_s24, 3  ;;  %s4000_s26 = smov [#allocation4]  }
   0x7   : > { %p4072_p4 = por %p6607_p1, %p66_p0  ;;  %s199_s27 = sshll.u32 %s4000_s26, 4  ;;  %s200_s27 = int_to_ptr.vmem [resolvable:$true] %s199_s27 }
   0x8   : > { %p4076_p5 = pnand %p3176_p2, %p187_p3  ;;  %s4089_s29 = sadd.s32 1, %s3930_s24  }
   0x9   : > { %s6777_s5 = scalar_select %p4072_p4, 1, 0 }
   0xa   : > { %s6778_s25 = scalar_select %p4076_p5, 1, 0 }
   0xb   : > { %p3286_p6 = pneg %p4076_p5  ;;  %s53_s30 = sadd.s32 1, %s3926_s23 }
   0xc   : > { %s50_s7 = ssub.s32 %s3930_s24, %s4089_s29  ;;  %s3766_s10 = scalar_lea.hbm %s6602_s2, 4096 }
   0xd   : > { %p4084_p7 = pnand %p3286_p6, %p6607_p1  ;;  %p3767_p8 = scmp.ne.s32.totalorder %s6602_s2, %s3766_s10 }
   0xe   : > { %p3773_p12 = scmp.lt.u32.totalorder %s3766_s10, %s6602_s2 }
   0xf   : > { %p3768_p9 = pneg %p4084_p7 }
  0x11   : > { %p3769_p10 = pnand %p3768_p9, %p3767_p8 }
  0x13   : > { %p3770_p11 = pneg %p3769_p10 }
  0x15   : > { %p3775_p13 = pnand %p3773_p12, %p3770_p11 }
  0x17   : > { %3778 = shalt.err (!%p3775_p13)
}
  0x18   : > { %s3779_s15 = scalar_lea.vmem %s200_s27, 4096  ;;  %p3787_p6 = scmp.lt.s32.totalorder %s200_s27, %s200_s27 }
  0x19   : > { %p3780_p0 = scmp.ne.s32.totalorder %s200_s27, %s3779_s15  ;;  %p3788_p1 = scmp.lt.s32.totalorder %s3779_s15, %s3779_s15 }
  0x1b   : > { %p3782_p2 = pnand %p3780_p0, %p3768_p9  ;;  %p3789_p4 = por %p3788_p1, %p3787_p6 }
  0x1d   : > { %p3783_p3 = pneg %p3782_p2 }
  0x1f   : > { %p3790_p5 = pnand %p3789_p4, %p3783_p3 }
  0x21   : > { %3793 = shalt.err (!%p3790_p5)
}
  0x22   : > { %s4001_s16 = smov 1024   ;;  %s4002_s17 = smov 64  }
  0x23   : > { %3289 = dma.hbm_to_vmem [thread:$0]  (!%p4084_p7), %s6602_s2, 4096, %s200_s27, [#allocation5], %s4001_s16, %s4001_s16, %s4002_s17  }
  0x24   : > { %p51_p8 = scmp.eq.s32.totalorder %s50_s7, 0  ;;  %p60_p9 = scmp.ne.s32.totalorder %s3926_s23, %s3922_s22 }
  0x25   : > { %p61_p1 = scmp.eq.s32.totalorder %s3930_s24, 0  ;;  %p3295_p4 = scmp.lt.s32.totalorder %s3930_s24, 2 }
  0x26   : > { %s4115_s20 = scalar_select %p51_p8, %s3926_s23, %s53_s30  }
  0x27   : > { %p62_p5 = por %p61_p1, %p60_p9  ;;  %s230_s21 = sand.u32 1, %s3926_s23  }
  0x28   : > { %s3179_s26 = sshll.u32 %s230_s21, 7  ;;  %s3225_s8 = sshll.u32 %s3930_s24, 11 }
  0x29   : > { %s4122_s11 = scalar_lea.hbm %s6601_s1, %s3225_s8  ;;  %s234_s27 = scalar_lea.vmem [#allocation2], %s3179_s26 }
  0x2a   : > { %s241_s28 = sshll.u32 %s234_s27, 4  ;;  %p4126_p7 = pnand %p3295_p4, %p62_p5  ;;  %s4124_s28 = int_to_ptr.vmem [resolvable:$true] %s241_s28 }
  0x2b   : > { %s4130_s24 = scalar_lea.sflag [#allocation3], %s230_s21  ;;  %s3794_s7 = scalar_lea.hbm %s4122_s11, 2048 }
  0x2c   : > { %p3795_p10 = scmp.ne.s32.totalorder %s4122_s11, %s3794_s7  ;;  %p3796_p11 = pneg %p4126_p7 }
  0x2d   : > { %s3799_s14 = scalar_lea.hbm %s6601_s1, 4096  ;;  %p3800_p0 = scmp.lt.u32.totalorder %s4122_s11, %s6601_s1 }
  0x2e   : > { %p3797_p12 = pnand %p3796_p11, %p3795_p10  ;;  %p3801_p2 = scmp.lt.u32.totalorder %s3799_s14, %s3794_s7 }
  0x2f   : > { %p3803_p6 = scmp.lt.u32.totalorder %s3794_s7, %s4122_s11 }
  0x30   : > { %p3798_p13 = pneg %p3797_p12  ;;  %p3802_p3 = por %p3801_p2, %p3800_p0 }
  0x32   : > { %p3804_p8 = por %p3803_p6, %p3802_p3 }
  0x34   : > { %p3805_p9 = pnand %p3804_p8, %p3798_p13 }
  0x36   : > { %3808 = shalt.err (!%p3805_p9)
}
  0x37   : > { %s3809_s17 = scalar_lea.vmem %s4124_s28, 2048  ;;  %s4003_s18 = smov [#allocation2]  }
  0x38   : > { %p3810_p1 = scmp.ne.s32.totalorder %s4124_s28, %s3809_s17  ;;  %s3814_s19 = sshll.u32 %s4003_s18, 4  ;;  %s3815_s19 = int_to_ptr.vmem [resolvable:$false] %s3814_s19 }
  0x39   : > { %s3816_s21 = scalar_lea.vmem %s3815_s19, 4096  ;;  %p3817_p10 = scmp.lt.s32.totalorder %s4124_s28, %s3815_s19 }
  0x3a   : > { %p3812_p4 = pnand %p3810_p1, %p3796_p11  ;;  %p3818_p12 = scmp.lt.s32.totalorder %s3816_s21, %s3809_s17 }
  0x3c   : > { %p3813_p5 = pneg %p3812_p4  ;;  %p3819_p0 = por %p3818_p12, %p3817_p10 }
  0x3e   : > { %p3820_p2 = pnand %p3819_p0, %p3813_p5 }
  0x40   : > { %3823 = shalt.err (!%p3820_p2)
}
  0x41   : > { %s4004_s26 = smov 128   ;;  %s4005_s8 = smov 8  }
  0x42   : > { %3293 = dma.hbm_to_vmem [thread:$0]  (!%p4126_p7), %s4122_s11, 2048, %s4124_s28, %s4130_s24, %s4004_s26, %s4004_s26, %s4005_s8  }
  0x43   : > { %p6781_p11 = scmp.ne.s32.totalorder %s6778_s25, 0 }
  0x45   : > { %253 = sbr.rel (%p6781_p11) target bundleno = 1878 (0x756), region = 44 }
  0x4c   : > { %s255_s9 = sand.u32 1, %s3922_s22   ;;  %p6782_p13 = scmp.ne.s32.totalorder %s6777_s5, 0 }
  0x4d   : > { %s3183_s10 = sshll.u32 %s255_s9, 7  ;;  %s256_s27 = scalar_lea.sflag [#allocation3], %s255_s9 }
  0x4e   : > { %s4161_s7 = scalar_lea.vmem [#allocation2], %s3183_s10 }
  0x4f   : > { %3909 = dma.done.wait (%p6782_p13), %s256_s27, 2048  }
  0x50   : > { %3911 = vsyncadd (%p6782_p13), %s256_s27, 4294965248  ;;  %p6783_p3 = scmp.eq.s32.totalorder %s4064_s4, 0 }
  0x52   : > { %3913 = dma.done.wait (%p6783_p3), [#allocation5], 4096   ;;  %p6784_p7 = pmov %p6783_p3 }
  0x53   : > { %p296_p6 = scmp.lt.s32.totalorder %s4064_s4, 1  ;;  %v6610_v0 = vlaneseq  ;;  %v331_v2 = vld [vmem:[#allocation4 + $0x8] sm:$0xff]  ;;  %v330_v7 = vld [vmem:[#allocation4] sm:$0xff]  ;;  %v333_v29 = vld [vmem:[#allocation4 + $0x18] sm:$0xff]  ;;  %vm807_vm0 = vcmask 261120   ;;  %s4404_s15 = smov 0  }
  0x54   : > { %3915 = vsyncadd (%p6784_p7), [#allocation5], 4294963200  ;;  %v339_v3 = vld [vmem:[#allocation4 + $0x48] sm:$0xff]  ;;  %v338_v8 = vld [vmem:[#allocation4 + $0x40] sm:$0xff] }
  0x55   : > { %s7299_s4 = smov (!%p296_p6, %s4064_s4), 1  ;;  %v4179_v1 = vshrl.u32 %v6610_v0, 7  ;;  %v335_v4 = vld [vmem:[#allocation4 + $0x28] sm:$0xff]  ;;  %v3227_v5 = vpack.c.bf16 %v339_v3, %v331_v2  ;;  %v3229_v10 = vpack.c.bf16 %v338_v8, %v330_v7  ;;  %v334_v11 = vld [vmem:[#allocation4 + $0x20] sm:$0xff]  ;;  %v341_v30 = vld [vmem:[#allocation4 + $0x58] sm:$0xff] }
  0x56   : > { %s3187_s25 = sshll.u32 %s7299_s4, 3  ;;  %s3226_s5 = sshll.u32 %s7299_s4, 6  ;;  %v343_v6 = vld [vmem:[#allocation4 + $0x68] sm:$0xff]  ;;  %v342_v12 = vld [vmem:[#allocation4 + $0x60] sm:$0xff]  ;;  %v337_v33 = vld [vmem:[#allocation4 + $0x38] sm:$0xff]  ;;  %v3235_v40 = vpack.c.bf16 %v341_v30, %v333_v29 }
  0x57   : > { %s4176_s30 = scalar_lea.vmem %s6606_s6, %s3187_s25  ;;  %6785 = vst [vmem:[#allocation8_spill] sm:$0xff] %v4179_v1  ;;  %v3243_v9 = vpack.c.bf16 %v343_v6, %v335_v4  ;;  %v347_v13 = vld [vmem:[#allocation4 + $0x88] sm:$0xff]  ;;  %s4184_s13 = scalar_lea.vmem %s6600_s0, %s3226_s5  ;;  %v4187_v14 = vsub.s32 1, %v4179_v1  ;;  %3228 = vmatprep.subr.bf16.mxu1 %v3227_v5  ;;  %v3245_v15 = vpack.c.bf16 %v342_v12, %v334_v11  ;;  %v4190_v19 = vsub.s32 0, %v4179_v1  ;;  %v346_v22 = vld [vmem:[#allocation4 + $0x80] sm:$0xff]  ;;  %v345_v34 = vld [vmem:[#allocation4 + $0x78] sm:$0xff] }
  0x58   : > { %v355_v16 = vld [vmem:[#allocation4 + $0xc8] sm:$0xff]  ;;  %3230 = vmatpush1.bf16.xpose.msra.mxu1 %v3229_v10  ;;  %v354_v23 = vld [vmem:[#allocation4 + $0xc0] sm:$0xff]  ;;  %v4204_v32 = vsub.s32 2, %v4179_v1  ;;  %v3251_v42 = vpack.c.bf16 %v345_v34, %v337_v33  ;;  %v332_v45 = vld [vmem:[#allocation4 + $0x10] sm:$0xff]  ;;  %v4218_v8 = vsub.s32 3, %v4179_v1  ;;  %v4224_v10 = vsub.s32 5, %v4179_v1 }
  0x59   : > { %6786 = vst [vmem:[#allocation9_spill] sm:$0xff] %v4187_v14  ;;  %v351_v17 = vld [vmem:[#allocation4 + $0xa8] sm:$0xff]  ;;  %6787 = vst [vmem:[#allocation10_spill] sm:$0xff] %v4190_v19  ;;  %3244 = vmatprep.subr.bf16.mxu0 %v3243_v9  ;;  %v3231_v20 = vpack.c.bf16 %v355_v16, %v347_v13  ;;  %v350_v24 = vld [vmem:[#allocation4 + $0xa0] sm:$0xff]  ;;  %v3233_v36 = vpack.c.bf16 %v354_v23, %v346_v22  ;;  %v4221_v9 = vsub.s32 4, %v4179_v1  ;;  %v4239_v22 = vsub.s32 7, %v4179_v1 }
  0x5a   : > { %v359_v18 = vld [vmem:[#allocation4 + $0xe8] sm:$0xff]  ;;  %3246 = vmatpush1.bf16.xpose.msra.mxu0 %v3245_v15  ;;  %v358_v25 = vld [vmem:[#allocation4 + $0xe0] sm:$0xff]  ;;  %6788 = vst [vmem:[#allocation11_spill] sm:$0xff] %v4204_v32  ;;  %v340_v46 = vld [vmem:[#allocation4 + $0x50] sm:$0xff] }
  0x5b   : > { %v3247_v21 = vpack.c.bf16 %v359_v18, %v351_v17  ;;  %v307_v26 = vld [vmem:[%s4184_s13 + $0x8] sm:$0xff]  ;;  %v4196_v27 = vld [vmem:[%s6603_s3] sm:$0xff]  ;;  %3232 = vmatprep.subr.bf16.mxu1 %v3231_v20  ;;  %v3249_v39 = vpack.c.bf16 %v358_v25, %v350_v24  ;;  %v336_v47 = vld [vmem:[#allocation4 + $0x30] sm:$0xff]  ;;  %v3237_v55 = vpack.c.bf16 %v340_v46, %v332_v45  ;;  %6789 = vst [vmem:[#allocation12_spill] sm:$0xff] %v4218_v8  ;;  %v4234_v18 = vsub.s32 6, %v4179_v1 }
  0x5c   : > { %v651_v28 = vrot.slane %v4196_v27, %v4187_v14  ;;  %v4201_v31 = vld [vmem:[%s4184_s13 + $0x28] sm:$0xff]  ;;  %426 = vmatprep.mubr.f32.mxu1 %v307_v26  ;;  %v647_v35 = vrot.slane %v4196_v27, %v4190_v19  ;;  %v306_v38 = vld [vmem:[%s4184_s13] sm:$0xff]  ;;  %v655_v43 = vrot.slane %v4196_v27, %v4204_v32  ;;  %v308_v48 = vld [vmem:[%s4184_s13 + $0x10] sm:$0xff]  ;;  %6790 = vst [vmem:[#allocation13_spill] sm:$0xff] %v4221_v9 }
  0x5d   : > { %3248 = vmatprep.subr.bf16.mxu0 %v3247_v21  ;;  %566 = vmatprep.mubr.f32.mxu0 %v4201_v31  ;;  %v344_v49 = vld [vmem:[#allocation4 + $0x70] sm:$0xff]  ;;  %v349_v50 = vld [vmem:[#allocation4 + $0x98] sm:$0xff]  ;;  %v310_v57 = vld [vmem:[%s4184_s13 + $0x20] sm:$0xff]  ;;  %6791 = vst [vmem:[#allocation14_spill] sm:$0xff] %v4224_v10  ;;  %v659_v11 = vrot.slane %v4196_v27, %v4218_v8  ;;  %v663_v12 = vrot.slane %v4196_v27, %v4221_v9 }
  0x5e   : > { %v685_v37 = vmul.f32 %v651_v28, %v307_v26  ;;  %v684_v41 = vmul.f32 %v647_v35, %v306_v38  ;;  %v357_v51 = vld [vmem:[#allocation4 + $0xd8] sm:$0xff]  ;;  %v686_v52 = vmul.f32 %v655_v43, %v308_v48  ;;  %v3253_v58 = vpack.c.bf16 %v344_v49, %v336_v47  ;;  %v348_v63 = vld [vmem:[#allocation4 + $0x90] sm:$0xff]  ;;  %6792 = vst [vmem:[#allocation15_spill] sm:$0xff] %v4234_v18  ;;  %v4245_v45 = vld [vmem:[%s4161_s7 + $0x8] sm:$0xff] }
  0x5f   : > { %v353_v53 = vld [vmem:[#allocation4 + $0xb8] sm:$0xff]  ;;  %v3239_v59 = vpack.c.bf16 %v357_v51, %v349_v50  ;;  %v356_v2 = vld [vmem:[#allocation4 + $0xd0] sm:$0xff]  ;;  %v667_v13 = vrot.slane %v4196_v27, %v4224_v10  ;;  %v688_v16 = vmul.f32 %v663_v12, %v310_v57  ;;  %v671_v21 = vrot.slane %v4196_v27, %v4234_v18  ;;  %6793 = vst [vmem:[#allocation16_spill] sm:$0xff] %v4239_v22  ;;  %v4248_v46 = vld [vmem:[%s4161_s7] sm:$0xff] }
  0x60   : > { %v692_v44 = vadd.f32 %v685_v37, %v684_v41  ;;  %3234 = vmatpush1.bf16.xpose.msra.mxu1 %v3233_v36  ;;  %v361_v54 = vld [vmem:[#allocation4 + $0xf8] sm:$0xff]  ;;  %v352_v3 = vld [vmem:[#allocation4 + $0xb0] sm:$0xff]  ;;  %v3241_v5 = vpack.c.bf16 %v356_v2, %v348_v63  ;;  %v675_v24 = vrot.slane %v4196_v27, %v4239_v22  ;;  %6794 = vst [vmem:[#allocation17_spill] sm:$0xff] %v4245_v45  ;;  %6795 = vst [vmem:[#allocation18_spill] sm:$0xff] %v4248_v46 }
  0x61   : > { %3236 = vmatprep.subr.bf16.mxu1 %v3235_v40  ;;  %v3255_v60 = vpack.c.bf16 %v361_v54, %v353_v53  ;;  %v309_v61 = vld [vmem:[%s4184_s13 + $0x18] sm:$0xff]  ;;  %v360_v4 = vld [vmem:[#allocation4 + $0xf0] sm:$0xff]  ;;  %v689_v17 = vmul.f32 %v667_v13, %v4201_v31  ;;  %v4006_v31 = vmov 1966171168   ;;  %v4280_v12 = vld [vmem:[%s4161_s7 + $0x40] sm:$0xff] }
  0x62   : > { %3250 = vmatpush1.bf16.xpose.msra.mxu0 %v3249_v39  ;;  %v693_v56 = vadd.f32 %v692_v44, %v686_v52  ;;  %v313_v62 = vld [vmem:[%s4184_s13 + $0x38] sm:$0xff]  ;;  %v3257_v6 = vpack.c.bf16 %v360_v4, %v352_v3  ;;  %v312_v7 = vld [vmem:[%s4184_s13 + $0x30] sm:$0xff]  ;;  %v687_v15 = vmul.f32 %v659_v11, %v309_v61  ;;  %v704_v33 = vunpack.c.l.s4 %v4006_v31  ;;  %v4277_v11 = vld [vmem:[%s4161_s7 + $0x48] sm:$0xff]  ;;  %6801 = vst [vmem:[#allocation24_spill] sm:$0xff] %v4280_v12 }
  0x63   : > { %3252 = vmatprep.subr.bf16.mxu0 %v3251_v42  ;;  %v690_v25 = vmul.f32 %v671_v21, %v312_v7  ;;  %v691_v28 = vmul.f32 %v675_v24, %v313_v62  ;;  %v4252_v50 = vld [vmem:[%s4161_s7 + $0x18] sm:$0xff]  ;;  %v4255_v51 = vld [vmem:[%s4161_s7 + $0x10] sm:$0xff]  ;;  %6800 = vst [vmem:[#allocation23_spill] sm:$0xff] %v4277_v11 }
  0x64   : > { %v694_v20 = vadd.f32 %v693_v56, %v687_v15  ;;  %v705_v34 = vunpack.c.0.s8 %v704_v33  ;;  %6796 = vst [vmem:[#allocation19_spill] sm:$0xff] %v4252_v50  ;;  %6797 = vst [vmem:[#allocation20_spill] sm:$0xff] %v4255_v51  ;;  %v4291_v24 = vld [vmem:[%s4161_s7 + $0x30] sm:$0xff]  ;;  %v4299_v33 = vld [vmem:[%s4161_s7 + $0x58] sm:$0xff] }
  0x65   : > { %6803 = vst [vmem:[#allocation26_spill] sm:$0xff] %v4291_v24  ;;  %6804 = vst [vmem:[#allocation27_spill] sm:$0xff] %v4299_v33 }
  0x66   : > { %v695_v23 = vadd.f32 %v694_v20, %v688_v16  ;;  %v708_v36 = vsub.s32 %v705_v34, %v4179_v1  ;;  %v4302_v34 = vld [vmem:[%s4161_s7 + $0x50] sm:$0xff] }
  0x67   : > { %427 = vmatmul.mubr.f32.vlgmr.msra.gmra.mrb[0].mxu1 %v306_v38  ;;  %6805 = vst [vmem:[#allocation28_spill] sm:$0xff] %v4302_v34 }
  0x68   : > { %3238 = vmatpush1.bf16.xpose.msra.mxu1 %v3237_v55  ;;  %496 = vmatprep.mubr.f32.mxu1 %v309_v61  ;;  %v696_v26 = vadd.f32 %v695_v23, %v689_v17  ;;  %v4266_v61 = vld [vmem:[%s4161_s7 + $0x28] sm:$0xff]  ;;  %v4288_v23 = vld [vmem:[%s4161_s7 + $0x38] sm:$0xff] }
  0x69   : > { %567 = vmatmul.mubr.f32.vlgmr.msra.gmra.mrb[0].mxu0 %v310_v57  ;;  %3240 = vmatprep.subr.bf16.mxu1 %v3239_v59  ;;  %6798 = vst [vmem:[#allocation21_spill] sm:$0xff] %v4266_v61  ;;  %6802 = vst [vmem:[#allocation25_spill] sm:$0xff] %v4288_v23 }
  0x6a   : > { %3254 = vmatpush1.bf16.xpose.msra.mxu0 %v3253_v58  ;;  %636 = vmatprep.mubr.f32.mxu0 %v313_v62  ;;  %v697_v29 = vadd.f32 %v696_v26, %v690_v25  ;;  %v4269_v62 = vld [vmem:[%s4161_s7 + $0x20] sm:$0xff] }
  0x6b   : > { %3256 = vmatprep.subr.bf16.mxu0 %v3255_v60  ;;  %6799 = vst [vmem:[#allocation22_spill] sm:$0xff] %v4269_v62 }
  0x6c   : > { %v698_v30 = vadd.f32 %v697_v29, %v691_v28 }
  0x6e   : > { %699 = vadd.xlane.f32.xlu0 %v698_v30 }
  0x70   : > { %3242 = vmatpush1.bf16.xpose.msra.mxu1 %v3241_v5 }
  0x72   : > { %3258 = vmatpush1.bf16.xpose.msra.mxu0 %v3257_v6 }
  0x77   : > { %497 = vmatmul.mubr.f32.vlgmr.msra.gmra.mrb[0].mxu1 %v308_v48 }
  0x79   : > { %637 = vmatmul.mubr.f32.vlgmr.msra.gmra.mrb[0].mxu0 %v312_v7 }
 0x14a   : > { %v498_v35 = vpop.f32.mrb[0].mxu1 }
 0x14b   : > { %v500_v38 = vpop.f32.mrb[1].mxu1 }
 0x14c   : > { %v638_v37 = vpop.f32.mrb[0].mxu0 }
 0x14d   : > { %v3275_v39 = vadd.f32 %v638_v37, %v498_v35  ;;  %v640_v27 = vpop.f32.mrb[1].mxu0 }
 0x14e   : > { %v4310_v27 = vld [vmem:[%s4161_s7 + $0x68] sm:$0xff] }
 0x14f   : > { %v702_v40 = vcombine.high %v3275_v39, %v3275_v39  ;;  %v709_v41 = vrot.slane %v3275_v39, %v708_v36  ;;  %6806 = vst [vmem:[#allocation29_spill] sm:$0xff] %v4310_v27 }
 0x151   : > { %v717_v42 = vcombine.high %v709_v41, %v709_v41  ;;  %v725_v43 = vrot.slane %v709_v41, %v708_v36  ;;  %v716_v44 = vrot.slane %v702_v40, %v708_v36  ;;  %v4313_v41 = vld [vmem:[%s4161_s7 + $0x60] sm:$0xff] }
 0x152   : > { %6807 = vst [vmem:[#allocation30_spill] sm:$0xff] %v4313_v41 }
 0x153   : > { %v754_v47 = vrot.slane %v725_v43, %v4190_v19  ;;  %v739_v48 = vrot.slane %v717_v42, %v708_v36  ;;  %v747_v49 = vcombine.high %v725_v43, %v725_v43  ;;  %v732_v56 = vrot.slane %v716_v44, %v708_v36 }
 0x154   : > { %v718_v63 = vcombine.high %v716_v44, %v716_v44 }
 0x155   : > { %v792_v52 = vmul.f32 %v754_v47, %v4245_v45  ;;  %v791_v53 = vmul.f32 %v754_v47, %v4248_v46  ;;  %v758_v54 = vrot.slane %v739_v48, %v4190_v19  ;;  %v762_v55 = vrot.slane %v747_v49, %v4190_v19  ;;  %v4321_v49 = vld [vmem:[%s4161_s7 + $0x78] sm:$0xff] }
 0x156   : > { %v770_v2 = vrot.slane %v732_v56, %v4190_v19  ;;  %v749_v3 = vcombine.high %v739_v48, %v739_v48  ;;  %v746_v15 = vrot.slane %v718_v63, %v708_v36  ;;  %v748_v26 = vcombine.high %v732_v56, %v732_v56  ;;  %6808 = vst [vmem:[#allocation31_spill] sm:$0xff] %v4321_v49 }
 0x157   : > { %v811_v57 = vsel %vm807_vm0, %v792_v52, 0.0  ;;  %v808_v58 = vsel %vm807_vm0, %v791_v53, 0.0  ;;  %v794_v59 = vmul.f32 %v758_v54, %v4252_v50  ;;  %v793_v60 = vmul.f32 %v758_v54, %v4255_v51  ;;  %v4324_v52 = vld [vmem:[%s4161_s7 + $0x70] sm:$0xff] }
 0x158   : > { %812 = vadd.xlane.f32.xlu1 %v811_v57  ;;  %809 = vadd.xlane.f32.xlu0 %v808_v58  ;;  %v796_v6 = vmul.f32 %v762_v55, %v4266_v61  ;;  %v795_v7 = vmul.f32 %v762_v55, %v4269_v62  ;;  %v800_v13 = vmul.f32 %v770_v2, %v4277_v11 }
 0x159   : > { %v817_v4 = vsel %vm807_vm0, %v794_v59, 0.0  ;;  %v814_v5 = vsel %vm807_vm0, %v793_v60, 0.0  ;;  %v799_v20 = vmul.f32 %v770_v2, %v4280_v12  ;;  %v766_v21 = vrot.slane %v749_v3, %v4190_v19  ;;  %6809 = vst [vmem:[#allocation32_spill] sm:$0xff] %v4324_v52  ;;  %v700_v59 = vpop.xlane.xlu0 %699 }
 0x15a   : > { %v823_v16 = vsel %vm807_vm0, %v796_v6, 0.0  ;;  %v820_v17 = vsel %vm807_vm0, %v795_v7, 0.0  ;;  %v774_v25 = vrot.slane %v746_v15, %v4190_v19  ;;  %v835_v28 = vsel %vm807_vm0, %v800_v13, 0.0 }
 0x15b   : > { %v832_v29 = vsel %vm807_vm0, %v799_v20, 0.0  ;;  %v798_v30 = vmul.f32 %v766_v21, %v4288_v23  ;;  %v797_v31 = vmul.f32 %v766_v21, %v4291_v24  ;;  %v778_v36 = vrot.slane %v748_v26, %v4190_v19 }
 0x15c   : > { %818 = vadd.xlane.f32.xlu0 %v817_v4  ;;  %815 = vadd.xlane.f32.xlu1 %v814_v5  ;;  %v802_v35 = vmul.f32 %v774_v25, %v4299_v33  ;;  %v801_v39 = vmul.f32 %v774_v25, %v4302_v34  ;;  %v750_v40 = vcombine.high %v746_v15, %v746_v15 }
 0x15d   : > { %v829_v37 = vsel %vm807_vm0, %v798_v30, 0.0  ;;  %v826_v38 = vsel %vm807_vm0, %v797_v31, 0.0  ;;  %v804_v42 = vmul.f32 %v778_v36, %v4310_v27  ;;  %v803_v47 = vmul.f32 %v778_v36, %v4313_v41 }
 0x15e   : > { %v841_v43 = vsel %vm807_vm0, %v802_v35, 0.0  ;;  %v838_v44 = vsel %vm807_vm0, %v801_v39, 0.0  ;;  %v782_v48 = vrot.slane %v750_v40, %v4190_v19  ;;  %v860_v60 = vrot.slane %v700_v59, %v4190_v19 }
 0x15f   : > { %v847_v53 = vsel %vm807_vm0, %v804_v42, 0.0  ;;  %v844_v54 = vsel %vm807_vm0, %v803_v47, 0.0  ;;  %v864_v5 = vrot.slane %v700_v59, %v4187_v14  ;;  %v876_v26 = vrot.slane %v700_v59, %v4221_v9 }
 0x160   : > { %824 = vadd.xlane.f32.xlu0 %v823_v16  ;;  %821 = vadd.xlane.f32.xlu1 %v820_v17  ;;  %v806_v55 = vmul.f32 %v782_v48, %v4321_v49  ;;  %v805_v56 = vmul.f32 %v782_v48, %v4324_v52  ;;  %v868_v16 = vrot.slane %v700_v59, %v4204_v32 }
 0x161   : > { %v872_v35 = vrot.slane %v700_v59, %v4218_v8  ;;  %v880_v40 = vrot.slane %v700_v59, %v4224_v10  ;;  %v884_v48 = vrot.slane %v700_v59, %v4234_v18 }
 0x162   : > { %v853_v57 = vsel %vm807_vm0, %v806_v55, 0.0  ;;  %v850_v58 = vsel %vm807_vm0, %v805_v56, 0.0 }
 0x164   : > { %836 = vadd.xlane.f32.xlu0 %v835_v28  ;;  %833 = vadd.xlane.f32.xlu1 %v832_v29 }
 0x168   : > { %830 = vadd.xlane.f32.xlu0 %v829_v37  ;;  %827 = vadd.xlane.f32.xlu1 %v826_v38 }
 0x16c   : > { %842 = vadd.xlane.f32.xlu0 %v841_v43  ;;  %839 = vadd.xlane.f32.xlu1 %v838_v44 }
 0x170   : > { %848 = vadd.xlane.f32.xlu0 %v847_v53  ;;  %845 = vadd.xlane.f32.xlu1 %v844_v54 }
 0x174   : > { %854 = vadd.xlane.f32.xlu0 %v853_v57  ;;  %851 = vadd.xlane.f32.xlu1 %v850_v58  ;;  %v888_v57 = vrot.slane %v700_v59, %v4239_v22  ;;  %v4386_v59 = vmov 0.0  }
 0x1e5   : > { %v813_v63 = vpop.xlane.xlu1 %812  ;;  %v810_v2 = vpop.xlane.xlu0 %809 }
 0x1e6   : > { %v4333_v3 = vadd.f32 %v860_v60, %v813_v63  ;;  %v4335_v4 = vadd.f32 %v860_v60, %v810_v2 }
 0x1e8   : > { %6810 = vst [vmem:[#allocation33_spill] sm:$0xff] %v4333_v3  ;;  %6811 = vst [vmem:[#allocation34_spill] sm:$0xff] %v4335_v4 }
 0x1e9   : > { %v819_v6 = vpop.xlane.xlu0 %818  ;;  %v816_v7 = vpop.xlane.xlu1 %815 }
 0x1ea   : > { %v4338_v13 = vadd.f32 %v864_v5, %v819_v6  ;;  %v4340_v15 = vadd.f32 %v864_v5, %v816_v7  ;;  %v4372_v5 = vmov 0.0   ;;  %v4374_v6 = vmov 0.0  }
 0x1eb   : > { %v4376_v7 = vmov 0.0  }
 0x1ec   : > { %6812 = vst [vmem:[#allocation35_spill] sm:$0xff] %v4338_v13  ;;  %6813 = vst [vmem:[#allocation36_spill] sm:$0xff] %v4340_v15 }
 0x1ed   : > { %v825_v17 = vpop.xlane.xlu0 %824  ;;  %v822_v20 = vpop.xlane.xlu1 %821 }
 0x1ee   : > { %v4343_v21 = vadd.f32 %v868_v16, %v825_v17  ;;  %v4345_v25 = vadd.f32 %v868_v16, %v822_v20  ;;  %v4378_v16 = vmov 0.0   ;;  %v4380_v17 = vmov 0.0  }
 0x1ef   : > { %v4382_v20 = vmov 0.0  }
 0x1f0   : > { %6814 = vst [vmem:[#allocation37_spill] sm:$0xff] %v4343_v21  ;;  %6815 = vst [vmem:[#allocation38_spill] sm:$0xff] %v4345_v25 }
 0x1f1   : > { %v837_v28 = vpop.xlane.xlu0 %836  ;;  %v834_v29 = vpop.xlane.xlu1 %833 }
 0x1f2   : > { %v4348_v30 = vadd.f32 %v876_v26, %v837_v28  ;;  %v4350_v31 = vadd.f32 %v876_v26, %v834_v29  ;;  %v4384_v26 = vmov 0.0   ;;  %v4388_v28 = vmov 0.0  }
 0x1f3   : > { %v4390_v29 = vmov 0.0  }
 0x1f4   : > { %6816 = vst [vmem:[#allocation39_spill] sm:$0xff] %v4348_v30  ;;  %6817 = vst [vmem:[#allocation40_spill] sm:$0xff] %v4350_v31 }
 0x1f5   : > { %v831_v36 = vpop.xlane.xlu0 %830  ;;  %v828_v37 = vpop.xlane.xlu1 %827 }
 0x1f6   : > { %v4353_v38 = vadd.f32 %v872_v35, %v831_v36  ;;  %v4355_v39 = vadd.f32 %v872_v35, %v828_v37  ;;  %v4392_v35 = vmov 0.0   ;;  %v4394_v36 = vmov 0.0  }
 0x1f7   : > { %v4396_v37 = vmov 0.0  }
 0x1f8   : > { %6818 = vst [vmem:[#allocation41_spill] sm:$0xff] %v4353_v38  ;;  %6819 = vst [vmem:[#allocation42_spill] sm:$0xff] %v4355_v39 }
 0x1f9   : > { %v843_v42 = vpop.xlane.xlu0 %842  ;;  %v840_v43 = vpop.xlane.xlu1 %839 }
 0x1fa   : > { %v4358_v44 = vadd.f32 %v880_v40, %v843_v42  ;;  %v4360_v47 = vadd.f32 %v880_v40, %v840_v43  ;;  %v4398_v40 = vmov 0.0   ;;  %v4400_v42 = vmov 0.0  }
 0x1fb   : > { %v4402_v43 = vmov 0.0  }
 0x1fc   : > { %6820 = vst [vmem:[#allocation43_spill] sm:$0xff] %v4358_v44  ;;  %6821 = vst [vmem:[#allocation44_spill] sm:$0xff] %v4360_v47 }
 0x1fd   : > { %v849_v53 = vpop.xlane.xlu0 %848  ;;  %v846_v54 = vpop.xlane.xlu1 %845 }
 0x1fe   : > { %v4363_v55 = vadd.f32 %v884_v48, %v849_v53  ;;  %v4365_v56 = vadd.f32 %v884_v48, %v846_v54 }
 0x200   : > { %6822 = vst [vmem:[#allocation45_spill] sm:$0xff] %v4363_v55  ;;  %6823 = vst [vmem:[#allocation46_spill] sm:$0xff] %v4365_v56 }
 0x201   : > { %v855_v58 = vpop.xlane.xlu0 %854  ;;  %v852_v60 = vpop.xlane.xlu1 %851 }
 0x202   : > { %v4368_v63 = vadd.f32 %v888_v57, %v855_v58  ;;  %v4370_v2 = vadd.f32 %v888_v57, %v852_v60 }
 0x204   : > { %6824 = vst [vmem:[#allocation47_spill] sm:$0xff] %v4368_v63  ;;  %6825 = vst [vmem:[#allocation48_spill] sm:$0xff] %v4370_v2 }
 0x205 LB: >> { %v6826_v62 = vld [vmem:[#allocation22_spill] sm:$0xff]  ;;  %v6827_v61 = vld [vmem:[#allocation21_spill] sm:$0xff]  ;;  %v6828_v52 = vld [vmem:[#allocation32_spill] sm:$0xff]  ;;  %6842 = vst [vmem:[#allocation49_spill] sm:$0xff] %v3934_v5  ;;  %v6617_v48 = vmov 0.0   ;;  %s3188_s16 = sshll.u32 %s3998_s15, 9  ;;  %v3994_v43 = vphi %v4402_v43, %v7267_v43   ;;  %v3990_v42 = vphi %v4400_v42, %v7266_v42   ;;  %v3986_v40 = vphi %v4398_v40, %v7265_v40   ;;  %v3982_v37 = vphi %v4396_v37, %v7264_v37   ;;  %v3978_v36 = vphi %v4394_v36, %v7263_v36   ;;  %v3974_v35 = vphi %v4392_v35, %v7262_v35   ;;  %v3970_v29 = vphi %v4390_v29, %v7261_v29   ;;  %v3966_v28 = vphi %v4388_v28, %v7260_v28   ;;  %v3962_v59 = vphi %v4386_v59, %v7259_v59   ;;  %v3958_v26 = vphi %v4384_v26, %v7258_v26   ;;  %v3954_v20 = vphi %v4382_v20, %v7257_v20   ;;  %v3950_v17 = vphi %v4380_v17, %v7256_v17   ;;  %v3946_v16 = vphi %v4378_v16, %v7255_v16   ;;  %v3942_v7 = vphi %v4376_v7, %v7254_v7   ;;  %v3938_v6 = vphi %v4374_v6, %v7253_v6   ;;  %v3934_v5 = vphi %v4372_v5, %v7252_v5   ;;  %s3998_s15 = sphi %s4404_s15, %s918_s15  }
 0x206   : >> { %v6829_v51 = vld [vmem:[#allocation20_spill] sm:$0xff]  ;;  %v6830_v50 = vld [vmem:[#allocation19_spill] sm:$0xff]  ;;  %v6832_v46 = vld [vmem:[#allocation18_spill] sm:$0xff]  ;;  %6843 = vst [vmem:[#allocation50_spill] sm:$0xff] %v3938_v6  ;;  %1091 = vmatprep.mubr.f32.mxu0 %v6617_v48  ;;  %1252 = vmatprep.mubr.f32.mxu1 %v6617_v48  ;;  %s4460_s17 = sshra.s32 %s3188_s16, 7  ;;  %s918_s15 = sadd.s32 1, %s3998_s15  }
 0x207   : >> { %v6831_v49 = vld [vmem:[#allocation31_spill] sm:$0xff]  ;;  %v6833_v45 = vld [vmem:[#allocation17_spill] sm:$0xff]  ;;  %v6834_v41 = vld [vmem:[#allocation30_spill] sm:$0xff]  ;;  %6844 = vst [vmem:[#allocation51_spill] sm:$0xff] %v3942_v7  ;;  %s3189_s18 = sshll.u32 %s4460_s17, 3  ;;  %s956_s8 = scalar_lea.vmem %s6603_s3, %s4460_s17 }
 0x208   : >> { %v6835_v34 = vld [vmem:[#allocation28_spill] sm:$0xff]  ;;  %v6836_v33 = vld [vmem:[#allocation27_spill] sm:$0xff]  ;;  %v6837_v27 = vld [vmem:[#allocation29_spill] sm:$0xff]  ;;  %6845 = vst [vmem:[#allocation52_spill] sm:$0xff] %v3946_v16  ;;  %s939_s19 = scalar_lea.vmem [#allocation4], %s3189_s18  ;;  %p6354_p8 = scmp.ge.s32.totalorder %s918_s15, 2  }
 0x209   : >> { %v6838_v24 = vld [vmem:[#allocation26_spill] sm:$0xff]  ;;  %v6839_v23 = vld [vmem:[#allocation25_spill] sm:$0xff]  ;;  %v6840_v12 = vld [vmem:[#allocation24_spill] sm:$0xff]  ;;  %6846 = vst [vmem:[#allocation53_spill] sm:$0xff] %v3950_v17 }
 0x20a   : >> { %v6841_v11 = vld [vmem:[#allocation23_spill] sm:$0xff]  ;;  %6847 = vst [vmem:[#allocation54_spill] sm:$0xff] %v3954_v20  ;;  %6848 = vst [vmem:[#allocation55_spill] sm:$0xff] %v3958_v26  ;;  %v941_v53 = vld [vmem:[%s939_s19 + $0x8] sm:$0xff] }
 0x20b   : >> { %6849 = vst [vmem:[#allocation56_spill] sm:$0xff] %v3962_v59  ;;  %6850 = vst [vmem:[#allocation57_spill] sm:$0xff] %v3966_v28  ;;  %v945_v54 = vld [vmem:[%s939_s19 + $0x48] sm:$0xff]  ;;  %v943_v57 = vld [vmem:[%s939_s19 + $0x18] sm:$0xff] }
 0x20c   : >> { %6851 = vst [vmem:[#allocation58_spill] sm:$0xff] %v3970_v29  ;;  %6852 = vst [vmem:[#allocation59_spill] sm:$0xff] %v3974_v35  ;;  %v3259_v58 = vpack.c.bf16 %v945_v54, %v941_v53  ;;  %v947_v60 = vld [vmem:[%s939_s19 + $0x58] sm:$0xff]  ;;  %v940_v0 = vld [vmem:[%s939_s19] sm:$0xff] }
 0x20d   : >> { %6853 = vst [vmem:[#allocation60_spill] sm:$0xff] %v3978_v36  ;;  %6854 = vst [vmem:[#allocation61_spill] sm:$0xff] %v3982_v37  ;;  %v944_v18 = vld [vmem:[%s939_s19 + $0x40] sm:$0xff]  ;;  %v3267_v10 = vpack.c.bf16 %v947_v60, %v943_v57  ;;  %v942_v9 = vld [vmem:[%s939_s19 + $0x10] sm:$0xff] }
 0x20e   : >> { %6855 = vst [vmem:[#allocation62_spill] sm:$0xff] %v3986_v40  ;;  %6856 = vst [vmem:[#allocation63_spill] sm:$0xff] %v3990_v42  ;;  %v3261_v22 = vpack.c.bf16 %v944_v18, %v940_v0  ;;  %v946_v1 = vld [vmem:[%s939_s19 + $0x50] sm:$0xff]  ;;  %v949_v2 = vld [vmem:[%s939_s19 + $0x88] sm:$0xff]  ;;  %3260 = vmatprep.subr.bf16.mxu0 %v3259_v58 }
 0x20f   : >> { %6857 = vst [vmem:[#allocation64_spill] sm:$0xff] %v3994_v43  ;;  %v3269_v48 = vpack.c.bf16 %v946_v1, %v942_v9  ;;  %v953_v63 = vld [vmem:[%s939_s19 + $0xc8] sm:$0xff]  ;;  %v951_v56 = vld [vmem:[%s939_s19 + $0x98] sm:$0xff]  ;;  %3268 = vmatprep.subr.bf16.mxu1 %v3267_v10  ;;  %v948_v31 = vld [vmem:[%s939_s19 + $0x80] sm:$0xff]  ;;  %v6858_v1 = vmov 0.0  }
 0x210   : >> { %v955_v55 = vld [vmem:[%s939_s19 + $0xd8] sm:$0xff]  ;;  %3262 = vmatpush1.bf16.msra.mxu0 %v3261_v22  ;;  %v3263_v47 = vpack.c.bf16 %v953_v63, %v949_v2  ;;  %v952_v30 = vld [vmem:[%s939_s19 + $0xc0] sm:$0xff]  ;;  %v950_v53 = vld [vmem:[%s939_s19 + $0x90] sm:$0xff] }
 0x211   : >> { %v3271_v44 = vpack.c.bf16 %v955_v55, %v951_v56  ;;  %3270 = vmatpush1.bf16.msra.mxu1 %v3269_v48  ;;  %v3265_v54 = vpack.c.bf16 %v952_v30, %v948_v31  ;;  %v954_v39 = vld [vmem:[%s939_s19 + $0xd0] sm:$0xff]  ;;  %v957_v30 = vld [vmem:[%s956_s8] sm:$0xf]  ;;  %v6860_v14 = vld [vmem:[#allocation9_spill] sm:$0xff] }
 0x212   : >> { %3264 = vmatprep.subr.bf16.mxu0 %v3263_v47  ;;  %v3273_v0 = vpack.c.bf16 %v954_v39, %v950_v53  ;;  %v6859_v19 = vld [vmem:[#allocation10_spill] sm:$0xff]  ;;  %v4565_v56 = vrot.slane %v957_v30, %v6860_v14  ;;  %v6861_v32 = vld [vmem:[#allocation11_spill] sm:$0xff]  ;;  %v6862_v8 = vld [vmem:[#allocation12_spill] sm:$0xff] }
 0x213   : >> { %3272 = vmatprep.subr.bf16.mxu1 %v3271_v44  ;;  %v4562_v55 = vrot.slane %v957_v30, %v6859_v19  ;;  %v4576_v53 = vrot.slane %v957_v30, %v6861_v32 }
 0x214   : >> { %3266 = vmatpush1.bf16.msra.mxu0 %v3265_v54 }
 0x215   : >> { %3274 = vmatpush1.bf16.msra.mxu1 %v3273_v0 }
 0x217   : >> { %3190 = vmatmul.mubr.msk.f32.vlgmr.msra.gmra.mrb[0].mxu0 %vm807_vm0, %v6832_v46 }
 0x218   : >> { %3206 = vmatmul.mubr.msk.f32.vlgmr.msra.gmra.mrb[0].mxu1 %vm807_vm0, %v6832_v46  ;;  %1097 = vmatprep.mubr.f32.mxu0 %v6858_v1 }
 0x219   : >> { %1258 = vmatprep.mubr.f32.mxu1 %v6858_v1 }
 0x21b   : >> { %3191 = vmatmul.mubr.msk.f32.gmra.mrb[2].mxu0 %vm807_vm0, %v6833_v45 }
 0x21c   : >> { %3207 = vmatmul.mubr.msk.f32.gmra.mrb[2].mxu1 %vm807_vm0, %v6833_v45  ;;  %1103 = vmatprep.mubr.f32.mxu0 %v6858_v1 }
 0x21d   : >> { %1264 = vmatprep.mubr.f32.mxu1 %v6858_v1 }
 0x21f   : >> { %3192 = vmatmul.mubr.msk.f32.gmra.mrb[4].mxu0 %vm807_vm0, %v6829_v51 }
 0x220   : >> { %3208 = vmatmul.mubr.msk.f32.gmra.mrb[4].mxu1 %vm807_vm0, %v6829_v51  ;;  %1109 = vmatprep.mubr.f32.mxu0 %v6858_v1 }
 0x221   : >> { %1270 = vmatprep.mubr.f32.mxu1 %v6858_v1 }
 0x223   : >> { %3193 = vmatmul.mubr.msk.f32.gmra.mrb[6].mxu0 %vm807_vm0, %v6830_v50 }
 0x224   : >> { %3209 = vmatmul.mubr.msk.f32.gmra.mrb[6].mxu1 %vm807_vm0, %v6830_v50  ;;  %1115 = vmatprep.mubr.f32.mxu0 %v6858_v1 }
 0x225   : >> { %1276 = vmatprep.mubr.f32.mxu1 %v6858_v1 }
 0x227   : >> { %3194 = vmatmul.mubr.msk.f32.gmra.mrb[8].mxu0 %vm807_vm0, %v6826_v62 }
 0x228   : >> { %3210 = vmatmul.mubr.msk.f32.gmra.mrb[8].mxu1 %vm807_vm0, %v6826_v62  ;;  %1121 = vmatprep.mubr.f32.mxu0 %v6858_v1 }
 0x229   : >> { %1282 = vmatprep.mubr.f32.mxu1 %v6858_v1 }
 0x22b   : >> { %3195 = vmatmul.mubr.msk.f32.gmra.mrb[10].mxu0 %vm807_vm0, %v6827_v61 }
 0x22c   : >> { %3211 = vmatmul.mubr.msk.f32.gmra.mrb[10].mxu1 %vm807_vm0, %v6827_v61  ;;  %1127 = vmatprep.mubr.f32.mxu0 %v6858_v1 }
 0x22d   : >> { %1288 = vmatprep.mubr.f32.mxu1 %v6858_v1 }
 0x22f   : >> { %3196 = vmatmul.mubr.msk.f32.gmra.mrb[12].mxu0 %vm807_vm0, %v6838_v24 }
 0x230   : >> { %3212 = vmatmul.mubr.msk.f32.gmra.mrb[12].mxu1 %vm807_vm0, %v6838_v24  ;;  %1133 = vmatprep.mubr.f32.mxu0 %v6858_v1 }
 0x231   : >> { %1294 = vmatprep.mubr.f32.mxu1 %v6858_v1 }
 0x233   : >> { %3197 = vmatmul.mubr.msk.f32.gmra.mrb[14].mxu0 %vm807_vm0, %v6839_v23 }
 0x234   : >> { %3213 = vmatmul.mubr.msk.f32.gmra.mrb[14].mxu1 %vm807_vm0, %v6839_v23  ;;  %1139 = vmatprep.mubr.f32.mxu0 %v6858_v1 }
 0x235   : >> { %1300 = vmatprep.mubr.f32.mxu1 %v6858_v1 }
 0x237   : >> { %3198 = vmatmul.mubr.msk.f32.gmra.mrb[16].mxu0 %vm807_vm0, %v6840_v12 }
 0x238   : >> { %3214 = vmatmul.mubr.msk.f32.gmra.mrb[16].mxu1 %vm807_vm0, %v6840_v12  ;;  %1145 = vmatprep.mubr.f32.mxu0 %v6858_v1  ;;  %v4582_v12 = vrot.slane %v957_v30, %v6862_v8 }
 0x239   : >> { %1306 = vmatprep.mubr.f32.mxu1 %v6858_v1 }
 0x23b   : >> { %3199 = vmatmul.mubr.msk.f32.gmra.mrb[18].mxu0 %vm807_vm0, %v6841_v11 }
 0x23c   : >> { %3215 = vmatmul.mubr.msk.f32.gmra.mrb[18].mxu1 %vm807_vm0, %v6841_v11  ;;  %1151 = vmatprep.mubr.f32.mxu0 %v6858_v1 }
 0x23d   : >> { %1312 = vmatprep.mubr.f32.mxu1 %v6858_v1 }
 0x23f   : >> { %3200 = vmatmul.mubr.msk.f32.gmra.mrb[20].mxu0 %vm807_vm0, %v6835_v34 }
 0x240   : >> { %3216 = vmatmul.mubr.msk.f32.gmra.mrb[20].mxu1 %vm807_vm0, %v6835_v34  ;;  %1157 = vmatprep.mubr.f32.mxu0 %v6858_v1 }
 0x241   : >> { %1318 = vmatprep.mubr.f32.mxu1 %v6858_v1 }
 0x243   : >> { %3201 = vmatmul.mubr.msk.f32.gmra.mrb[22].mxu0 %vm807_vm0, %v6836_v33 }
 0x244   : >> { %3217 = vmatmul.mubr.msk.f32.gmra.mrb[22].mxu1 %vm807_vm0, %v6836_v33  ;;  %1163 = vmatprep.mubr.f32.mxu0 %v6858_v1 }
 0x245   : >> { %1324 = vmatprep.mubr.f32.mxu1 %v6858_v1 }
 0x247   : >> { %3202 = vmatmul.mubr.msk.f32.gmra.mrb[24].mxu0 %vm807_vm0, %v6834_v41 }
 0x248   : >> { %3218 = vmatmul.mubr.msk.f32.gmra.mrb[24].mxu1 %vm807_vm0, %v6834_v41  ;;  %1169 = vmatprep.mubr.f32.mxu0 %v6858_v1 }
 0x249   : >> { %1330 = vmatprep.mubr.f32.mxu1 %v6858_v1 }
 0x24b   : >> { %3203 = vmatmul.mubr.msk.f32.gmra.mrb[26].mxu0 %vm807_vm0, %v6837_v27 }
 0x24c   : >> { %3219 = vmatmul.mubr.msk.f32.gmra.mrb[26].mxu1 %vm807_vm0, %v6837_v27  ;;  %1175 = vmatprep.mubr.f32.mxu0 %v6858_v1 }
 0x24d   : >> { %1336 = vmatprep.mubr.f32.mxu1 %v6858_v1 }
 0x24f   : >> { %3204 = vmatmul.mubr.msk.f32.gmra.mrb[28].mxu0 %vm807_vm0, %v6828_v52 }
 0x250   : >> { %3220 = vmatmul.mubr.msk.f32.gmra.mrb[28].mxu1 %vm807_vm0, %v6828_v52  ;;  %1181 = vmatprep.mubr.f32.mxu0 %v6858_v1 }
 0x251   : >> { %1342 = vmatprep.mubr.f32.mxu1 %v6858_v1 }
 0x253   : >> { %3205 = vmatmul.mubr.msk.f32.gmra.mrb[30].mxu0 %vm807_vm0, %v6831_v49 }
 0x254   : >> { %3221 = vmatmul.mubr.msk.f32.gmra.mrb[30].mxu1 %vm807_vm0, %v6831_v49  ;;  %vm2704_vm0 = vcmask (%p6354_p8), 130112  }
 0x2ea   : >> { %v1093_v9 = vpop.f32.mrb[0].mxu0 }
 0x2eb   : >> { %v1254_v10 = vpop.f32.mrb[0].mxu1  ;;  %v1095_v18 = vpop.f32.mrb[1].mxu0 }
 0x2ec   : >> { %v1256_v22 = vpop.f32.mrb[1].mxu1  ;;  %v4591_v24 = vadd.f32 %v1254_v10, %v4576_v53  ;;  %v4594_v33 = vadd.f32 %v1095_v18, %v4565_v56 }
 0x2ed   : >> { %v4601_v30 = vadd.f32 %v1256_v22, %v4582_v12 }
 0x2ee   : >> { %v1099_v31 = vpop.f32.mrb[2].mxu0  ;;  %6864 = vst [vmem:[#allocation66_spill] sm:$0xff] %v4591_v24  ;;  %6865 = vst [vmem:[#allocation67_spill] sm:$0xff] %v4594_v33  ;;  %v1543_v50 = vand.u32 2147483647, %v4591_v24 }
 0x2ef   : >> { %v1260_v39 = vpop.f32.mrb[2].mxu1  ;;  %v1101_v44 = vpop.f32.mrb[3].mxu0  ;;  %v4568_v2 = vadd.f32 %v1099_v31, %v4562_v55  ;;  %6866 = vst [vmem:[#allocation68_spill] sm:$0xff] %v4601_v30  ;;  %v1544_v22 = vand.u32 2147483647, %v4601_v30 }
 0x2f0   : >> { %v1262_v47 = vpop.f32.mrb[3].mxu1  ;;  %v4571_v57 = vadd.f32 %v1101_v44, %v4565_v56  ;;  %v4586_v44 = vadd.f32 %v1093_v9, %v4562_v55  ;;  %v1607_v25 = vsub.f32 0.0, %v1543_v50 }
 0x2f1   : >> { %v1545_v0 = vand.u32 2147483647, %v4568_v2 }
 0x2f2   : >> { %v1105_v63 = vpop.f32.mrb[4].mxu0  ;;  %v1546_v31 = vand.u32 2147483647, %v4571_v57  ;;  %6863 = vst [vmem:[#allocation65_spill] sm:$0xff] %v4586_v44  ;;  %v1541_v49 = vand.u32 2147483647, %v4586_v44 }
 0x2f3   : >> { %v1266_v48 = vpop.f32.mrb[4].mxu1  ;;  %v1107_v58 = vpop.f32.mrb[5].mxu0  ;;  %v1609_v34 = vsub.f32 0.0, %v1545_v0  ;;  %v1542_v0 = vand.u32 2147483647, %v4594_v33 }
 0x2f4   : >> { %v4573_v60 = vpop.f32.mrb[5].mxu1  ;;  %v1610_v46 = vsub.f32 0.0, %v1546_v31  ;;  %v4619_v31 = vadd.f32 %v1260_v39, %v4576_v53  ;;  %v1605_v32 = vsub.f32 0.0, %v1541_v49  ;;  %v4651_v4 = vadd.f32 %v1107_v58, %v4565_v56 }
 0x2f5   : >> { %v1677_v51 = vmul.f32 1.442695, %v1609_v34  ;;  %v1606_v39 = vsub.f32 0.0, %v1542_v0  ;;  %v1673_v0 = vmul.f32 1.442695, %v1607_v25 }
 0x2f6   : >> { %v1111_v54 = vpop.f32.mrb[6].mxu0  ;;  %6867 = vst [vmem:[#allocation69_spill] sm:$0xff] %v4619_v31  ;;  %v1679_v62 = vmul.f32 1.442695, %v1610_v46  ;;  %v1547_v13 = vand.u32 2147483647, %v4619_v31  ;;  %v4647_v46 = vadd.f32 %v1266_v48, %v4576_v53 }
 0x2f7   : >> { %v4579_v1 = vpop.f32.mrb[6].mxu1  ;;  %v1113_v11 = vpop.f32.mrb[7].mxu0  ;;  %v4607_v10 = vadd.f32 %v1111_v54, %v4562_v55  ;;  %v4622_v54 = vadd.f32 %v1262_v47, %v4582_v12  ;;  %3474 = vpow2.f32 %v1677_v51  ;;  %v4636_v47 = vadd.f32 %v1105_v63, %v4562_v55  ;;  %6871 = vst [vmem:[#allocation73_spill] sm:$0xff] %v4651_v4 }
 0x2f8   : >> { %v4588_v23 = vpop.f32.mrb[7].mxu1  ;;  %v4628_v34 = vadd.f32 %v1113_v11, %v4565_v56  ;;  %v1608_v11 = vsub.f32 0.0, %v1544_v22  ;;  %3476 = vpow2.f32 %v1679_v62  ;;  %v1669_v19 = vmul.f32 1.442695, %v1605_v32  ;;  %6870 = vst [vmem:[#allocation72_spill] sm:$0xff] %v4647_v46 }
 0x2f9   : >> { %6868 = vst [vmem:[#allocation70_spill] sm:$0xff] %v4622_v54  ;;  %v1553_v14 = vand.u32 2147483647, %v4607_v10  ;;  %6869 = vst [vmem:[#allocation71_spill] sm:$0xff] %v4636_v47  ;;  %v1548_v38 = vand.u32 2147483647, %v4622_v54  ;;  %v4672_v32 = vadd.f32 %v4573_v60, %v4582_v12 }
 0x2fa   : >> { %v1117_v27 = vpop.f32.mrb[8].mxu0  ;;  %v1554_v63 = vand.u32 2147483647, %v4628_v34  ;;  %v1671_v5 = vmul.f32 1.442695, %v1606_v39  ;;  %v1611_v7 = vsub.f32 0.0, %v1547_v13  ;;  %3478 = vpow2.f32 %v1669_v19 }
 0x2fb   : >> { %v4596_v41 = vpop.f32.mrb[8].mxu1  ;;  %v4598_v45 = vpop.f32.mrb[9].mxu0  ;;  %v1617_v51 = vsub.f32 0.0, %v1553_v14  ;;  %v4654_v22 = vadd.f32 %v1117_v27, %v4562_v55  ;;  %v1549_v48 = vand.u32 2147483647, %v4636_v47  ;;  %v1612_v25 = vsub.f32 0.0, %v1548_v38 }
 0x2fc   : >> { %v4603_v9 = vpop.f32.mrb[9].mxu1  ;;  %v1675_v14 = vmul.f32 1.442695, %v1608_v11  ;;  %v1551_v27 = vand.u32 2147483647, %v4647_v46  ;;  %v1618_v20 = vsub.f32 0.0, %v1554_v63  ;;  %3480 = vpow2.f32 %v1673_v0 }
 0x2fd   : >> { %6872 = vst [vmem:[#allocation74_spill] sm:$0xff] %v4654_v22  ;;  %v1693_v17 = vmul.f32 1.442695, %v1617_v51  ;;  %v1550_v62 = vand.u32 2147483647, %v4651_v4  ;;  %6873 = vst [vmem:[#allocation75_spill] sm:$0xff] %v4672_v32  ;;  %v4680_v51 = vadd.f32 %v4579_v1, %v4576_v53  ;;  %3482 = vpow2.f32 %v1671_v5 }
 0x2fe   : >> { %v4610_v18 = vpop.f32.mrb[10].mxu0  ;;  %v1557_v13 = vand.u32 2147483647, %v4654_v22  ;;  %v1613_v19 = vsub.f32 0.0, %v1549_v48  ;;  %v1681_v26 = vmul.f32 1.442695, %v1611_v7  ;;  %v4693_v1 = vadd.f32 %v4598_v45, %v4565_v56 }
 0x2ff   : >> { %v4613_v52 = vpop.f32.mrb[10].mxu1  ;;  %v4615_v61 = vpop.f32.mrb[11].mxu0  ;;  %6874 = vst [vmem:[#allocation76_spill] sm:$0xff] %v4680_v51  ;;  %v1683_v59 = vmul.f32 1.442695, %v1612_v25  ;;  %v1615_v0 = vsub.f32 0.0, %v1551_v27  ;;  %3484 = vpow2.f32 %v1693_v17  ;;  %v4704_v17 = vadd.f32 %v4588_v23, %v4582_v12 }
 0x300   : >> { %v4624_v8 = vpop.f32.mrb[11].mxu1  ;;  %v1695_v48 = vmul.f32 1.442695, %v1618_v20  ;;  %3486 = vpow2.f32 %v1675_v14  ;;  %v1614_v35 = vsub.f32 0.0, %v1550_v62  ;;  %v1552_v5 = vand.u32 2147483647, %v4672_v32 }
 0x301   : >> { %v4689_v29 = vpop.eup %3474  ;;  %v1621_v7 = vsub.f32 0.0, %v1557_v13  ;;  %v1685_v36 = vmul.f32 1.442695, %v1613_v19  ;;  %v1555_v27 = vand.u32 2147483647, %v4680_v51  ;;  %6875 = vst [vmem:[#allocation77_spill] sm:$0xff] %v4704_v17  ;;  %3488 = vpow2.f32 %v1681_v26 }
 0x302   : >> { %v4632_v21 = vpop.f32.mrb[12].mxu0  ;;  %v4695_v11 = vpop.eup %3476  ;;  %v1833_v20 = vadd.f32 1.0, %v4689_v29  ;;  %v4712_v14 = vadd.f32 %v4610_v18, %v4562_v55  ;;  %v1689_v37 = vmul.f32 1.442695, %v1615_v0  ;;  %3490 = vpow2.f32 %v1695_v48 }
 0x303   : >> { %v4638_v49 = vpop.f32.mrb[12].mxu1  ;;  %v4640_v3 = vpop.f32.mrb[13].mxu0  ;;  %v1842_v25 = vadd.f32 1.0, %v4695_v11  ;;  %v1558_v23 = vand.u32 2147483647, %v4693_v1  ;;  %3492 = vpow2.f32 %v1683_v59  ;;  %v1616_v42 = vsub.f32 0.0, %v1552_v5 }
 0x304   : >> { %v4644_v50 = vpop.f32.mrb[13].mxu1  ;;  %6876 = vst [vmem:[#allocation78_spill] sm:$0xff] %v4712_v14  ;;  %v1687_v40 = vmul.f32 1.442695, %v1614_v35  ;;  %v1701_v26 = vmul.f32 1.442695, %v1621_v7  ;;  %v4720_v43 = vpop.eup %3478  ;;  %3494 = vpow2.f32 %v1685_v36  ;;  %v4730_v0 = vadd.f32 %v4596_v41, %v4576_v53 }
 0x305   : >> { %6877 = vst [vmem:[#allocation79_spill] sm:$0xff] %v4720_v43  ;;  %v1619_v62 = vsub.f32 0.0, %v1555_v27  ;;  %v1556_v46 = vand.u32 2147483647, %v4704_v17  ;;  %3496 = vlog2.f32 %v1833_v20  ;;  %v1561_v59 = vand.u32 2147483647, %v4712_v14 }
 0x306   : >> { %v4656_v15 = vpop.f32.mrb[14].mxu0  ;;  %6878 = vst [vmem:[#allocation80_spill] sm:$0xff] %v4730_v0  ;;  %v4735_v35 = vadd.f32 %v4615_v61, %v4565_v56  ;;  %v4741_v5 = vpop.eup %3480  ;;  %v1836_v7 = vmul.f32 -0.5, %v4689_v29  ;;  %3498 = vlog2.f32 %v1842_v25  ;;  %v1622_v20 = vsub.f32 0.0, %v1558_v23 }
 0x307   : >> { %v4661_v6 = vpop.f32.mrb[14].mxu1  ;;  %v4663_v16 = vpop.f32.mrb[15].mxu0  ;;  %6880 = vst [vmem:[#allocation82_spill] sm:$0xff] %v4741_v5  ;;  %v1691_v18 = vmul.f32 1.442695, %v1616_v42  ;;  %3500 = vpow2.f32 %v1701_v26  ;;  %v1845_v30 = vmul.f32 -0.5, %v4695_v11 }
 0x308   : >> { %v4665_v58 = vpop.f32.mrb[15].mxu1  ;;  %6879 = vst [vmem:[#allocation81_spill] sm:$0xff] %v4735_v35  ;;  %v4745_v41 = vpop.eup %3482  ;;  %3502 = vpow2.f32 %v1689_v37  ;;  %v1697_v24 = vmul.f32 1.442695, %v1619_v62  ;;  %v1620_v25 = vsub.f32 0.0, %v1556_v46  ;;  %v1625_v4 = vsub.f32 0.0, %v1561_v59 }
 0x309   : >> { %6881 = vst [vmem:[#allocation83_spill] sm:$0xff] %v4745_v41  ;;  %v4751_v31 = vpop.eup %3484  ;;  %3504 = vpow2.f32 %v1687_v40  ;;  %v1559_v42 = vand.u32 2147483647, %v4730_v0  ;;  %v1562_v26 = vand.u32 2147483647, %v4735_v35  ;;  %v1837_v51 = vadd.f32 1.0, %v1836_v7 }
 0x30a   : >> { %v4675_v38 = vpop.f32.mrb[16].mxu0  ;;  %v4758_v27 = vpop.eup %3486  ;;  %v1839_v44 = vand.u32 2147483647, %v4689_v29  ;;  %v1703_v37 = vmul.f32 1.442695, %v1622_v20  ;;  %v4767_v46 = vadd.f32 %v4603_v9, %v4582_v12  ;;  %3506 = vpow2.f32 %v1691_v18 }
 0x30b   : >> { %v4682_v63 = vpop.f32.mrb[16].mxu1  ;;  %v4684_v39 = vpop.f32.mrb[17].mxu0  ;;  %6884 = vst [vmem:[#allocation86_spill] sm:$0xff] %v4758_v27  ;;  %v1848_v27 = vand.u32 2147483647, %v4695_v11  ;;  %v1905_v40 = vadd.f32 1.0, %v4751_v31  ;;  %v4781_v9 = vadd.f32 %v4632_v21, %v4562_v55  ;;  %3508 = vpow2.f32 %v1697_v24 }
 0x30c   : >> { %v4687_v28 = vpop.f32.mrb[17].mxu1  ;;  %6886 = vst [vmem:[#allocation88_spill] sm:$0xff] %v4767_v46  ;;  %v4769_v62 = vpop.eup %3488  ;;  %v1846_v7 = vadd.f32 1.0, %v1845_v30  ;;  %v1623_v59 = vsub.f32 0.0, %v1559_v42  ;;  %v1709_v17 = vmul.f32 1.442695, %v1625_v4  ;;  %3510 = vpow2.f32 %v1703_v37 }
 0x30d   : >> { %6887 = vst [vmem:[#allocation89_spill] sm:$0xff] %v4769_v62  ;;  %v4776_v41 = vpop.eup %3490  ;;  %6889 = vst [vmem:[#allocation91_spill] sm:$0xff] %v4781_v9  ;;  %vm4796_vm1 = vcmp.lt.f32.partialorder %v1839_v44, 0.0004427343  ;;  %v1560_v20 = vand.u32 2147483647, %v4767_v46  ;;  %v4803_v24 = vadd.f32 %v4613_v52, %v4576_v53  ;;  %3512 = vlog2.f32 %v1905_v40 }
 0x30e   : >> { %v4698_v60 = vpop.f32.mrb[18].mxu0  ;;  %v4787_v18 = vpop.eup %3492  ;;  %vm4805_vm2 = vcmp.lt.f32.partialorder %v1848_v27, 0.0004427343  ;;  %v1914_v44 = vadd.f32 1.0, %v4776_v41  ;;  %v1847_v37 = vmul.f32 %v4695_v11, %v1846_v7  ;;  %v1565_v52 = vand.u32 2147483647, %v4781_v9 }
 0x30f   : >> { %v4706_v45 = vpop.f32.mrb[18].mxu1  ;;  %v4714_v13 = vpop.f32.mrb[19].mxu0  ;;  %6892 = vst [vmem:[#allocation94_spill] sm:$0xff] %v4787_v18  ;;  %6897 = vst [vmem:[#allocation97_spill] sm:$0xff] %v4803_v24  ;;  %v1705_v27 = vmul.f32 1.442695, %v1623_v59  ;;  %v4820_v40 = vadd.f32 %v4640_v3, %v4565_v56  ;;  %v4870_v42 = vadd.f32 %v4638_v49, %v4576_v53 }
 0x310   : >> { %v4716_v19 = vpop.f32.mrb[19].mxu1  ;;  %v4791_v30 = vpop.eup %3494  ;;  %v1563_v7 = vand.u32 2147483647, %v4803_v24 }
 0x311   : >> { %6894 = vst [vmem:[#allocation96_spill] sm:$0xff] %v4791_v30  ;;  %v3497_v4 = vpop.eup %3496  ;;  %6901 = vst [vmem:[#allocation99_spill] sm:$0xff] %v4820_v40 }
 0x312   : >> { %v4724_v47 = vpop.f32.mrb[20].mxu0  ;;  %v1835_v0 = vmul.f32 0.6931472, %v3497_v4  ;;  %v1566_v4 = vand.u32 2147483647, %v4820_v40  ;;  %6912 = vst [vmem:[#allocation108_spill] sm:$0xff] %v4870_v42 }
 0x313   : >> { %v4726_v32 = vpop.f32.mrb[20].mxu1  ;;  %v4737_v36 = vpop.f32.mrb[21].mxu0 }
 0x314   : >> { %v4739_v48 = vpop.f32.mrb[21].mxu1 }
 0x316   : >> { %v4749_v54 = vpop.f32.mrb[22].mxu0 }
 0x317   : >> { %v4754_v33 = vpop.f32.mrb[22].mxu1  ;;  %v4756_v23 = vpop.f32.mrb[23].mxu0 }
 0x318   : >> { %6882 = vst [vmem:[#allocation84_spill] sm:$0xff] %v4754_v33  ;;  %6883 = vst [vmem:[#allocation85_spill] sm:$0xff] %v4756_v23  ;;  %v4762_v61 = vpop.f32.mrb[23].mxu1 }
 0x319   : >> { %6885 = vst [vmem:[#allocation87_spill] sm:$0xff] %v4762_v61  ;;  %v1699_v61 = vmul.f32 1.442695, %v1620_v25  ;;  %v4794_v25 = vmul.f32 %v4689_v29, %v1837_v51  ;;  %v1908_v29 = vmul.f32 -0.5, %v4751_v31 }
 0x31a   : >> { %v4774_v5 = vpop.f32.mrb[24].mxu0 }
 0x31b   : >> { %6888 = vst [vmem:[#allocation90_spill] sm:$0xff] %v4774_v5  ;;  %v4783_v62 = vpop.f32.mrb[24].mxu1  ;;  %v4785_v43 = vpop.f32.mrb[25].mxu0  ;;  %v1626_v5 = vsub.f32 0.0, %v1562_v26  ;;  %3514 = vpow2.f32 %v1699_v61  ;;  %v1624_v61 = vsub.f32 0.0, %v1560_v20  ;;  %v1909_v59 = vadd.f32 1.0, %v1908_v29 }
 0x31c   : >> { %6890 = vst [vmem:[#allocation92_spill] sm:$0xff] %v4783_v62  ;;  %6891 = vst [vmem:[#allocation93_spill] sm:$0xff] %v4785_v43  ;;  %v4789_v33 = vpop.f32.mrb[25].mxu1  ;;  %v3499_v26 = vpop.eup %3498  ;;  %3516 = vpow2.f32 %v1709_v17  ;;  %v1917_v20 = vmul.f32 -0.5, %v4776_v41 }
 0x31d   : >> { %6893 = vst [vmem:[#allocation95_spill] sm:$0xff] %v4789_v33  ;;  %v4816_v33 = vpop.eup %3500  ;;  %v1711_v18 = vmul.f32 1.442695, %v1626_v5  ;;  %v1844_v43 = vmul.f32 0.6931472, %v3499_v26  ;;  %3518 = vlog2.f32 %v1914_v44  ;;  %v4833_v5 = vadd.f32 %v4624_v8, %v4582_v12 }
 0x31e   : >> { %v4811_v51 = vpop.f32.mrb[26].mxu0  ;;  %v4822_v62 = vpop.eup %3502  ;;  %v1941_v17 = vadd.f32 1.0, %v4816_v33  ;;  %v1707_v29 = vmul.f32 1.442695, %v1624_v61  ;;  %v1627_v26 = vsub.f32 0.0, %v1563_v7  ;;  %v1910_v11 = vmul.f32 %v4751_v31, %v1909_v59 }
 0x31f   : >> { %6900 = vst [vmem:[#allocation98_spill] sm:$0xff] %v4811_v51  ;;  %6902 = vst [vmem:[#allocation100_spill] sm:$0xff] %v4822_v62  ;;  %v1911_v51 = vand.u32 2147483647, %v4751_v31  ;;  %v4827_v30 = vpop.eup %3504  ;;  %v1629_v62 = vsub.f32 0.0, %v1565_v52  ;;  %3520 = vpow2.f32 %v1711_v18  ;;  %v4841_v3 = vpop.f32.mrb[26].mxu1  ;;  %v1841_v52 = vsel %vm4796_vm1, %v4794_v25, %v1835_v0 }
 0x320   : >> { %6903 = vst [vmem:[#allocation101_spill] sm:$0xff] %v4827_v30  ;;  %6904 = vst [vmem:[#allocation102_spill] sm:$0xff] %v4833_v5  ;;  %v4835_v23 = vpop.eup %3506  ;;  %3522 = vpow2.f32 %v1705_v27  ;;  %v4843_v46 = vpop.f32.mrb[27].mxu0  ;;  %v1850_v18 = vsel %vm4805_vm2, %v1847_v37, %v1844_v43  ;;  %v1920_v61 = vand.u32 2147483647, %v4776_v41  ;;  %v4863_v0 = vadd.f32 %v4656_v15, %v4562_v55 }
 0x321   : >> { %6905 = vst [vmem:[#allocation103_spill] sm:$0xff] %v4835_v23  ;;  %6906 = vst [vmem:[#allocation104_spill] sm:$0xff] %v4841_v3  ;;  %v4845_v8 = vpop.eup %3508  ;;  %vm4853_vm3 = vcmp.lt.f32.partialorder %v1911_v51, 0.0004427343  ;;  %3524 = vlog2.f32 %v1941_v17  ;;  %v1564_v44 = vand.u32 2147483647, %v4833_v5  ;;  %v4897_v3 = vadd.f32 %v4644_v50, %v4582_v12 }
 0x322   : >> { %6907 = vst [vmem:[#allocation105_spill] sm:$0xff] %v4845_v8  ;;  %v4858_v7 = vpop.eup %3510  ;;  %v1717_v24 = vmul.f32 1.442695, %v1629_v62  ;;  %6910 = vst [vmem:[#allocation106_spill] sm:$0xff] %v4863_v0  ;;  %v4865_v25 = vpop.f32.mrb[27].mxu1  ;;  %v1918_v31 = vadd.f32 1.0, %v1917_v20  ;;  %3526 = vpow2.f32 %v1707_v29  ;;  %v4901_v29 = vadd.f32 %v4663_v16, %v4565_v56 }
 0x323   : >> { %6911 = vst [vmem:[#allocation107_spill] sm:$0xff] %v4865_v25  ;;  %v3513_v43 = vpop.eup %3512  ;;  %v1944_v21 = vmul.f32 -0.5, %v4816_v33  ;;  %v1630_v51 = vsub.f32 0.0, %v1566_v4  ;;  %v6914_v59 = vmax.f32 %v4568_v2, 0.0  ;;  %v6915_v15 = vmax.f32 %v4571_v57, 0.0  ;;  %6918 = vst [vmem:[#allocation110_spill] sm:$0xff] %v4897_v3 }
 0x324   : >> { %v1713_v8 = vmul.f32 1.442695, %v1627_v26  ;;  %vm4885_vm4 = vcmp.lt.f32.partialorder %v1920_v61, 0.0004427343  ;;  %v1947_v49 = vand.u32 2147483647, %v4816_v33  ;;  %3528 = vpow2.f32 %v1717_v24 }
 0x325   : >> { %v4872_v37 = vpop.eup %3514  ;;  %v4876_v62 = vadd.f32 %v1841_v52, %v6914_v59  ;;  %v4880_v17 = vadd.f32 %v1850_v18, %v6915_v15  ;;  %v1950_v4 = vadd.f32 1.0, %v4858_v7  ;;  %v1907_v52 = vmul.f32 0.6931472, %v3513_v43  ;;  %6919 = vst [vmem:[#allocation111_spill] sm:$0xff] %v4901_v29  ;;  %v4903_v24 = vpop.f32.mrb[28].mxu0 }
 0x326   : >> { %6913 = vst [vmem:[#allocation109_spill] sm:$0xff] %v4872_v37  ;;  %v4883_v23 = vpop.eup %3516  ;;  %v1628_v59 = vsub.f32 0.0, %v1564_v44  ;;  %v1569_v18 = vand.u32 2147483647, %v4863_v0  ;;  %v1919_v26 = vmul.f32 %v4776_v41, %v1918_v31  ;;  %v1945_v20 = vadd.f32 1.0, %v1944_v21  ;;  %6920 = vst [vmem:[#allocation112_spill] sm:$0xff] %v4903_v24 }
 0x327   : >> { %v3519_v15 = vpop.eup %3518  ;;  %v1567_v37 = vand.u32 2147483647, %v4870_v42  ;;  %v1719_v61 = vmul.f32 1.442695, %v1630_v51  ;;  %v1977_v25 = vadd.f32 1.0, %v4883_v23  ;;  %3530 = vpow2.f32 %v1713_v8 }
 0x328   : >> { %3532 = vlog2.f32 %v1950_v4  ;;  %v1633_v31 = vsub.f32 0.0, %v1569_v18  ;;  %v1913_v50 = vsel %vm4853_vm3, %v1910_v11, %v1907_v52  ;;  %v1916_v8 = vmul.f32 0.6931472, %v3519_v15 }
 0x329   : >> { %v4905_v44 = vpop.eup %3520  ;;  %vm4913_vm5 = vcmp.lt.f32.partialorder %v1947_v49, 0.0004427343  ;;  %v1953_v16 = vmul.f32 -0.5, %v4858_v7  ;;  %v1715_v24 = vmul.f32 1.442695, %v1628_v59  ;;  %v1946_v4 = vmul.f32 %v4816_v33, %v1945_v20 }
 0x32a   : >> { %v4909_v21 = vpop.eup %3522  ;;  %v1631_v5 = vsub.f32 0.0, %v1567_v37  ;;  %3534 = vpow2.f32 %v1719_v61  ;;  %v1986_v43 = vadd.f32 1.0, %v4905_v44  ;;  %v1568_v11 = vand.u32 2147483647, %v4897_v3 }
 0x32b   : >> { %6921 = vst [vmem:[#allocation113_spill] sm:$0xff] %v4909_v21  ;;  %v3525_v18 = vpop.eup %3524  ;;  %3536 = vlog2.f32 %v1977_v25  ;;  %v1570_v27 = vand.u32 2147483647, %v4901_v29  ;;  %v6924_v49 = vmax.f32 %v4607_v10, 0.0  ;;  %v1980_v59 = vmul.f32 -0.5, %v4883_v23 }
 0x32c   : >> { %v1725_v15 = vmul.f32 1.442695, %v1633_v31  ;;  %v4930_v33 = vadd.f32 %v4675_v38, %v4562_v55  ;;  %v1922_v25 = vsel %vm4885_vm4, %v1919_v26, %v1916_v8  ;;  %v1954_v37 = vadd.f32 1.0, %v1953_v16  ;;  %v4935_v61 = vpop.eup %3526 }
 0x32d   : >> { %v4925_v52 = vadd.f32 %v1913_v50, %v6924_v49  ;;  %v1956_v20 = vand.u32 2147483647, %v4858_v7  ;;  %3538 = vpow2.f32 %v1715_v24  ;;  %6927 = vst [vmem:[#allocation116_spill] sm:$0xff] %v4935_v61  ;;  %v1943_v41 = vmul.f32 0.6931472, %v3525_v18 }
 0x32e   : >> { %6926 = vst [vmem:[#allocation115_spill] sm:$0xff] %v4930_v33  ;;  %v1983_v50 = vand.u32 2147483647, %v4883_v23  ;;  %v4940_v49 = vadd.f32 %v4661_v6, %v4576_v53  ;;  %v1573_v31 = vand.u32 2147483647, %v4930_v33  ;;  %v4943_v38 = vpop.eup %3528  ;;  %3540 = vlog2.f32 %v1986_v43 }
 0x32f   : >> { %6925 = vst [vmem:[#allocation114_spill] sm:$0xff] %v4925_v52  ;;  %v1721_v30 = vmul.f32 1.442695, %v1631_v5  ;;  %v1632_v26 = vsub.f32 0.0, %v1568_v11  ;;  %v1634_v8 = vsub.f32 0.0, %v1570_v27  ;;  %v1981_v16 = vadd.f32 1.0, %v1980_v59 }
 0x330   : >> { %6928 = vst [vmem:[#allocation117_spill] sm:$0xff] %v4940_v49  ;;  %3542 = vpow2.f32 %v1725_v15  ;;  %v1637_v42 = vsub.f32 0.0, %v1573_v31  ;;  %v6930_v61 = vmax.f32 %v4628_v34, 0.0  ;;  %v4953_v6 = vmul.f32 %v4858_v7, %v1954_v37 }
 0x331   : >> { %v4946_v18 = vpop.eup %3530  ;;  %vm4955_vm6 = vcmp.lt.f32.partialorder %v1956_v20, 0.0004427343  ;;  %v4961_v5 = vadd.f32 %v4684_v39, %v4565_v56  ;;  %v1949_v11 = vsel %vm4913_vm5, %v1946_v4, %v1943_v41  ;;  %v2013_v27 = vadd.f32 1.0, %v4943_v38 }
 0x332   : >> { %6929 = vst [vmem:[#allocation118_spill] sm:$0xff] %v4946_v18  ;;  %v4950_v21 = vadd.f32 %v1922_v25, %v6930_v61  ;;  %v3533_v43 = vpop.eup %3532  ;;  %v1571_v59 = vand.u32 2147483647, %v4940_v49  ;;  %v4969_v7 = vadd.f32 %v4665_v58, %v4582_v12  ;;  %vm4971_vm7 = vcmp.lt.f32.partialorder %v1983_v50, 0.0004427343  ;;  %v4981_v58 = vpop.f32.mrb[28].mxu1 }
 0x333   : >> { %6933 = vst [vmem:[#allocation119_spill] sm:$0xff] %v4961_v5  ;;  %v1992_v25 = vand.u32 2147483647, %v4905_v44  ;;  %3544 = vpow2.f32 %v1721_v30  ;;  %v1723_v39 = vmul.f32 1.442695, %v1632_v26  ;;  %v1982_v41 = vmul.f32 %v4883_v23, %v1981_v16  ;;  %v4991_v23 = vpop.f32.mrb[29].mxu1 }
 0x334   : >> { %6934 = vst [vmem:[#allocation120_spill] sm:$0xff] %v4969_v7  ;;  %v1727_v37 = vmul.f32 1.442695, %v1634_v8  ;;  %v4976_v20 = vpop.eup %3534  ;;  %v1733_v4 = vmul.f32 1.442695, %v1637_v42  ;;  %v6937_v31 = vmax.f32 %v4654_v22, 0.0  ;;  %3546 = vlog2.f32 %v2013_v27 }
 0x335   : >> { %v1574_v61 = vand.u32 2147483647, %v4961_v5  ;;  %v3537_v50 = vpop.eup %3536  ;;  %v1952_v18 = vmul.f32 0.6931472, %v3533_v43  ;;  %v1989_v30 = vmul.f32 -0.5, %v4905_v44  ;;  %v4989_v8 = vpop.f32.mrb[29].mxu0  ;;  %v4999_v43 = vadd.f32 %v4682_v63, %v4576_v53 }
 0x336   : >> { %v4985_v24 = vadd.f32 %v1949_v11, %v6937_v31  ;;  %v1635_v42 = vsub.f32 0.0, %v1571_v59  ;;  %v1572_v16 = vand.u32 2147483647, %v4969_v7  ;;  %v2022_v22 = vadd.f32 1.0, %v4976_v20 }
 0x337   : >> { %v1638_v51 = vsub.f32 0.0, %v1574_v61  ;;  %v4994_v3 = vpop.eup %3538  ;;  %3548 = vpow2.f32 %v1727_v37  ;;  %6940 = vst [vmem:[#allocation123_spill] sm:$0xff] %v4999_v43  ;;  %v5003_v11 = vadd.f32 %v4698_v60, %v4562_v55  ;;  %v1979_v31 = vmul.f32 0.6931472, %v3537_v50 }
 0x338   : >> { %6938 = vst [vmem:[#allocation121_spill] sm:$0xff] %v4985_v24  ;;  %6939 = vst [vmem:[#allocation122_spill] sm:$0xff] %v4994_v3  ;;  %v2016_v27 = vmul.f32 -0.5, %v4943_v38  ;;  %3550 = vpow2.f32 %v1733_v4  ;;  %v3541_v26 = vpop.eup %3540  ;;  %v1990_v61 = vadd.f32 1.0, %v1989_v30  ;;  %vm5006_vm8 = vcmp.lt.f32.partialorder %v1992_v25, 0.0004427343 }
 0x339   : >> { %6941 = vst [vmem:[#allocation124_spill] sm:$0xff] %v5003_v11  ;;  %v1735_v59 = vmul.f32 1.442695, %v1638_v51  ;;  %3552 = vpow2.f32 %v1723_v39  ;;  %v1958_v60 = vsel %vm4955_vm6, %v4953_v6, %v1952_v18  ;;  %v2019_v50 = vand.u32 2147483647, %v4943_v38 }
 0x33a   : >> { %v5011_v63 = vpop.eup %3542  ;;  %v1636_v51 = vsub.f32 0.0, %v1572_v16  ;;  %3554 = vlog2.f32 %v2022_v22  ;;  %v1729_v30 = vmul.f32 1.442695, %v1635_v42  ;;  %v1575_v25 = vand.u32 2147483647, %v4999_v43 }
 0x33b   : >> { %v1577_v24 = vand.u32 2147483647, %v5003_v11  ;;  %v1985_v39 = vsel %vm4971_vm7, %v1982_v41, %v1979_v31  ;;  %v2017_v37 = vadd.f32 1.0, %v2016_v27  ;;  %3556 = vpow2.f32 %v1735_v59  ;;  %v5036_v27 = vpop.f32.mrb[30].mxu0 }
 0x33c   : >> { %v5024_v52 = vadd.f32 %v4714_v13, %v4565_v56  ;;  %v1988_v6 = vmul.f32 0.6931472, %v3541_v26  ;;  %v2025_v16 = vmul.f32 -0.5, %v4976_v20  ;;  %v2049_v22 = vadd.f32 1.0, %v5011_v63 }
 0x33d   : >> { %v5026_v18 = vpop.eup %3544  ;;  %v1641_v42 = vsub.f32 0.0, %v1577_v24  ;;  %v6945_v4 = vmax.f32 %v4693_v1, 0.0  ;;  %v1991_v15 = vmul.f32 %v4905_v44, %v1990_v61  ;;  %v1731_v31 = vmul.f32 1.442695, %v1636_v51 }
 0x33e   : >> { %6944 = vst [vmem:[#allocation125_spill] sm:$0xff] %v5026_v18  ;;  %v6947_v13 = vmax.f32 %v4712_v14, 0.0  ;;  %vm5042_vm9 = vcmp.lt.f32.partialorder %v2019_v50, 0.0004427343  ;;  %3558 = vpow2.f32 %v1729_v30  ;;  %v1639_v24 = vsub.f32 0.0, %v1575_v25  ;;  %v3547_v18 = vpop.eup %3546 }
 0x33f   : >> { %v5032_v49 = vadd.f32 %v1958_v60, %v6945_v4  ;;  %v2028_v60 = vand.u32 2147483647, %v4976_v20  ;;  %v5049_v44 = vadd.f32 %v4687_v28, %v4582_v12  ;;  %v1741_v61 = vmul.f32 1.442695, %v1641_v42 }
 0x340   : >> { %v5040_v59 = vadd.f32 %v1985_v39, %v6947_v13  ;;  %v1578_v4 = vand.u32 2147483647, %v5024_v52  ;;  %v1994_v50 = vsel %vm5006_vm8, %v1991_v15, %v1988_v6  ;;  %v2018_v39 = vmul.f32 %v4943_v38, %v2017_v37 }
 0x341   : >> { %6946 = vst [vmem:[#allocation126_spill] sm:$0xff] %v5032_v49  ;;  %6951 = vst [vmem:[#allocation128_spill] sm:$0xff] %v5049_v44  ;;  %v5052_v51 = vpop.eup %3548  ;;  %v2026_v13 = vadd.f32 1.0, %v2025_v16  ;;  %3560 = vlog2.f32 %v2049_v22  ;;  %v5063_v42 = vadd.f32 %v4706_v45, %v4576_v53  ;;  %v2015_v7 = vmul.f32 0.6931472, %v3547_v18 }
 0x342   : >> { %6948 = vst [vmem:[#allocation127_spill] sm:$0xff] %v5040_v59  ;;  %v5057_v30 = vpop.eup %3550  ;;  %3562 = vpow2.f32 %v1731_v31  ;;  %v1737_v3 = vmul.f32 1.442695, %v1639_v24  ;;  %v1642_v6 = vsub.f32 0.0, %v1578_v4  ;;  %v6954_v38 = vmax.f32 %v4735_v35, 0.0  ;;  %v5078_v31 = vpop.f32.mrb[30].mxu1 }
 0x343   : >> { %6952 = vst [vmem:[#allocation129_spill] sm:$0xff] %v5063_v42  ;;  %v5065_v41 = vpop.eup %3552  ;;  %3564 = vpow2.f32 %v1741_v61  ;;  %vm5071_vm10 = vcmp.lt.f32.partialorder %v2028_v60, 0.0004427343  ;;  %v2052_v22 = vmul.f32 -0.5, %v5011_v63  ;;  %v2058_v15 = vadd.f32 1.0, %v5052_v51 }
 0x344   : >> { %6953 = vst [vmem:[#allocation130_spill] sm:$0xff] %v5065_v41  ;;  %v5069_v37 = vadd.f32 %v1994_v50, %v6954_v38  ;;  %v1576_v45 = vand.u32 2147483647, %v5049_v44  ;;  %v3555_v18 = vpop.eup %3554  ;;  %v2027_v24 = vmul.f32 %v4976_v20, %v2026_v13  ;;  %v2085_v61 = vadd.f32 1.0, %v5057_v30  ;;  %v5087_v50 = vpop.f32.mrb[31].mxu0 }
 0x345   : >> { %v5085_v60 = vadd.f32 %v4716_v19, %v4582_v12  ;;  %v5089_v38 = vpop.eup %3556  ;;  %v2055_v28 = vand.u32 2147483647, %v5011_v63  ;;  %v1579_v43 = vand.u32 2147483647, %v5063_v42  ;;  %v5096_v20 = vadd.f32 %v4724_v47, %v4562_v55  ;;  %v5098_v13 = vpop.f32.mrb[31].mxu1 }
 0x346   : >> { %6955 = vst [vmem:[#allocation131_spill] sm:$0xff] %v5069_v37  ;;  %v2021_v19 = vsel %vm5042_vm9, %v2018_v39, %v2015_v7  ;;  %v2061_v4 = vmul.f32 -0.5, %v5052_v51  ;;  %3566 = vpow2.f32 %v1737_v3  ;;  %v1743_v41 = vmul.f32 1.442695, %v1642_v6  ;;  %v6981_v3 = vld [vmem:[#allocation79_spill] sm:$0xff] }
 0x347   : >> { %6958 = vst [vmem:[#allocation132_spill] sm:$0xff] %v5085_v60  ;;  %v2053_v37 = vadd.f32 1.0, %v2052_v22  ;;  %3568 = vlog2.f32 %v2058_v15  ;;  %v1640_v59 = vsub.f32 0.0, %v1576_v45  ;;  %v5105_v25 = vadd.f32 %v4737_v36, %v4565_v56 }
 0x348   : >> { %v5107_v44 = vpop.eup %3558  ;;  %v2024_v47 = vmul.f32 0.6931472, %v3555_v18  ;;  %3570 = vlog2.f32 %v2085_v61  ;;  %v2094_v49 = vadd.f32 1.0, %v5089_v38  ;;  %v6960_v7 = vmax.f32 %v4781_v9, 0.0 }
 0x349   : >> { %6959 = vst [vmem:[#allocation133_spill] sm:$0xff] %v5107_v44  ;;  %vm5115_vm11 = vcmp.lt.f32.partialorder %v2055_v28, 0.0004427343  ;;  %v1643_v6 = vsub.f32 0.0, %v1579_v43  ;;  %v1581_v36 = vand.u32 2147483647, %v5096_v20  ;;  %3572 = vpow2.f32 %v1743_v41 }
 0x34a   : >> { %v5113_v39 = vadd.f32 %v2021_v19, %v6960_v7  ;;  %v2062_v15 = vadd.f32 1.0, %v2061_v4  ;;  %v2064_v45 = vand.u32 2147483647, %v5052_v51  ;;  %v1580_v18 = vand.u32 2147483647, %v5085_v60  ;;  %v6976_v60 = vld [vmem:[#allocation85_spill] sm:$0xff] }
 0x34b   : >> { %v3561_v22 = vpop.eup %3560  ;;  %v2054_v26 = vmul.f32 %v5011_v63, %v2053_v37  ;;  %v2088_v19 = vmul.f32 -0.5, %v5057_v30  ;;  %v1739_v28 = vmul.f32 1.442695, %v1640_v59  ;;  %v1582_v7 = vand.u32 2147483647, %v5105_v25 }
 0x34c   : >> { %6961 = vst [vmem:[#allocation134_spill] sm:$0xff] %v5113_v39  ;;  %v5122_v61 = vpop.eup %3562  ;;  %v2030_v43 = vsel %vm5071_vm10, %v2027_v24, %v2024_v47  ;;  %v2091_v4 = vand.u32 2147483647, %v5057_v30  ;;  %3574 = vlog2.f32 %v2094_v49  ;;  %v5134_v41 = vadd.f32 %v4726_v32, %v4576_v53 }
 0x34d   : >> { %6964 = vst [vmem:[#allocation135_spill] sm:$0xff] %v5122_v61  ;;  %v5127_v44 = vpop.eup %3564  ;;  %v2051_v61 = vmul.f32 0.6931472, %v3561_v22  ;;  %v1745_v37 = vmul.f32 1.442695, %v1643_v6  ;;  %v1645_v39 = vsub.f32 0.0, %v1581_v36  ;;  %v2063_v59 = vmul.f32 %v5052_v51, %v2062_v15 }
 0x34e   : >> { %6965 = vst [vmem:[#allocation136_spill] sm:$0xff] %v5134_v41  ;;  %v1644_v35 = vsub.f32 0.0, %v1580_v18  ;;  %v5141_v16 = vadd.f32 %v4749_v54, %v4562_v55  ;;  %v6966_v49 = vmax.f32 %v4820_v40, 0.0  ;;  %vm5147_vm12 = vcmp.lt.f32.partialorder %v2064_v45, 0.0004427343 }
 0x34f   : >> { %v2089_v47 = vadd.f32 1.0, %v2088_v19  ;;  %v2121_v6 = vadd.f32 1.0, %v5127_v44  ;;  %v1646_v36 = vsub.f32 0.0, %v1582_v7  ;;  %vm5154_vm13 = vcmp.lt.f32.partialorder %v2091_v4, 0.0004427343 }
 0x350   : >> { %v5145_v24 = vadd.f32 %v2030_v43, %v6966_v49  ;;  %v5152_v51 = vpop.eup %3566  ;;  %3576 = vpow2.f32 %v1739_v28  ;;  %v1583_v15 = vand.u32 2147483647, %v5134_v41  ;;  %v2057_v45 = vsel %vm5115_vm11, %v2054_v26, %v2051_v61 }
 0x351   : >> { %6970 = vst [vmem:[#allocation138_spill] sm:$0xff] %v5152_v51  ;;  %v3569_v18 = vpop.eup %3568  ;;  %v2097_v19 = vmul.f32 -0.5, %v5089_v38  ;;  %3578 = vpow2.f32 %v1745_v37  ;;  %v1749_v43 = vmul.f32 1.442695, %v1645_v39  ;;  %v2100_v49 = vand.u32 2147483647, %v5089_v38 }
 0x352   : >> { %6967 = vst [vmem:[#allocation137_spill] sm:$0xff] %v5145_v24  ;;  %v3571_v7 = vpop.eup %3570  ;;  %v1747_v4 = vmul.f32 1.442695, %v1644_v35  ;;  %v5166_v63 = vadd.f32 %v4739_v48, %v4582_v12  ;;  %v1585_v28 = vand.u32 2147483647, %v5141_v16  ;;  %v2090_v54 = vmul.f32 %v5057_v30, %v2089_v47  ;;  %v6977_v30 = vld [vmem:[#allocation84_spill] sm:$0xff] }
 0x353   : >> { %3580 = vlog2.f32 %v2121_v6  ;;  %v1751_v26 = vmul.f32 1.442695, %v1646_v36  ;;  %v5171_v61 = vpop.eup %3572  ;;  %v6974_v39 = vmax.f32 %v4863_v0, 0.0  ;;  %v2060_v9 = vmul.f32 0.6931472, %v3569_v18  ;;  %v6990_v36 = vld [vmem:[#allocation87_spill] sm:$0xff] }
 0x354   : >> { %6973 = vst [vmem:[#allocation139_spill] sm:$0xff] %v5166_v63  ;;  %v1647_v35 = vsub.f32 0.0, %v1583_v15  ;;  %v5179_v48 = vadd.f32 %v6976_v60, %v4565_v56  ;;  %v2087_v42 = vmul.f32 0.6931472, %v3571_v7  ;;  %v2098_v51 = vadd.f32 1.0, %v2097_v19 }
 0x355   : >> { %v5175_v37 = vadd.f32 %v2057_v45, %v6974_v39  ;;  %3582 = vpow2.f32 %v1749_v43  ;;  %v5183_v47 = vadd.f32 %v6977_v30, %v4576_v53  ;;  %vm5185_vm14 = vcmp.lt.f32.partialorder %v2100_v49, 0.0004427343 }
 0x356   : >> { %v3575_v6 = vpop.eup %3574  ;;  %3584 = vpow2.f32 %v1747_v4  ;;  %v1584_v18 = vand.u32 2147483647, %v5166_v63  ;;  %v1649_v15 = vsub.f32 0.0, %v1585_v28  ;;  %v2124_v45 = vmul.f32 -0.5, %v5127_v44 }
 0x357   : >> { %6975 = vst [vmem:[#allocation140_spill] sm:$0xff] %v5175_v37  ;;  %6978 = vst [vmem:[#allocation85_spill] sm:$0xff] %v5183_v47  ;;  %v2130_v60 = vadd.f32 1.0, %v5171_v61  ;;  %3586 = vpow2.f32 %v1751_v26  ;;  %v2066_v43 = vsel %vm5147_vm12, %v2063_v59, %v2060_v9  ;;  %v2127_v7 = vand.u32 2147483647, %v5127_v44 }
 0x358   : >> { %v1753_v49 = vmul.f32 1.442695, %v1647_v35  ;;  %v1586_v39 = vand.u32 2147483647, %v5179_v48  ;;  %v2093_v4 = vsel %vm5154_vm13, %v2090_v54, %v2087_v42  ;;  %v2096_v30 = vmul.f32 0.6931472, %v3575_v6 }
 0x359   : >> { %v1587_v28 = vand.u32 2147483647, %v5183_v47  ;;  %v1797_v37 = vadd.f32 1.0, %v6981_v3  ;;  %v2099_v26 = vmul.f32 %v5089_v38, %v2098_v51  ;;  %v2133_v32 = vmul.f32 -0.5, %v5171_v61  ;;  %v6997_v47 = vld [vmem:[#allocation86_spill] sm:$0xff] }
 0x35a   : >> { %v5201_v24 = vpop.eup %3576  ;;  %v1648_v9 = vsub.f32 0.0, %v1584_v18  ;;  %v1757_v59 = vmul.f32 1.442695, %v1649_v15  ;;  %v6984_v35 = vmax.f32 %v4901_v29, 0.0  ;;  %v2125_v42 = vadd.f32 1.0, %v2124_v45  ;;  %v7009_v29 = vld [vmem:[#allocation93_spill] sm:$0xff] }
 0x35b   : >> { %6982 = vst [vmem:[#allocation84_spill] sm:$0xff] %v5201_v24  ;;  %v5205_v19 = vpop.eup %3578  ;;  %3588 = vlog2.f32 %v2130_v60  ;;  %v6986_v54 = vmax.f32 %v4930_v33, 0.0  ;;  %v1650_v51 = vsub.f32 0.0, %v1586_v39  ;;  %v2102_v15 = vsel %vm5185_vm14, %v2099_v26, %v2096_v30 }
 0x35c   : >> { %6983 = vst [vmem:[#allocation79_spill] sm:$0xff] %v5205_v19  ;;  %v5209_v41 = vadd.f32 %v2066_v43, %v6984_v35  ;;  %3590 = vpow2.f32 %v1753_v49  ;;  %vm5219_vm15 = vcmp.lt.f32.partialorder %v2127_v7, 0.0004427343  ;;  %v1651_v45 = vsub.f32 0.0, %v1587_v28  ;;  %v6992_v7 = vld [vmem:[#allocation83_spill] sm:$0xff] }
 0x35d   : >> { %v5214_v6 = vadd.f32 %v2093_v4, %v6986_v54  ;;  %v3581_v18 = vpop.eup %3580  ;;  %3592 = vlog2.f32 %v1797_v37  ;;  %v2134_v60 = vadd.f32 1.0, %v2133_v32  ;;  %v1755_v43 = vmul.f32 1.442695, %v1648_v9 }
 0x35e   : >> { %6985 = vst [vmem:[#allocation141_spill] sm:$0xff] %v5209_v41  ;;  %3594 = vpow2.f32 %v1757_v59  ;;  %v2126_v49 = vmul.f32 %v5127_v44, %v2125_v42  ;;  %v2136_v39 = vand.u32 2147483647, %v5171_v61  ;;  %v5230_v30 = vadd.f32 %v6990_v36, %v4582_v12  ;;  %v6996_v36 = vld [vmem:[#allocation82_spill] sm:$0xff] }
 0x35f   : >> { %6987 = vst [vmem:[#allocation142_spill] sm:$0xff] %v5214_v6  ;;  %v5224_v4 = vpop.eup %3582  ;;  %v1806_v26 = vadd.f32 1.0, %v6992_v7  ;;  %v6994_v37 = vmax.f32 %v4961_v5, 0.0  ;;  %v2123_v32 = vmul.f32 0.6931472, %v3581_v18  ;;  %v1800_v42 = vmul.f32 -0.5, %v6981_v3 }
 0x360   : >> { %6991 = vst [vmem:[#allocation87_spill] sm:$0xff] %v5230_v30  ;;  %v5233_v54 = vpop.eup %3584  ;;  %v1759_v59 = vmul.f32 1.442695, %v1650_v51  ;;  %v1761_v44 = vmul.f32 1.442695, %v1651_v45  ;;  %v1815_v35 = vadd.f32 1.0, %v6996_v36  ;;  %v5245_v22 = vmul.f32 %v5171_v61, %v2134_v60 }
 0x361   : >> { %6993 = vst [vmem:[#allocation83_spill] sm:$0xff] %v5233_v54  ;;  %v5237_v28 = vadd.f32 %v2102_v15, %v6994_v37  ;;  %v5240_v38 = vpop.eup %3586  ;;  %3596 = vlog2.f32 %v1806_v26  ;;  %v2157_v63 = vadd.f32 1.0, %v5224_v4  ;;  %v2160_v15 = vmul.f32 -0.5, %v5224_v4 }
 0x362   : >> { %3598 = vpow2.f32 %v1755_v43  ;;  %v1588_v37 = vand.u32 2147483647, %v5230_v30  ;;  %v2129_v45 = vsel %vm5219_vm15, %v2126_v49, %v2123_v32  ;;  %v2166_v26 = vadd.f32 1.0, %v5240_v38 }
 0x363   : >> { %6995 = vst [vmem:[#allocation143_spill] sm:$0xff] %v5237_v28  ;;  %3600 = vlog2.f32 %v1815_v35  ;;  %v1809_v61 = vmul.f32 -0.5, %v6992_v7  ;;  %v1801_v43 = vadd.f32 1.0, %v1800_v42  ;;  %v1824_v18 = vadd.f32 1.0, %v6997_v47  ;;  %v6999_v35 = vld [vmem:[#allocation65_spill] sm:$0xff]  ;;  %v7004_v28 = vld [vmem:[#allocation67_spill] sm:$0xff] }
 0x364   : >> { %3602 = vpow2.f32 %v1759_v59  ;;  %v2161_v51 = vadd.f32 1.0, %v2160_v15  ;;  %vm1413_vm1 = vcmp.ne.f32.partialorder %v6999_v35, %v6999_v35  ;;  %v1803_v19 = vand.u32 2147483647, %v6981_v3 }
 0x365   : >> { %v3589_v60 = vpop.eup %3588  ;;  %3604 = vpow2.f32 %v1761_v44  ;;  %v1818_v49 = vmul.f32 -0.5, %v6996_v36  ;;  %v7000_v59 = vmax.f32 %v5003_v11, 0.0  ;;  %vm5268_vm2 = vcmp.lt.f32.partialorder %v2136_v39, 0.0004427343 }
 0x366   : >> { %v5258_v54 = vpop.eup %3590  ;;  %3606 = vlog2.f32 %v2157_v63  ;;  %v2169_v9 = vmul.f32 -0.5, %v5240_v38  ;;  %v1652_v63 = vsub.f32 0.0, %v1588_v37  ;;  %v5275_v30 = vmul.f32 0.6931472, %v3589_v60  ;;  %v7005_v37 = vld [vmem:[#allocation66_spill] sm:$0xff] }
 0x367   : >> { %6998 = vst [vmem:[#allocation82_spill] sm:$0xff] %v5258_v54  ;;  %v3593_v32 = vpop.eup %3592  ;;  %v5266_v44 = vadd.f32 %v2129_v45, %v7000_v59  ;;  %3608 = vlog2.f32 %v1824_v18  ;;  %v2172_v54 = vand.u32 2147483647, %v5240_v38  ;;  %vm1414_vm3 = vcmp.ne.f32.partialorder %v7004_v28, %v7004_v28  ;;  %v7006_v60 = vld [vmem:[#allocation90_spill] sm:$0xff] }
 0x368   : >> { %v5273_v15 = vpop.eup %3594  ;;  %3610 = vlog2.f32 %v2166_v26  ;;  %v1810_v45 = vadd.f32 1.0, %v1809_v61  ;;  %v1799_v59 = vmul.f32 0.6931472, %v3593_v32  ;;  %v1802_v39 = vmul.f32 %v6981_v3, %v1801_v43 }
 0x369   : >> { %7001 = vst [vmem:[#allocation86_spill] sm:$0xff] %v5266_v44  ;;  %v1812_v44 = vand.u32 2147483647, %v6992_v7  ;;  %v1821_v6 = vand.u32 2147483647, %v6996_v36  ;;  %vm1415_vm4 = vcmp.ne.f32.partialorder %v7005_v37, %v7005_v37  ;;  %v1819_v18 = vadd.f32 1.0, %v1818_v49 }
 0x36a   : >> { %vm1804_vm5 = vcmp.lt.f32.partialorder %v1803_v19, 0.0004427343  ;;  %v1827_v26 = vmul.f32 -0.5, %v6997_v47  ;;  %v5288_v11 = vadd.f32 %v7006_v60, %v4562_v55  ;;  %v2170_v61 = vadd.f32 1.0, %v2169_v9 }
 0x36b   : >> { %v3597_v24 = vpop.eup %3596  ;;  %v2193_v32 = vadd.f32 1.0, %v5273_v15  ;;  %v1763_v3 = vmul.f32 1.442695, %v1652_v63  ;;  %v1805_v43 = vsel %vm1804_vm5, %v1802_v39, %v1799_v59  ;;  %v1811_v33 = vmul.f32 %v6992_v7, %v1810_v45  ;;  %v7012_v7 = vld [vmem:[#allocation68_spill] sm:$0xff] }
 0x36c   : >> { %v5291_v41 = vpop.eup %3598  ;;  %v1808_v5 = vmul.f32 0.6931472, %v3597_v24  ;;  %v7008_v19 = vmax.f32 %v6999_v35, 0.0  ;;  %v5298_v0 = vadd.f32 %v7009_v29, %v4565_v56  ;;  %v5301_v40 = vmul.f32 %v5224_v4, %v2161_v51 }
 0x36d   : >> { %7007 = vst [vmem:[#allocation65_spill] sm:$0xff] %v5291_v41  ;;  %v3601_v60 = vpop.eup %3600  ;;  %vm1813_vm6 = vcmp.lt.f32.partialorder %v1812_v44, 0.0004427343  ;;  %vm5303_vm7 = vcmp.lt.f32.partialorder %v1821_v6, 0.0004427343  ;;  %vm1416_vm8 = vcmp.ne.f32.partialorder %v7012_v7, %v7012_v7  ;;  %v1820_v29 = vmul.f32 %v6996_v36, %v1819_v18 }
 0x36e   : >> { %v2373_v49 = vadd.f32 %v1805_v43, %v7008_v19  ;;  %v1589_v24 = vand.u32 2147483647, %v5288_v11  ;;  %v5308_v63 = vpop.eup %3602  ;;  %v1814_v45 = vsel %vm1813_vm6, %v1811_v33, %v1808_v5  ;;  %v1817_v59 = vmul.f32 0.6931472, %v3601_v60 }
 0x36f   : >> { %v1828_v39 = vadd.f32 1.0, %v1827_v26  ;;  %v5313_v43 = vpop.eup %3604  ;;  %v1830_v51 = vand.u32 2147483647, %v6997_v47  ;;  %v7013_v6 = vmax.f32 %v7004_v28, 0.0  ;;  %v2138_v33 = vsel %vm5268_vm2, %v5245_v22, %v5275_v30 }
 0x370   : >> { %v2437_v19 = vsel %vm1413_vm1, %v6999_v35, %v2373_v49  ;;  %v1653_v41 = vsub.f32 0.0, %v1589_v24  ;;  %v3607_v14 = vpop.eup %3606  ;;  %v7014_v5 = vand.u32 2147483647, %v5224_v4  ;;  %3612 = vlog2.f32 %v2193_v32 }
 0x371   : >> { %v2374_v44 = vadd.f32 %v1814_v45, %v7013_v6  ;;  %v1823_v18 = vsel %vm5303_vm7, %v1820_v29, %v1817_v59  ;;  %v1590_v26 = vand.u32 2147483647, %v5298_v0  ;;  %v3609_v35 = vpop.eup %3608  ;;  %vm1417_vm10 = vcmp.ne.f32.partialorder %v4568_v2, %v4568_v2 }
 0x372   : >> { %vm5328_vm9 = vcmp.lt.f32.partialorder %v7014_v5, 0.0004427343  ;;  %vm1418_vm11 = vcmp.ne.f32.partialorder %v4571_v57, %v4571_v57  ;;  %v2202_v22 = vadd.f32 1.0, %v5308_v63  ;;  %v7017_v4 = vmax.f32 %v7005_v37, 0.0  ;;  %v3611_v49 = vpop.eup %3610 }
 0x373   : >> { %v2438_v42 = vsel %vm1414_vm3, %v7004_v28, %v2374_v44  ;;  %v1765_v32 = vmul.f32 1.442695, %v1653_v41  ;;  %vm5346_vm12 = vcmp.lt.f32.partialorder %v2172_v54, 0.0004427343  ;;  %3614 = vpow2.f32 %v1763_v3 }
 0x374   : >> { %v2375_v30 = vadd.f32 %v1823_v18, %v7017_v4  ;;  %v1826_v9 = vmul.f32 0.6931472, %v3609_v35  ;;  %v1829_v24 = vmul.f32 %v6997_v47, %v1828_v39  ;;  %v2501_v45 = vadd.f32 %v2438_v42, %v2437_v19  ;;  %v7021_v39 = vld [vmem:[#allocation92_spill] sm:$0xff]  ;;  %v7024_v18 = vld [vmem:[#allocation89_spill] sm:$0xff] }
 0x375   : >> { %vm1831_vm13 = vcmp.lt.f32.partialorder %v1830_v51, 0.0004427343  ;;  %3616 = vpow2.f32 %v1765_v32  ;;  %v1654_v29 = vsub.f32 0.0, %v1590_v26  ;;  %v2159_v28 = vmul.f32 0.6931472, %v3607_v14 }
 0x376   : >> { %v2439_v59 = vsel %vm1415_vm4, %v7005_v37, %v2375_v30  ;;  %v2196_v41 = vmul.f32 -0.5, %v5273_v15  ;;  %v1832_v54 = vsel %vm1831_vm13, %v1829_v24, %v1826_v9  ;;  %3618 = vlog2.f32 %v2202_v22  ;;  %v7025_v30 = vld [vmem:[#allocation94_spill] sm:$0xff] }
 0x377   : >> { %v2502_v6 = vadd.f32 %v2501_v45, %v2439_v59  ;;  %v2205_v3 = vmul.f32 -0.5, %v5308_v63  ;;  %v7020_v44 = vmax.f32 %v7012_v7, 0.0  ;;  %v5361_v51 = vadd.f32 %v7021_v39, %v4576_v53 }
 0x378   : >> { %v7023_v19 = vmax.f32 %v5024_v52, 0.0  ;;  %v2171_v14 = vmul.f32 %v5240_v38, %v2170_v61  ;;  %v1767_v5 = vmul.f32 1.442695, %v1654_v29  ;;  %v1851_v26 = vadd.f32 1.0, %v7024_v18 }
 0x379   : >> { %v2376_v47 = vadd.f32 %v1832_v54, %v7020_v44  ;;  %7022 = vst [vmem:[#allocation67_spill] sm:$0xff] %v5361_v51  ;;  %v2168_v35 = vmul.f32 0.6931472, %v3611_v49  ;;  %v2199_v22 = vand.u32 2147483647, %v5273_v15  ;;  %v1860_v42 = vadd.f32 1.0, %v7025_v30 }
 0x37a   : >> { %v5365_v37 = vadd.f32 %v2138_v33, %v7023_v19  ;;  %v2197_v32 = vadd.f32 1.0, %v2196_v41  ;;  %v2208_v9 = vand.u32 2147483647, %v5308_v63  ;;  %3620 = vlog2.f32 %v1851_v26  ;;  %v3613_v24 = vpop.eup %3612  ;;  %v7028_v41 = vld [vmem:[#allocation98_spill] sm:$0xff] }
 0x37b   : >> { %v2440_v4 = vsel %vm1416_vm8, %v7012_v7, %v2376_v47  ;;  %v2165_v38 = vsel %vm5328_vm9, %v5301_v40, %v2159_v28  ;;  %v2206_v61 = vadd.f32 1.0, %v2205_v3  ;;  %v1591_v49 = vand.u32 2147483647, %v5361_v51  ;;  %v7026_v7 = vld [vmem:[#allocation95_spill] sm:$0xff]  ;;  %v7062_v51 = vld [vmem:[#allocation72_spill] sm:$0xff] }
 0x37c   : >> { %v2503_v33 = vadd.f32 %v2502_v6, %v2440_v4  ;;  %3622 = vlog2.f32 %v1860_v42  ;;  %v5382_v45 = vadd.f32 %v7026_v7, %v4582_v12  ;;  %v2441_v59 = vsel %vm1417_vm10, %v4568_v2, %v4876_v62  ;;  %v7035_v42 = vld [vmem:[#allocation69_spill] sm:$0xff] }
 0x37d   : >> { %3624 = vpow2.f32 %v1767_v5  ;;  %v2442_v40 = vsel %vm1418_vm11, %v4571_v57, %v4880_v17  ;;  %v2174_v36 = vsel %vm5346_vm12, %v2171_v14, %v2168_v35  ;;  %v1854_v29 = vmul.f32 -0.5, %v7024_v18  ;;  %v5403_v6 = vpop.eup %3614 }
 0x37e   : >> { %2504 = vadd.xlane.f32.xlu0 %v2503_v33  ;;  %7027 = vst [vmem:[#allocation66_spill] sm:$0xff] %v5382_v45  ;;  %v5397_v28 = vadd.f32 %v2442_v40, %v2441_v59  ;;  %v5401_v54 = vadd.f32 %v7028_v41, %v4562_v55  ;;  %v5406_v2 = vmul.f32 %v5273_v15, %v2197_v32  ;;  %vm5408_vm14 = vcmp.lt.f32.partialorder %v2199_v22, 0.0004427343 }
 0x37f   : >> { %v1863_v57 = vmul.f32 -0.5, %v7025_v30  ;;  %v5415_v17 = vadd.f32 %v4843_v46, %v4565_v56  ;;  %v5417_v60 = vpop.eup %3616  ;;  %v7031_v3 = vmax.f32 %v5096_v20, 0.0  ;;  %vm5423_vm15 = vcmp.lt.f32.partialorder %v2208_v9, 0.0004427343 }
 0x380   : >> { %v1655_v15 = vsub.f32 0.0, %v1591_v49  ;;  %v1593_v39 = vand.u32 2147483647, %v5401_v54  ;;  %v7034_v19 = vmax.f32 %v5105_v25, 0.0  ;;  %v2195_v5 = vmul.f32 0.6931472, %v3613_v24  ;;  %v3619_v35 = vpop.eup %3618 }
 0x381   : >> { %v5421_v44 = vadd.f32 %v2165_v38, %v7031_v3  ;;  %v2207_v46 = vmul.f32 %v5308_v63, %v2206_v61  ;;  %v1592_v26 = vand.u32 2147483647, %v5382_v45  ;;  %vm1419_vm1 = vcmp.ne.f32.partialorder %v7035_v42, %v7035_v42  ;;  %v7036_v3 = vld [vmem:[#allocation104_spill] sm:$0xff] }
 0x382   : >> { %v5430_v14 = vadd.f32 %v2174_v36, %v7034_v19  ;;  %v1855_v32 = vadd.f32 1.0, %v1854_v29  ;;  %v1657_v9 = vsub.f32 0.0, %v1593_v39  ;;  %v2229_v33 = vadd.f32 1.0, %v5417_v60 }
 0x383   : >> { %v1857_v38 = vand.u32 2147483647, %v7024_v18  ;;  %v1864_v49 = vadd.f32 1.0, %v1863_v57  ;;  %v1594_v24 = vand.u32 2147483647, %v5415_v17  ;;  %v2201_v36 = vsel %vm5408_vm14, %v5406_v2, %v2195_v5 }
 0x384   : >> { %v1769_v63 = vmul.f32 1.442695, %v1655_v15  ;;  %v1866_v59 = vand.u32 2147483647, %v7025_v30  ;;  %v3621_v40 = vpop.eup %3620  ;;  %v2204_v29 = vmul.f32 0.6931472, %v3619_v35  ;;  %v5449_v39 = vadd.f32 %v7036_v3, %v4576_v53 }
 0x385   : >> { %v1656_v41 = vsub.f32 0.0, %v1592_v26  ;;  %v1853_v19 = vmul.f32 0.6931472, %v3621_v40  ;;  %v1856_v15 = vmul.f32 %v7024_v18, %v1855_v32  ;;  %v1773_v4 = vmul.f32 1.442695, %v1657_v9  ;;  %v7044_v3 = vld [vmem:[#allocation101_spill] sm:$0xff] }
 0x386   : >> { %7037 = vst [vmem:[#allocation90_spill] sm:$0xff] %v5449_v39  ;;  %v3623_v57 = vpop.eup %3622  ;;  %v1658_v61 = vsub.f32 0.0, %v1594_v24  ;;  %3626 = vlog2.f32 %v2229_v33  ;;  %vm1858_vm2 = vcmp.lt.f32.partialorder %v1857_v38, 0.0004427343  ;;  %v1865_v62 = vmul.f32 %v7025_v30, %v1864_v49  ;;  %v7039_v33 = vld [vmem:[#allocation70_spill] sm:$0xff]  ;;  %v7041_v30 = vld [vmem:[#allocation107_spill] sm:$0xff] }
 0x387   : >> { %v5452_v7 = vpop.eup %3624  ;;  %v1862_v22 = vmul.f32 0.6931472, %v3623_v57  ;;  %3628 = vpow2.f32 %v1769_v63  ;;  %v1859_v2 = vsel %vm1858_vm2, %v1856_v15, %v1853_v19  ;;  %vm1867_vm3 = vcmp.lt.f32.partialorder %v1866_v59, 0.0004427343 }
 0x388   : >> { %v1775_v5 = vmul.f32 1.442695, %v1658_v61  ;;  %v2210_v26 = vsel %vm5423_vm15, %v2207_v46, %v2204_v29  ;;  %v7038_v40 = vmax.f32 %v7035_v42, 0.0  ;;  %v1595_v32 = vand.u32 2147483647, %v5449_v39  ;;  %v7043_v46 = vld [vmem:[#allocation96_spill] sm:$0xff] }
 0x389   : >> { %v1868_v35 = vsel %vm1867_vm3, %v1865_v62, %v1862_v22  ;;  %v2238_v9 = vadd.f32 1.0, %v5452_v7  ;;  %v7040_v38 = vmax.f32 %v7039_v33, 0.0  ;;  %3630 = vpow2.f32 %v1773_v4 }
 0x38a   : >> { %v2379_v18 = vadd.f32 %v1859_v2, %v7038_v40  ;;  %v5465_v49 = vadd.f32 %v7041_v30, %v4582_v12  ;;  %v1771_v63 = vmul.f32 1.442695, %v1656_v41  ;;  %vm1420_vm4 = vcmp.ne.f32.partialorder %v7039_v33, %v7039_v33 }
 0x38b   : >> { %v2380_v24 = vadd.f32 %v1868_v35, %v7040_v38  ;;  %v1869_v22 = vadd.f32 1.0, %v7043_v46  ;;  %v2232_v61 = vmul.f32 -0.5, %v5417_v60  ;;  %v2235_v59 = vand.u32 2147483647, %v5417_v60 }
 0x38c   : >> { %7042 = vst [vmem:[#allocation93_spill] sm:$0xff] %v5465_v49  ;;  %v2443_v47 = vsel %vm1419_vm1, %v7035_v42, %v2379_v18  ;;  %3632 = vpow2.f32 %v1775_v5  ;;  %v1659_v41 = vsub.f32 0.0, %v1595_v32  ;;  %v1878_v57 = vadd.f32 1.0, %v7044_v3  ;;  %v7049_v5 = vld [vmem:[#allocation100_spill] sm:$0xff]  ;;  %v7050_v32 = vld [vmem:[#allocation75_spill] sm:$0xff] }
 0x38d   : >> { %v2507_v4 = vadd.f32 %v5397_v28, %v2443_v47  ;;  %v2444_v29 = vsel %vm1420_vm4, %v7039_v33, %v2380_v24  ;;  %3634 = vlog2.f32 %v1869_v22  ;;  %v2241_v19 = vmul.f32 -0.5, %v5452_v7 }
 0x38e   : >> { %3636 = vlog2.f32 %v2238_v9  ;;  %v1596_v42 = vand.u32 2147483647, %v5465_v49  ;;  %v7045_v62 = vmax.f32 %v5141_v16, 0.0  ;;  %v7047_v35 = vmax.f32 %v5179_v48, 0.0 }
 0x38f   : >> { %v2508_v15 = vadd.f32 %v2507_v4, %v2444_v29  ;;  %3638 = vlog2.f32 %v1878_v57  ;;  %v1887_v40 = vadd.f32 1.0, %v7049_v5  ;;  %v1872_v33 = vmul.f32 -0.5, %v7043_v46 }
 0x390   : >> { %v5483_v2 = vadd.f32 %v2201_v36, %v7045_v62  ;;  %v5487_v28 = vadd.f32 %v2210_v26, %v7047_v35  ;;  %3640 = vpow2.f32 %v1771_v63  ;;  %v3627_v38 = vpop.eup %3626  ;;  %v2233_v24 = vadd.f32 1.0, %v2232_v61  ;;  %v7054_v36 = vld [vmem:[#allocation103_spill] sm:$0xff] }
 0x391   : >> { %2509 = vadd.xlane.f32.xlu0 %v2508_v15  ;;  %v1777_v30 = vmul.f32 1.442695, %v1659_v41  ;;  %v1881_v47 = vmul.f32 -0.5, %v7044_v3  ;;  %v5495_v26 = vpop.eup %3628  ;;  %vm5497_vm5 = vcmp.lt.f32.partialorder %v2235_v59, 0.0004427343  ;;  %v2242_v63 = vadd.f32 1.0, %v2241_v19 }
 0x392   : >> { %7046 = vst [vmem:[#allocation68_spill] sm:$0xff] %v5483_v2  ;;  %7048 = vst [vmem:[#allocation92_spill] sm:$0xff] %v5487_v28  ;;  %v1660_v4 = vsub.f32 0.0, %v1596_v42  ;;  %3642 = vlog2.f32 %v1887_v40  ;;  %v2244_v29 = vand.u32 2147483647, %v5452_v7  ;;  %v1873_v35 = vadd.f32 1.0, %v1872_v33 }
 0x393   : >> { %7051 = vst [vmem:[#allocation89_spill] sm:$0xff] %v5495_v26  ;;  %v1875_v15 = vand.u32 2147483647, %v7043_v46  ;;  %v5505_v41 = vpop.eup %3630  ;;  %v5507_v62 = vmul.f32 0.6931472, %v3627_v38  ;;  %v1890_v59 = vmul.f32 -0.5, %v7049_v5  ;;  %v5512_v19 = vmul.f32 %v5417_v60, %v2233_v24 }
 0x394   : >> { %v1896_v18 = vadd.f32 1.0, %v7054_v36  ;;  %3644 = vpow2.f32 %v1777_v30  ;;  %v1882_v42 = vadd.f32 1.0, %v1881_v47  ;;  %v1884_v40 = vand.u32 2147483647, %v7044_v3  ;;  %v7055_v38 = vld [vmem:[#allocation71_spill] sm:$0xff]  ;;  %v7058_v24 = vld [vmem:[#allocation73_spill] sm:$0xff] }
 0x395   : >> { %v5518_v61 = vmul.f32 %v5452_v7, %v2242_v63  ;;  %v5520_v9 = vmul.f32 1.442695, %v1660_v4  ;;  %vm1421_vm6 = vcmp.ne.f32.partialorder %v7055_v38, %v7055_v38  ;;  %vm5524_vm7 = vcmp.lt.f32.partialorder %v2244_v29, 0.0004427343  ;;  %v7061_v7 = vld [vmem:[#allocation112_spill] sm:$0xff] }
 0x396   : >> { %v5515_v57 = vpop.eup %3632  ;;  %3646 = vlog2.f32 %v1896_v18  ;;  %v2265_v60 = vadd.f32 1.0, %v5505_v41  ;;  %vm1422_vm8 = vcmp.ne.f32.partialorder %v7058_v24, %v7058_v24  ;;  %vm5531_vm9 = vcmp.lt.f32.partialorder %v1875_v15, 0.0004427343 }
 0x397   : >> { %v3635_v33 = vpop.eup %3634  ;;  %v5537_v47 = vadd.f32 %v7061_v7, %v4562_v55  ;;  %v2237_v18 = vsel %vm5497_vm5, %v5512_v19, %v5507_v62  ;;  %v1874_v29 = vmul.f32 %v7043_v46, %v1873_v35  ;;  %v1891_v39 = vadd.f32 1.0, %v1890_v59 }
 0x398   : >> { %v3637_v63 = vpop.eup %3636  ;;  %v1871_v4 = vmul.f32 0.6931472, %v3635_v33  ;;  %vm1423_vm10 = vcmp.ne.f32.partialorder %v7062_v51, %v7062_v51  ;;  %v1883_v15 = vmul.f32 %v7044_v3, %v1882_v42  ;;  %vm5547_vm11 = vcmp.lt.f32.partialorder %v1884_v40, 0.0004427343 }
 0x399   : >> { %v3639_v45 = vpop.eup %3638  ;;  %v1893_v7 = vand.u32 2147483647, %v7049_v5  ;;  %v1899_v28 = vmul.f32 -0.5, %v7054_v36  ;;  %v2274_v62 = vadd.f32 1.0, %v5515_v57  ;;  %v1597_v59 = vand.u32 2147483647, %v5537_v47 }
 0x39a   : >> { %v5553_v22 = vpop.eup %3640  ;;  %v1877_v46 = vsel %vm5531_vm9, %v1874_v29, %v1871_v4  ;;  %v1880_v35 = vmul.f32 0.6931472, %v3639_v45  ;;  %3648 = vlog2.f32 %v2265_v60  ;;  %v2268_v3 = vmul.f32 -0.5, %v5505_v41 }
 0x39b   : >> { %7065 = vst [vmem:[#allocation94_spill] sm:$0xff] %v5553_v22  ;;  %v7066_v19 = vmax.f32 %v7055_v38, 0.0  ;;  %v5564_v40 = vadd.f32 %v4989_v8, %v4565_v56  ;;  %v2240_v22 = vmul.f32 0.6931472, %v3637_v63  ;;  %v1892_v30 = vmul.f32 %v7049_v5, %v1891_v39 }
 0x39c   : >> { %v3643_v33 = vpop.eup %3642  ;;  %v1886_v2 = vsel %vm5547_vm11, %v1883_v15, %v1880_v35  ;;  %v1661_v45 = vsub.f32 0.0, %v1597_v59  ;;  %vm1424_vm12 = vcmp.ne.f32.partialorder %v7050_v32, %v7050_v32  ;;  %v1900_v4 = vadd.f32 1.0, %v1899_v28 }
 0x39d   : >> { %v2381_v42 = vadd.f32 %v1877_v46, %v7066_v19  ;;  %v1889_v60 = vmul.f32 0.6931472, %v3643_v33  ;;  %v7067_v29 = vmax.f32 %v7058_v24, 0.0  ;;  %3650 = vlog2.f32 %v2274_v62 }
 0x39e   : >> { %vm1894_vm13 = vcmp.lt.f32.partialorder %v1893_v7, 0.0004427343  ;;  %v1902_v26 = vand.u32 2147483647, %v7054_v36  ;;  %v1781_v63 = vmul.f32 1.442695, %v1661_v45  ;;  %v5578_v39 = vpop.eup %3644  ;;  %vm1425_vm14 = vcmp.ne.f32.partialorder %v4607_v10, %v4607_v10 }
 0x39f   : >> { %v2382_v46 = vadd.f32 %v1886_v2, %v7067_v29  ;;  %v2445_v8 = vsel %vm1421_vm6, %v7055_v38, %v2381_v42  ;;  %v2271_v28 = vand.u32 2147483647, %v5505_v41  ;;  %v1895_v5 = vsel %vm1894_vm13, %v1892_v30, %v1889_v60  ;;  %v7071_v29 = vld [vmem:[#allocation105_spill] sm:$0xff] }
 0x3a0   : >> { %v1598_v38 = vand.u32 2147483647, %v5564_v40  ;;  %v3647_v15 = vpop.eup %3646  ;;  %vm1426_vm15 = vcmp.ne.f32.partialorder %v4628_v34, %v4628_v34  ;;  %v2246_v7 = vsel %vm5524_vm7, %v5518_v61, %v2240_v22  ;;  %v7068_v62 = vmax.f32 %v7062_v51, 0.0 }
 0x3a1   : >> { %v2446_v2 = vsel %vm1422_vm8, %v7058_v24, %v2382_v46  ;;  %3652 = vpow2.f32 %v1781_v63  ;;  %v2277_v19 = vmul.f32 -0.5, %v5515_v57  ;;  %v1898_v42 = vmul.f32 0.6931472, %v3647_v15 }
 0x3a2   : >> { %v2383_v35 = vadd.f32 %v1895_v5, %v7068_v62  ;;  %v2511_v59 = vadd.f32 %v2446_v2, %v2445_v8  ;;  %v1901_v24 = vmul.f32 %v7054_v36, %v1900_v4  ;;  %v1662_v33 = vsub.f32 0.0, %v1598_v38  ;;  %v7074_v5 = vld [vmem:[#allocation109_spill] sm:$0xff] }
 0x3a3   : >> { %vm1903_vm1 = vcmp.lt.f32.partialorder %v1902_v26, 0.0004427343  ;;  %v5603_v49 = vadd.f32 %v4981_v58, %v4576_v53  ;;  %v5607_v61 = vadd.f32 %v4991_v23, %v4582_v12  ;;  %v1923_v36 = vadd.f32 1.0, %v7071_v29 }
 0x3a4   : >> { %v2447_v30 = vsel %vm1423_vm10, %v7062_v51, %v2383_v35  ;;  %v1904_v22 = vsel %vm1903_vm1, %v1901_v24, %v1898_v42  ;;  %v1783_v60 = vmul.f32 1.442695, %v1662_v33  ;;  %v2269_v4 = vadd.f32 1.0, %v2268_v3  ;;  %v3649_v26 = vpop.eup %3648  ;;  %v7080_v42 = vld [vmem:[#allocation114_spill] sm:$0xff] }
 0x3a5   : >> { %7069 = vst [vmem:[#allocation95_spill] sm:$0xff] %v5603_v49  ;;  %7070 = vst [vmem:[#allocation98_spill] sm:$0xff] %v5607_v61  ;;  %v2512_v45 = vadd.f32 %v2511_v59, %v2447_v30  ;;  %v2280_v46 = vand.u32 2147483647, %v5515_v57  ;;  %3654 = vpow2.f32 %v5520_v9  ;;  %v7072_v51 = vmax.f32 %v7050_v32, 0.0 }
 0x3a6   : >> { %v7073_v58 = vmax.f32 %v5288_v11, 0.0  ;;  %v2278_v23 = vadd.f32 1.0, %v2277_v19  ;;  %3656 = vpow2.f32 %v1783_v60  ;;  %v1932_v2 = vadd.f32 1.0, %v7074_v5 }
 0x3a7   : >> { %v2384_v8 = vadd.f32 %v1904_v22, %v7072_v51  ;;  %v7075_v38 = vmax.f32 %v5298_v0, 0.0  ;;  %vm5623_vm2 = vcmp.lt.f32.partialorder %v2271_v28, 0.0004427343  ;;  %3658 = vlog2.f32 %v1923_v36  ;;  %v3651_v59 = vpop.eup %3650  ;;  %v7088_v28 = vld [vmem:[#allocation74_spill] sm:$0xff] }
 0x3a8   : >> { %v5616_v63 = vadd.f32 %v2237_v18, %v7073_v58  ;;  %v1599_v62 = vand.u32 2147483647, %v5603_v49  ;;  %v1600_v35 = vand.u32 2147483647, %v5607_v61  ;;  %3660 = vlog2.f32 %v1932_v2  ;;  %v7125_v61 = vld [vmem:[#allocation106_spill] sm:$0xff] }
 0x3a9   : >> { %v5621_v15 = vadd.f32 %v2246_v7, %v7075_v38  ;;  %v2448_v9 = vsel %vm1424_vm12, %v7050_v32, %v2384_v8  ;;  %v2267_v19 = vmul.f32 0.6931472, %v3649_v26  ;;  %v2270_v7 = vmul.f32 %v5505_v41, %v2269_v4  ;;  %v7081_v26 = vld [vmem:[#allocation76_spill] sm:$0xff] }
 0x3aa   : >> { %v2513_v18 = vadd.f32 %v2512_v45, %v2448_v9  ;;  %vm5634_vm3 = vcmp.lt.f32.partialorder %v2280_v46, 0.0004427343  ;;  %v2449_v32 = vsel %vm1425_vm14, %v4607_v10, %v7080_v42  ;;  %v2279_v24 = vmul.f32 %v5515_v57, %v2278_v23 }
 0x3ab   : >> { %v1926_v33 = vmul.f32 -0.5, %v7071_v29  ;;  %v2450_v41 = vsel %vm1426_vm15, %v4628_v34, %v4950_v21  ;;  %v5652_v30 = vadd.f32 %v5036_v27, %v4562_v55  ;;  %v5654_v22 = vpop.eup %3652  ;;  %v1405_v45 = vmax.f32 %v5537_v47, 0.0  ;;  %v7112_v21 = vld [vmem:[#allocation91_spill] sm:$0xff] }
 0x3ac   : >> { %2514 = vadd.xlane.f32.xlu1 %v2513_v18  ;;  %v1935_v10 = vmul.f32 -0.5, %v7074_v5  ;;  %v2516_v57 = vadd.f32 %v2450_v41, %v2449_v32  ;;  %v5660_v60 = vadd.f32 %v5087_v50, %v4565_v56  ;;  %v2276_v36 = vmul.f32 0.6931472, %v3651_v59 }
 0x3ad   : >> { %v2301_v4 = vadd.f32 1.0, %v5654_v22  ;;  %v1663_v46 = vsub.f32 0.0, %v1599_v62  ;;  %v1664_v34 = vsub.f32 0.0, %v1600_v35  ;;  %v2273_v55 = vsel %vm5623_vm2, %v2270_v7, %v2267_v19 }
 0x3ae   : >> { %v1929_v27 = vand.u32 2147483647, %v7071_v29  ;;  %v1601_v51 = vand.u32 2147483647, %v5652_v30  ;;  %vm1427_vm4 = vcmp.ne.f32.partialorder %v7081_v26, %v7081_v26  ;;  %v1927_v56 = vadd.f32 1.0, %v1926_v33 }
 0x3af   : >> { %3662 = vlog2.f32 %v2301_v4  ;;  %v5673_v50 = vadd.f32 %v5078_v31, %v4576_v53  ;;  %v5675_v58 = vpop.eup %3654  ;;  %v1936_v23 = vadd.f32 1.0, %v1935_v10  ;;  %v1938_v2 = vand.u32 2147483647, %v7074_v5  ;;  %v7084_v31 = vld [vmem:[#allocation77_spill] sm:$0xff] }
 0x3b0   : >> { %v1665_v38 = vsub.f32 0.0, %v1601_v51  ;;  %v1602_v3 = vand.u32 2147483647, %v5660_v60  ;;  %v5679_v9 = vpop.eup %3656  ;;  %v7083_v18 = vmax.f32 %v5401_v54, 0.0  ;;  %v2282_v35 = vsel %vm5634_vm3, %v2279_v24, %v2276_v36 }
 0x3b1   : >> { %7082 = vst [vmem:[#allocation69_spill] sm:$0xff] %v5673_v50  ;;  %v1785_v59 = vmul.f32 1.442695, %v1663_v46  ;;  %v1787_v53 = vmul.f32 1.442695, %v1664_v34  ;;  %vm1428_vm5 = vcmp.ne.f32.partialorder %v7084_v31, %v7084_v31  ;;  %v3659_v19 = vpop.eup %3658  ;;  %v2310_v7 = vadd.f32 1.0, %v5679_v9 }
 0x3b2   : >> { %v5683_v62 = vadd.f32 %v2273_v55, %v7083_v18  ;;  %vm5690_vm6 = vcmp.lt.f32.partialorder %v1929_v27, 0.0004427343  ;;  %v1789_v32 = vmul.f32 1.442695, %v1665_v38  ;;  %v5696_v33 = vadd.f32 %v5098_v13, %v4582_v12  ;;  %v3661_v41 = vpop.eup %3660 }
 0x3b3   : >> { %vm1429_vm7 = vcmp.ne.f32.partialorder %v7088_v28, %v7088_v28  ;;  %v1925_v24 = vmul.f32 0.6931472, %v3659_v19  ;;  %v1928_v10 = vmul.f32 %v7071_v29, %v1927_v56  ;;  %v1603_v36 = vand.u32 2147483647, %v5673_v50  ;;  %v7092_v19 = vld [vmem:[#allocation113_spill] sm:$0xff] }
 0x3b4   : >> { %7087 = vst [vmem:[#allocation104_spill] sm:$0xff] %v5696_v33  ;;  %v1666_v4 = vsub.f32 0.0, %v1602_v3  ;;  %vm1430_vm8 = vcmp.ne.f32.partialorder %v4693_v1, %v4693_v1  ;;  %3664 = vlog2.f32 %v2310_v7  ;;  %v1934_v46 = vmul.f32 0.6931472, %v3661_v41 }
 0x3b5   : >> { %v1937_v34 = vmul.f32 %v7074_v5, %v1936_v23  ;;  %vm1939_vm9 = vcmp.lt.f32.partialorder %v1938_v2, 0.0004427343  ;;  %v2304_v12 = vmul.f32 -0.5, %v5654_v22  ;;  %v1931_v13 = vsel %vm5690_vm6, %v1928_v10, %v1925_v24  ;;  %v7093_v24 = vld [vmem:[#allocation116_spill] sm:$0xff] }
 0x3b6   : >> { %3666 = vpow2.f32 %v1789_v32  ;;  %v1791_v55 = vmul.f32 1.442695, %v1666_v4  ;;  %v7089_v27 = vmax.f32 %v7081_v26, 0.0  ;;  %v1604_v56 = vand.u32 2147483647, %v5696_v33  ;;  %v7113_v33 = vld [vmem:[#allocation131_spill] sm:$0xff] }
 0x3b7   : >> { %3668 = vpow2.f32 %v1785_v59  ;;  %v1940_v29 = vsel %vm1939_vm9, %v1937_v34, %v1934_v46  ;;  %v7090_v38 = vmax.f32 %v5415_v17, 0.0  ;;  %v7091_v5 = vmax.f32 %v7084_v31, 0.0  ;;  %v7094_v46 = vld [vmem:[#allocation78_spill] sm:$0xff] }
 0x3b8   : >> { %v2387_v51 = vadd.f32 %v1931_v13, %v7089_v27  ;;  %v1667_v2 = vsub.f32 0.0, %v1603_v36  ;;  %3670 = vpow2.f32 %v1791_v55  ;;  %v2307_v18 = vand.u32 2147483647, %v5654_v22  ;;  %v7098_v27 = vld [vmem:[#allocation81_spill] sm:$0xff] }
 0x3b9   : >> { %v5713_v3 = vadd.f32 %v2282_v35, %v7090_v38  ;;  %v2388_v23 = vadd.f32 %v1940_v29, %v7091_v5  ;;  %3672 = vpow2.f32 %v1787_v53  ;;  %v1959_v7 = vadd.f32 1.0, %v7092_v19  ;;  %v3663_v42 = vpop.eup %3662  ;;  %v7099_v5 = vld [vmem:[#allocation126_spill] sm:$0xff] }
 0x3ba   : >> { %v2451_v59 = vsel %vm1427_vm4, %v7081_v26, %v2387_v51  ;;  %v2305_v32 = vadd.f32 1.0, %v2304_v12  ;;  %v2313_v35 = vmul.f32 -0.5, %v5679_v9  ;;  %v1968_v10 = vadd.f32 1.0, %v7093_v24 }
 0x3bb   : >> { %v2517_v41 = vadd.f32 %v2516_v57, %v2451_v59  ;;  %v2452_v36 = vsel %vm1428_vm5, %v7084_v31, %v2388_v23  ;;  %v1668_v4 = vsub.f32 0.0, %v1604_v56  ;;  %3674 = vlog2.f32 %v1959_v7  ;;  %v7097_v31 = vld [vmem:[#allocation121_spill] sm:$0xff]  ;;  %v7100_v7 = vld [vmem:[#allocation118_spill] sm:$0xff] }
 0x3bc   : >> { %vm1433_vm10 = vcmp.ne.f32.partialorder %v7094_v46, %v7094_v46  ;;  %v1793_v34 = vmul.f32 1.442695, %v1667_v2  ;;  %v1962_v12 = vmul.f32 -0.5, %v7092_v19  ;;  %3676 = vlog2.f32 %v1968_v10 }
 0x3bd   : >> { %v2518_v26 = vadd.f32 %v2517_v41, %v2452_v36  ;;  %v2303_v57 = vmul.f32 0.6931472, %v3663_v42  ;;  %vm5733_vm11 = vcmp.lt.f32.partialorder %v2307_v18, 0.0004427343  ;;  %v2316_v55 = vand.u32 2147483647, %v5679_v9 }
 0x3be   : >> { %v2453_v29 = vsel %vm1429_vm7, %v7088_v28, %v7097_v31  ;;  %vm1434_vm12 = vcmp.ne.f32.partialorder %v7098_v27, %v7098_v27  ;;  %v2306_v51 = vmul.f32 %v5654_v22, %v2305_v32  ;;  %v2314_v56 = vadd.f32 1.0, %v2313_v35  ;;  %v3665_v2 = vpop.eup %3664  ;;  %v7101_v35 = vld [vmem:[#allocation122_spill] sm:$0xff] }
 0x3bf   : >> { %2519 = vadd.xlane.f32.xlu1 %v2518_v26  ;;  %v1971_v38 = vmul.f32 -0.5, %v7093_v24  ;;  %v2454_v23 = vsel %vm1430_vm8, %v4693_v1, %v7099_v5  ;;  %v1795_v18 = vmul.f32 1.442695, %v1668_v4  ;;  %v1965_v59 = vand.u32 2147483647, %v7092_v19 }
 0x3c0   : >> { %v5753_v28 = vadd.f32 %v2454_v23, %v2453_v29  ;;  %v1995_v42 = vadd.f32 1.0, %v7100_v7  ;;  %v5756_v41 = vpop.eup %3666  ;;  %3678 = vpow2.f32 %v1793_v34  ;;  %v1963_v32 = vadd.f32 1.0, %v1962_v12 }
 0x3c1   : >> { %v2004_v10 = vadd.f32 1.0, %v7101_v35  ;;  %v5760_v36 = vpop.eup %3668  ;;  %v2309_v1 = vsel %vm5733_vm11, %v2306_v51, %v2303_v57  ;;  %vm5764_vm13 = vcmp.lt.f32.partialorder %v2316_v55, 0.0004427343  ;;  %v1974_v26 = vand.u32 2147483647, %v7093_v24  ;;  %v7104_v57 = vld [vmem:[#allocation80_spill] sm:$0xff] }
 0x3c2   : >> { %3680 = vlog2.f32 %v1995_v42  ;;  %v5769_v31 = vpop.eup %3670  ;;  %v5772_v34 = vmul.f32 %v5679_v9, %v2314_v56  ;;  %v2337_v12 = vadd.f32 1.0, %v5756_v41  ;;  %v1972_v29 = vadd.f32 1.0, %v1971_v38  ;;  %v7108_v56 = vld [vmem:[#allocation88_spill] sm:$0xff] }
 0x3c3   : >> { %3682 = vlog2.f32 %v2004_v10  ;;  %v5775_v5 = vpop.eup %3672  ;;  %v2312_v13 = vmul.f32 0.6931472, %v3665_v2  ;;  %vm1431_vm14 = vcmp.ne.f32.partialorder %v7104_v57, %v7104_v57  ;;  %vm5779_vm15 = vcmp.lt.f32.partialorder %v1965_v59, 0.0004427343 }
 0x3c4   : >> { %3684 = vpow2.f32 %v1795_v18  ;;  %v5785_v51 = vadd.f32 %v2309_v1, %v1405_v45  ;;  %v2346_v9 = vadd.f32 1.0, %v5769_v31  ;;  %vm1432_vm1 = vcmp.ne.f32.partialorder %v7108_v56, %v7108_v56  ;;  %v7111_v45 = vld [vmem:[#allocation127_spill] sm:$0xff]  ;;  %v7122_v18 = vld [vmem:[#allocation125_spill] sm:$0xff] }
 0x3c5   : >> { %v1964_v38 = vmul.f32 %v7092_v19, %v1963_v32  ;;  %v1998_v23 = vmul.f32 -0.5, %v7100_v7  ;;  %v3675_v2 = vpop.eup %3674  ;;  %vm5792_vm2 = vcmp.lt.f32.partialorder %v1974_v26, 0.0004427343  ;;  %v2001_v59 = vand.u32 2147483647, %v7100_v7 }
 0x3c6   : >> { %7107 = vst [vmem:[#allocation70_spill] sm:$0xff] %v5785_v51  ;;  %v2007_v42 = vmul.f32 -0.5, %v7101_v35  ;;  %v2457_v10 = vsel %vm1433_vm10, %v7094_v46, %v7111_v45  ;;  %v3677_v1 = vpop.eup %3676  ;;  %3686 = vlog2.f32 %v2337_v12  ;;  %v2340_v19 = vmul.f32 -0.5, %v5756_v41  ;;  %v7114_v12 = vld [vmem:[#allocation99_spill] sm:$0xff] }
 0x3c7   : >> { %v1961_v32 = vmul.f32 0.6931472, %v3675_v2  ;;  %v1973_v26 = vmul.f32 %v7093_v24, %v1972_v29  ;;  %vm1437_vm3 = vcmp.ne.f32.partialorder %v7112_v21, %v7112_v21  ;;  %v2318_v22 = vsel %vm5764_vm13, %v5772_v34, %v2312_v13  ;;  %v7115_v29 = vld [vmem:[#allocation97_spill] sm:$0xff] }
 0x3c8   : >> { %v2343_v53 = vand.u32 2147483647, %v5756_v41  ;;  %v1970_v8 = vmul.f32 0.6931472, %v3677_v1  ;;  %v2458_v46 = vsel %vm1434_vm12, %v7098_v27, %v7113_v33  ;;  %vm1438_vm4 = vcmp.ne.f32.partialorder %v7114_v12, %v7114_v12 }
 0x3c9   : >> { %3688 = vlog2.f32 %v2346_v9  ;;  %v1967_v24 = vsel %vm5779_vm15, %v1964_v38, %v1961_v32  ;;  %vm1435_vm5 = vcmp.ne.f32.partialorder %v7115_v29, %v7115_v29  ;;  %v1999_v4 = vadd.f32 1.0, %v1998_v23  ;;  %v7121_v23 = vld [vmem:[#allocation102_spill] sm:$0xff] }
 0x3ca   : >> { %v2526_v34 = vadd.f32 %v2458_v46, %v2457_v10  ;;  %v1976_v13 = vsel %vm5792_vm2, %v1973_v26, %v1970_v8  ;;  %v7116_v2 = vmax.f32 %v7104_v57, 0.0  ;;  %vm5826_vm6 = vcmp.lt.f32.partialorder %v2001_v59, 0.0004427343  ;;  %v5830_v9 = vpop.eup %3678  ;;  %v7123_v46 = vld [vmem:[#allocation130_spill] sm:$0xff] }
 0x3cb   : >> { %v2008_v27 = vadd.f32 1.0, %v2007_v42  ;;  %7119 = vst [vmem:[#allocation107_spill] sm:$0xff] %v5830_v9  ;;  %v2349_v55 = vmul.f32 -0.5, %v5769_v31  ;;  %v7120_v38 = vmax.f32 %v7108_v56, 0.0  ;;  %vm1436_vm7 = vcmp.ne.f32.partialorder %v7121_v23, %v7121_v23 }
 0x3cc   : >> { %v2391_v45 = vadd.f32 %v1967_v24, %v7116_v2  ;;  %v2010_v8 = vand.u32 2147483647, %v7101_v35  ;;  %v2031_v10 = vadd.f32 1.0, %v7122_v18  ;;  %v3681_v32 = vpop.eup %3680  ;;  %v2341_v59 = vadd.f32 1.0, %v2340_v19  ;;  %v7126_v19 = vld [vmem:[#allocation111_spill] sm:$0xff] }
 0x3cd   : >> { %v2392_v1 = vadd.f32 %v1976_v13, %v7120_v38  ;;  %v2352_v26 = vand.u32 2147483647, %v5769_v31  ;;  %v2040_v24 = vadd.f32 1.0, %v7123_v46  ;;  %v3683_v2 = vpop.eup %3682  ;;  %v1997_v38 = vmul.f32 0.6931472, %v3681_v32 }
 0x3ce   : >> { %v2455_v42 = vsel %vm1431_vm14, %v7104_v57, %v2391_v45  ;;  %v2000_v50 = vmul.f32 %v7100_v7, %v1999_v4  ;;  %3690 = vlog2.f32 %v2031_v10  ;;  %v5847_v49 = vpop.eup %3684  ;;  %vm1441_vm8 = vcmp.ne.f32.partialorder %v7125_v61, %v7125_v61 }
 0x3cf   : >> { %v2522_v13 = vadd.f32 %v5753_v28, %v2455_v42  ;;  %7124 = vst [vmem:[#allocation96_spill] sm:$0xff] %v5847_v49  ;;  %vm1442_vm9 = vcmp.ne.f32.partialorder %v7126_v19, %v7126_v19  ;;  %v2456_v57 = vsel %vm1432_vm1, %v7108_v56, %v2392_v1  ;;  %v2006_v45 = vmul.f32 0.6931472, %v3683_v2 }
 0x3d0   : >> { %v2009_v28 = vmul.f32 %v7101_v35, %v2008_v27  ;;  %3692 = vlog2.f32 %v2040_v24  ;;  %v2350_v32 = vadd.f32 1.0, %v2349_v55  ;;  %v2003_v4 = vsel %vm5826_vm6, %v2000_v50, %v1997_v38  ;;  %v3687_v1 = vpop.eup %3686  ;;  %v7132_v55 = vld [vmem:[#allocation134_spill] sm:$0xff] }
 0x3d1   : >> { %v2523_v7 = vadd.f32 %v2522_v13, %v2456_v57  ;;  %vm2011_vm10 = vcmp.lt.f32.partialorder %v2010_v8, 0.0004427343  ;;  %v7127_v10 = vmax.f32 %v5564_v40, 0.0  ;;  %v7128_v9 = vmax.f32 %v7115_v29, 0.0  ;;  %v7146_v35 = vld [vmem:[#allocation138_spill] sm:$0xff] }
 0x3d2   : >> { %v2012_v49 = vsel %vm2011_vm10, %v2009_v28, %v2006_v45  ;;  %v2034_v56 = vmul.f32 -0.5, %v7122_v18  ;;  %vm5867_vm11 = vcmp.lt.f32.partialorder %v2343_v53, 0.0004427343  ;;  %v7131_v33 = vmax.f32 %v7121_v23, 0.0  ;;  %v7137_v28 = vld [vmem:[#allocation108_spill] sm:$0xff] }
 0x3d3   : >> { %v5862_v42 = vadd.f32 %v2318_v22, %v7127_v10  ;;  %v2395_v51 = vadd.f32 %v2003_v4, %v7128_v9  ;;  %2524 = vadd.xlane.f32.xlu0 %v2523_v7  ;;  %v2043_v27 = vmul.f32 -0.5, %v7123_v46  ;;  %v2461_v22 = vsel %vm1437_vm3, %v7112_v21, %v7132_v55  ;;  %v3689_v2 = vpop.eup %3688  ;;  %v7138_v7 = vld [vmem:[#allocation135_spill] sm:$0xff]  ;;  %v7141_v10 = vld [vmem:[#allocation110_spill] sm:$0xff] }
 0x3d4   : >> { %v2396_v50 = vadd.f32 %v2012_v49, %v7131_v33  ;;  %v2342_v9 = vmul.f32 %v5756_v41, %v2341_v59  ;;  %vm5880_vm12 = vcmp.lt.f32.partialorder %v2352_v26, 0.0004427343  ;;  %v7135_v49 = vld [vmem:[#allocation137_spill] sm:$0xff]  ;;  %v2351_v21 = vmul.f32 %v5769_v31, %v2350_v32  ;;  %v7140_v32 = vld [vmem:[#allocation119_spill] sm:$0xff]  ;;  %v7144_v33 = vld [vmem:[#allocation140_spill] sm:$0xff] }
 0x3d5   : >> { %v2459_v53 = vsel %vm1435_vm5, %v7115_v29, %v2395_v51  ;;  %v2462_v24 = vsel %vm1438_vm4, %v7114_v12, %v7135_v49  ;;  %v2037_v41 = vand.u32 2147483647, %v7122_v18  ;;  %v2339_v26 = vmul.f32 0.6931472, %v3687_v1  ;;  %v7136_v29 = vld [vmem:[#allocation133_spill] sm:$0xff] }
 0x3d6   : >> { %v2527_v13 = vadd.f32 %v2526_v34, %v2459_v53  ;;  %v2531_v59 = vadd.f32 %v2462_v24, %v2461_v22  ;;  %v2460_v38 = vsel %vm1436_vm7, %v7121_v23, %v2396_v50  ;;  %v2035_v51 = vadd.f32 1.0, %v2034_v56  ;;  %v7139_v34 = vld [vmem:[#allocation115_spill] sm:$0xff] }
 0x3d7   : >> { %v2067_v57 = vadd.f32 1.0, %v7136_v29  ;;  %vm1439_vm13 = vcmp.ne.f32.partialorder %v7137_v28, %v7137_v28  ;;  %v2044_v12 = vadd.f32 1.0, %v2043_v27  ;;  %v2076_v31 = vadd.f32 1.0, %v7138_v7  ;;  %v7145_v27 = vld [vmem:[#allocation141_spill] sm:$0xff] }
 0x3d8   : >> { %v2528_v45 = vadd.f32 %v2527_v13, %v2460_v38  ;;  %vm1445_vm14 = vcmp.ne.f32.partialorder %v7139_v34, %v7139_v34  ;;  %vm1446_vm15 = vcmp.ne.f32.partialorder %v7140_v32, %v7140_v32  ;;  %v2348_v4 = vmul.f32 0.6931472, %v3689_v2  ;;  %v3691_v56 = vpop.eup %3690 }
 0x3d9   : >> { %vm1440_vm1 = vcmp.ne.f32.partialorder %v7141_v10, %v7141_v10  ;;  %v2046_v23 = vand.u32 2147483647, %v7123_v46  ;;  %3694 = vlog2.f32 %v2067_v57  ;;  %vm5910_vm2 = vcmp.lt.f32.partialorder %v2037_v41, 0.0004427343 }
 0x3da   : >> { %2529 = vadd.xlane.f32.xlu1 %v2528_v45  ;;  %3696 = vlog2.f32 %v2076_v31  ;;  %v2465_v50 = vsel %vm1441_vm8, %v7125_v61, %v7144_v33  ;;  %v2466_v55 = vsel %vm1442_vm9, %v7126_v19, %v7145_v27  ;;  %v3693_v22 = vpop.eup %3692  ;;  %v2345_v53 = vsel %vm5867_vm11, %v2342_v9, %v2339_v26  ;;  %v7149_v31 = vld [vmem:[#allocation124_spill] sm:$0xff]  ;;  %v7152_v33 = vld [vmem:[#allocation117_spill] sm:$0xff] }
 0x3db   : >> { %v2033_v49 = vmul.f32 0.6931472, %v3691_v56  ;;  %v2036_v24 = vmul.f32 %v7122_v18, %v2035_v51  ;;  %v2070_v2 = vmul.f32 -0.5, %v7136_v29  ;;  %v2042_v13 = vmul.f32 0.6931472, %v3693_v22 }
 0x3dc   : >> { %v2045_v41 = vmul.f32 %v7123_v46, %v2044_v12  ;;  %v2079_v61 = vmul.f32 -0.5, %v7138_v7  ;;  %v5930_v38 = vadd.f32 %v2466_v55, %v2465_v50  ;;  %v2354_v57 = vsel %vm5880_vm12, %v2351_v21, %v2348_v4  ;;  %v7148_v46 = vld [vmem:[#allocation84_spill] sm:$0xff] }
 0x3dd   : >> { %v2039_v19 = vsel %vm5910_vm2, %v2036_v24, %v2033_v49  ;;  %vm2047_vm3 = vcmp.lt.f32.partialorder %v2046_v23, 0.0004427343  ;;  %v2103_v9 = vadd.f32 1.0, %v7146_v35  ;;  %v7147_v18 = vmax.f32 %v7137_v28, 0.0 }
 0x3de   : >> { %v2048_v26 = vsel %vm2047_vm3, %v2045_v41, %v2042_v13  ;;  %v2073_v45 = vand.u32 2147483647, %v7136_v29  ;;  %v2112_v12 = vadd.f32 1.0, %v7148_v46  ;;  %vm1449_vm4 = vcmp.ne.f32.partialorder %v7149_v31, %v7149_v31  ;;  %v7157_v41 = vld [vmem:[#allocation142_spill] sm:$0xff] }
 0x3df   : >> { %v2399_v51 = vadd.f32 %v2039_v19, %v7147_v18  ;;  %v7150_v8 = vmax.f32 %v5652_v30, 0.0  ;;  %v7151_v4 = vmax.f32 %v7141_v10, 0.0  ;;  %v2071_v56 = vadd.f32 1.0, %v2070_v2  ;;  %v7154_v2 = vld [vmem:[#allocation120_spill] sm:$0xff] }
 0x3e0   : >> { %3698 = vlog2.f32 %v2103_v9  ;;  %vm1450_vm5 = vcmp.ne.f32.partialorder %v5024_v52, %v5024_v52  ;;  %vm1443_vm6 = vcmp.ne.f32.partialorder %v7152_v33, %v7152_v33  ;;  %v2080_v50 = vadd.f32 1.0, %v2079_v61  ;;  %v7158_v61 = vld [vmem:[#allocation143_spill] sm:$0xff] }
 0x3e1   : >> { %v5945_v21 = vadd.f32 %v2345_v53, %v7150_v8  ;;  %v2400_v23 = vadd.f32 %v2048_v26, %v7151_v4  ;;  %v2463_v1 = vsel %vm1439_vm13, %v7137_v28, %v2399_v51  ;;  %v2106_v27 = vmul.f32 -0.5, %v7146_v35  ;;  %v7159_v4 = vld [vmem:[#allocation79_spill] sm:$0xff] }
 0x3e2   : >> { %3700 = vlog2.f32 %v2112_v12  ;;  %v7153_v55 = vmax.f32 %v5660_v60, 0.0  ;;  %v2532_v53 = vadd.f32 %v2531_v59, %v2463_v1  ;;  %v2082_v49 = vand.u32 2147483647, %v7138_v7 }
 0x3e3   : >> { %v2115_v24 = vmul.f32 -0.5, %v7148_v46  ;;  %v2464_v28 = vsel %vm1440_vm1, %v7141_v10, %v2400_v23  ;;  %vm1444_vm7 = vcmp.ne.f32.partialorder %v7154_v2, %v7154_v2  ;;  %vm5970_vm8 = vcmp.lt.f32.partialorder %v2073_v45, 0.0004427343  ;;  %v3695_v10 = vpop.eup %3694 }
 0x3e4   : >> { %v5960_v22 = vadd.f32 %v2354_v57, %v7153_v55  ;;  %v2469_v59 = vsel %vm1445_vm14, %v7139_v34, %v7157_v41  ;;  %v2470_v57 = vsel %vm1446_vm15, %v7140_v32, %v7158_v61  ;;  %v2533_v19 = vadd.f32 %v2532_v53, %v2464_v28  ;;  %v3697_v51 = vpop.eup %3696  ;;  %v7160_v32 = vld [vmem:[#allocation83_spill] sm:$0xff] }
 0x3e5   : >> { %v2072_v9 = vmul.f32 %v7136_v29, %v2071_v56  ;;  %v2109_v26 = vand.u32 2147483647, %v7146_v35  ;;  %v2541_v18 = vadd.f32 %v2470_v57, %v2469_v59  ;;  %v2069_v45 = vmul.f32 0.6931472, %v3695_v10  ;;  %v7161_v56 = vld [vmem:[#allocation123_spill] sm:$0xff]  ;;  %v7166_v59 = vld [vmem:[#allocation86_spill] sm:$0xff] }
 0x3e6   : >> { %v2081_v12 = vmul.f32 %v7138_v7, %v2080_v50  ;;  %v2107_v8 = vadd.f32 1.0, %v2106_v27  ;;  %v2139_v34 = vadd.f32 1.0, %v7159_v4  ;;  %2534 = vadd.xlane.f32.xlu0 %v2533_v19  ;;  %v2078_v23 = vmul.f32 0.6931472, %v3697_v51 }
 0x3e7   : >> { %v2116_v1 = vadd.f32 1.0, %v2115_v24  ;;  %v2118_v55 = vand.u32 2147483647, %v7148_v46  ;;  %v2148_v41 = vadd.f32 1.0, %v7160_v32  ;;  %vm1453_vm9 = vcmp.ne.f32.partialorder %v5096_v20, %v5096_v20 }
 0x3e8   : >> { %v2075_v29 = vsel %vm5970_vm8, %v2072_v9, %v2069_v45  ;;  %vm2083_vm10 = vcmp.lt.f32.partialorder %v2082_v49, 0.0004427343  ;;  %vm1447_vm11 = vcmp.ne.f32.partialorder %v7161_v56, %v7161_v56  ;;  %3702 = vlog2.f32 %v2139_v34  ;;  %v7169_v34 = vld [vmem:[#allocation82_spill] sm:$0xff] }
 0x3e9   : >> { %vm1454_vm12 = vcmp.ne.f32.partialorder %v5105_v25, %v5105_v25  ;;  %v2084_v7 = vsel %vm2083_vm10, %v2081_v12, %v2078_v23  ;;  %v7162_v50 = vmax.f32 %v7152_v33, 0.0  ;;  %vm6000_vm13 = vcmp.lt.f32.partialorder %v2109_v26, 0.0004427343 }
 0x3ea   : >> { %3704 = vlog2.f32 %v2148_v41  ;;  %v7165_v24 = vmax.f32 %v7154_v2, 0.0  ;;  %v2108_v49 = vmul.f32 %v7146_v35, %v2107_v8  ;;  %v2142_v13 = vmul.f32 -0.5, %v7159_v4  ;;  %v3699_v57 = vpop.eup %3698 }
 0x3eb   : >> { %v2403_v27 = vadd.f32 %v2075_v29, %v7162_v50  ;;  %v2473_v61 = vsel %vm1449_vm4, %v7149_v31, %v7166_v59  ;;  %v2117_v19 = vmul.f32 %v7148_v46, %v2116_v1  ;;  %vm6018_vm14 = vcmp.lt.f32.partialorder %v2118_v55, 0.0004427343  ;;  %v7172_v50 = vld [vmem:[#allocation128_spill] sm:$0xff] }
 0x3ec   : >> { %v2404_v28 = vadd.f32 %v2084_v7, %v7165_v24  ;;  %v2474_v35 = vsel %vm1450_vm5, %v5024_v52, %v5365_v37  ;;  %v3701_v26 = vpop.eup %3700  ;;  %v2105_v51 = vmul.f32 0.6931472, %v3699_v57  ;;  %v2151_v45 = vmul.f32 -0.5, %v7160_v32 }
 0x3ed   : >> { %v2467_v10 = vsel %vm1443_vm6, %v7152_v33, %v2403_v27  ;;  %v2546_v12 = vadd.f32 %v2474_v35, %v2473_v61  ;;  %v2114_v33 = vmul.f32 0.6931472, %v3701_v26  ;;  %v2145_v8 = vand.u32 2147483647, %v7159_v4 }
 0x3ee   : >> { %v2537_v31 = vadd.f32 %v5930_v38, %v2467_v10  ;;  %v2468_v46 = vsel %vm1444_vm7, %v7154_v2, %v2404_v28  ;;  %v2175_v23 = vadd.f32 1.0, %v7169_v34  ;;  %v2111_v52 = vsel %vm6000_vm13, %v2108_v49, %v2105_v51  ;;  %v7170_v38 = vld [vmem:[#allocation65_spill] sm:$0xff] }
 0x3ef   : >> { %v2143_v37 = vadd.f32 1.0, %v2142_v13  ;;  %v2184_v55 = vadd.f32 1.0, %v7170_v38  ;;  %v2120_v41 = vsel %vm6018_vm14, %v2117_v19, %v2114_v33  ;;  %v7171_v29 = vmax.f32 %v7161_v56, 0.0 }
 0x3f0   : >> { %v2538_v1 = vadd.f32 %v2537_v31, %v2468_v46  ;;  %v2154_v2 = vand.u32 2147483647, %v7160_v32  ;;  %3706 = vlog2.f32 %v2175_v23  ;;  %vm1457_vm15 = vcmp.ne.f32.partialorder %v5141_v16, %v5141_v16  ;;  %v7188_v31 = vld [vmem:[#allocation89_spill] sm:$0xff] }
 0x3f1   : >> { %v2407_v7 = vadd.f32 %v2111_v52, %v7171_v29  ;;  %vm1448_vm1 = vcmp.ne.f32.partialorder %v7172_v50, %v7172_v50  ;;  %v7173_v27 = vmax.f32 %v7172_v50, 0.0  ;;  %v2152_v24 = vadd.f32 1.0, %v2151_v45 }
 0x3f2   : >> { %2539 = vadd.xlane.f32.xlu1 %v2538_v1  ;;  %3708 = vlog2.f32 %v2184_v55  ;;  %vm1458_vm2 = vcmp.ne.f32.partialorder %v5179_v48, %v5179_v48  ;;  %vm6055_vm3 = vcmp.lt.f32.partialorder %v2145_v8, 0.0004427343  ;;  %v2178_v13 = vmul.f32 -0.5, %v7169_v34  ;;  %v3703_v61 = vpop.eup %3702  ;;  %v7178_v8 = vld [vmem:[#allocation129_spill] sm:$0xff] }
 0x3f3   : >> { %v2408_v53 = vadd.f32 %v2120_v41, %v7173_v27  ;;  %v2471_v28 = vsel %vm1447_vm11, %v7161_v56, %v2407_v7  ;;  %v2477_v59 = vsel %vm1453_vm9, %v5096_v20, %v5421_v44  ;;  %v2144_v10 = vmul.f32 %v7159_v4, %v2143_v37  ;;  %v7180_v37 = vld [vmem:[#allocation132_spill] sm:$0xff] }
 0x3f4   : >> { %v2542_v57 = vadd.f32 %v2541_v18, %v2471_v28  ;;  %v2187_v19 = vmul.f32 -0.5, %v7170_v38  ;;  %v2478_v56 = vsel %vm1454_vm12, %v5105_v25, %v5430_v14  ;;  %v3705_v9 = vpop.eup %3704  ;;  %v2141_v26 = vmul.f32 0.6931472, %v3703_v61  ;;  %v7186_v28 = vld [vmem:[#allocation68_spill] sm:$0xff] }
 0x3f5   : >> { %v2472_v35 = vsel %vm1448_vm1, %v7172_v50, %v2408_v53  ;;  %vm6073_vm4 = vcmp.lt.f32.partialorder %v2154_v2, 0.0004427343  ;;  %v2551_v20 = vadd.f32 %v2478_v56, %v2477_v59  ;;  %v2150_v18 = vmul.f32 0.6931472, %v3705_v9 }
 0x3f6   : >> { %v2543_v44 = vadd.f32 %v2542_v57, %v2472_v35  ;;  %v2153_v4 = vmul.f32 %v7160_v32, %v2152_v24  ;;  %v2181_v51 = vand.u32 2147483647, %v7169_v34  ;;  %v2147_v45 = vsel %vm6055_vm3, %v2144_v10, %v2141_v26  ;;  %v7187_v10 = vld [vmem:[#allocation92_spill] sm:$0xff] }
 0x3f7   : >> { %v2179_v46 = vadd.f32 1.0, %v2178_v13  ;;  %v2190_v25 = vand.u32 2147483647, %v7170_v38  ;;  %v2211_v14 = vadd.f32 1.0, %v5313_v43  ;;  %v7179_v23 = vmax.f32 %v7178_v8, 0.0 }
 0x3f8   : >> { %2544 = vadd.xlane.f32.xlu0 %v2543_v44  ;;  %v2156_v33 = vsel %vm6073_vm4, %v2153_v4, %v2150_v18  ;;  %v2188_v52 = vadd.f32 1.0, %v2187_v19  ;;  %v2220_v32 = vadd.f32 1.0, %v5403_v6  ;;  %vm1451_vm5 = vcmp.ne.f32.partialorder %v7178_v8, %v7178_v8  ;;  %v7189_v18 = vld [vmem:[#allocation136_spill] sm:$0xff] }
 0x3f9   : >> { %v2411_v1 = vadd.f32 %v2147_v45, %v7179_v23  ;;  %vm1452_vm6 = vcmp.ne.f32.partialorder %v7180_v37, %v7180_v37  ;;  %v7181_v55 = vmax.f32 %v7180_v37, 0.0  ;;  %3710 = vlog2.f32 %v2211_v14  ;;  %v7191_v45 = vld [vmem:[#allocation94_spill] sm:$0xff]  ;;  %v7194_v23 = vld [vmem:[#allocation85_spill] sm:$0xff] }
 0x3fa   : >> { %vm1461_vm7 = vcmp.ne.f32.partialorder %v5288_v11, %v5288_v11  ;;  %vm1462_vm8 = vcmp.ne.f32.partialorder %v5298_v0, %v5298_v0  ;;  %vm6099_vm9 = vcmp.lt.f32.partialorder %v2181_v51, 0.0004427343  ;;  %v2214_v2 = vmul.f32 -0.5, %v5313_v43  ;;  %v3707_v50 = vpop.eup %3706 }
 0x3fb   : >> { %v2412_v41 = vadd.f32 %v2156_v33, %v7181_v55  ;;  %v2475_v29 = vsel %vm1451_vm5, %v7178_v8, %v2411_v1  ;;  %3712 = vlog2.f32 %v2220_v32  ;;  %v2180_v53 = vmul.f32 %v7169_v34, %v2179_v46 }
 0x3fc   : >> { %v2547_v27 = vadd.f32 %v2546_v12, %v2475_v29  ;;  %vm6105_vm10 = vcmp.lt.f32.partialorder %v2190_v25, 0.0004427343  ;;  %v2481_v49 = vsel %vm1457_vm15, %v5141_v16, %v7186_v28  ;;  %v3709_v13 = vpop.eup %3708  ;;  %v2177_v61 = vmul.f32 0.6931472, %v3707_v50  ;;  %v7192_v25 = vld [vmem:[#allocation139_spill] sm:$0xff] }
 0x3fd   : >> { %v2476_v59 = vsel %vm1452_vm6, %v7180_v37, %v2412_v41  ;;  %v2189_v57 = vmul.f32 %v7170_v38, %v2188_v52  ;;  %v2482_v12 = vsel %vm1458_vm2, %v5179_v48, %v7187_v10  ;;  %v2186_v19 = vmul.f32 0.6931472, %v3709_v13 }
 0x3fe   : >> { %v2548_v34 = vadd.f32 %v2547_v27, %v2476_v59  ;;  %v2223_v56 = vmul.f32 -0.5, %v5403_v6  ;;  %v2556_v9 = vadd.f32 %v2482_v12, %v2481_v49  ;;  %v2183_v16 = vsel %vm6099_vm9, %v2180_v53, %v2177_v61  ;;  %v7199_v61 = vld [vmem:[#allocation87_spill] sm:$0xff] }
 0x3ff   : >> { %v2215_v35 = vadd.f32 1.0, %v2214_v2  ;;  %v2217_v26 = vand.u32 2147483647, %v5313_v43  ;;  %v2247_v44 = vadd.f32 1.0, %v7188_v31  ;;  %v2192_v38 = vsel %vm6105_vm10, %v2189_v57, %v2186_v19  ;;  %v7202_v19 = vld [vmem:[#allocation67_spill] sm:$0xff] }
 0x400   : >> { %2549 = vadd.xlane.f32.xlu1 %v2548_v34  ;;  %v7190_v4 = vmax.f32 %v7189_v18, 0.0  ;;  %v2226_v51 = vand.u32 2147483647, %v5403_v6  ;;  %v2256_v46 = vadd.f32 1.0, %v7191_v45  ;;  %vm1465_vm11 = vcmp.ne.f32.partialorder %v5401_v54, %v5401_v54 }
 0x401   : >> { %vm1455_vm12 = vcmp.ne.f32.partialorder %v7189_v18, %v7189_v18  ;;  %vm1456_vm13 = vcmp.ne.f32.partialorder %v7192_v25, %v7192_v25  ;;  %v7193_v14 = vmax.f32 %v7192_v25, 0.0  ;;  %3714 = vlog2.f32 %v2247_v44 }
 0x402   : >> { %v2415_v48 = vadd.f32 %v2183_v16, %v7190_v4  ;;  %vm1466_vm14 = vcmp.ne.f32.partialorder %v5415_v17, %v5415_v17  ;;  %vm1459_vm15 = vcmp.ne.f32.partialorder %v7194_v23, %v7194_v23  ;;  %v2224_v1 = vadd.f32 1.0, %v2223_v56 }
 0x403   : >> { %v2416_v33 = vadd.f32 %v2192_v38, %v7193_v14  ;;  %3716 = vlog2.f32 %v2256_v46  ;;  %v2216_v32 = vmul.f32 %v5313_v43, %v2215_v35  ;;  %vm6146_vm1 = vcmp.lt.f32.partialorder %v2217_v26, 0.0004427343  ;;  %v3711_v41 = vpop.eup %3710 }
 0x404   : >> { %v2479_v8 = vsel %vm1455_vm12, %v7189_v18, %v2415_v48  ;;  %v2250_v55 = vmul.f32 -0.5, %v7188_v31  ;;  %vm6152_vm2 = vcmp.lt.f32.partialorder %v2226_v51, 0.0004427343  ;;  %v2486_v43 = vsel %vm1462_vm8, %v5298_v0, %v5621_v15 }
 0x405   : >> { %v2552_v52 = vadd.f32 %v2551_v20, %v2479_v8  ;;  %v2480_v29 = vsel %vm1456_vm13, %v7192_v25, %v2416_v33  ;;  %v2485_v20 = vsel %vm1461_vm7, %v5288_v11, %v5616_v63  ;;  %v3713_v2 = vpop.eup %3712  ;;  %v2213_v27 = vmul.f32 0.6931472, %v3711_v41 }
 0x406   : >> { %v2259_v53 = vmul.f32 -0.5, %v7191_v45  ;;  %v2561_v24 = vadd.f32 %v2486_v43, %v2485_v20  ;;  %v2222_v28 = vmul.f32 0.6931472, %v3713_v2  ;;  %v2225_v49 = vmul.f32 %v5403_v6, %v2224_v1 }
 0x407   : >> { %v2553_v50 = vadd.f32 %v2552_v52, %v2480_v29  ;;  %v2253_v13 = vand.u32 2147483647, %v7188_v31  ;;  %v2283_v59 = vadd.f32 1.0, %v5578_v39  ;;  %v2219_v11 = vsel %vm6146_vm1, %v2216_v32, %v2213_v27  ;;  %v7207_v52 = vld [vmem:[#allocation66_spill] sm:$0xff] }
 0x408   : >> { %v2251_v63 = vadd.f32 1.0, %v2250_v55  ;;  %v2262_v0 = vand.u32 2147483647, %v7191_v45  ;;  %v2292_v15 = vadd.f32 1.0, %v5675_v58  ;;  %vm1469_vm3 = vcmp.ne.f32.partialorder %v5537_v47, %v5537_v47 }
 0x409   : >> { %2554 = vadd.xlane.f32.xlu0 %v2553_v50  ;;  %vm1460_vm4 = vcmp.ne.f32.partialorder %v7199_v61, %v7199_v61  ;;  %v2228_v6 = vsel %vm6152_vm2, %v2225_v49, %v2222_v28  ;;  %v7200_v57 = vmax.f32 %v7194_v23, 0.0  ;;  %3718 = vlog2.f32 %v2283_v59  ;;  %v7210_v50 = vld [vmem:[#allocation70_spill] sm:$0xff] }
 0x40a   : >> { %vm1470_vm5 = vcmp.ne.f32.partialorder %v5564_v40, %v5564_v40  ;;  %v7201_v12 = vmax.f32 %v7199_v61, 0.0  ;;  %vm1463_vm6 = vcmp.ne.f32.partialorder %v7202_v19, %v7202_v19  ;;  %v2260_v56 = vadd.f32 1.0, %v2259_v53 }
 0x40b   : >> { %v2419_v10 = vadd.f32 %v2219_v11, %v7200_v57  ;;  %3720 = vlog2.f32 %v2292_v15  ;;  %vm6192_vm7 = vcmp.lt.f32.partialorder %v2253_v13, 0.0004427343  ;;  %v2286_v26 = vmul.f32 -0.5, %v5578_v39  ;;  %v3715_v38 = vpop.eup %3714  ;;  %v7226_v13 = vld [vmem:[#allocation69_spill] sm:$0xff] }
 0x40c   : >> { %v2420_v34 = vadd.f32 %v2228_v6, %v7201_v12  ;;  %v2489_v44 = vsel %vm1465_vm11, %v5401_v54, %v5683_v62  ;;  %v2252_v4 = vmul.f32 %v7188_v31, %v2251_v63  ;;  %vm6203_vm8 = vcmp.lt.f32.partialorder %v2262_v0, 0.0004427343  ;;  %v7214_v12 = vld [vmem:[#allocation90_spill] sm:$0xff] }
 0x40d   : >> { %v2483_v16 = vsel %vm1459_vm15, %v7194_v23, %v2419_v10  ;;  %v2490_v51 = vsel %vm1466_vm14, %v5415_v17, %v5713_v3  ;;  %v3717_v46 = vpop.eup %3716  ;;  %v2249_v62 = vmul.f32 0.6931472, %v3715_v38  ;;  %v2261_v33 = vmul.f32 %v7191_v45, %v2260_v56  ;;  %v7231_v38 = vld [vmem:[#allocation60_spill] sm:$0xff] }
 0x40e   : >> { %v2557_v18 = vadd.f32 %v2556_v9, %v2483_v16  ;;  %v2484_v54 = vsel %vm1460_vm4, %v7199_v61, %v2420_v34  ;;  %v2295_v9 = vmul.f32 -0.5, %v5675_v58  ;;  %v2566_v31 = vadd.f32 %v2490_v51, %v2489_v44  ;;  %v7216_v16 = vld [vmem:[#allocation96_spill] sm:$0xff] }
 0x40f   : >> { %v2258_v14 = vmul.f32 0.6931472, %v3717_v46  ;;  %v2319_v8 = vadd.f32 1.0, %v5760_v36  ;;  %v2255_v23 = vsel %vm6192_vm7, %v2252_v4, %v2249_v62  ;;  %v2287_v17 = vadd.f32 1.0, %v2286_v26  ;;  %v7217_v26 = vld [vmem:[#allocation93_spill] sm:$0xff] }
 0x410   : >> { %v2558_v25 = vadd.f32 %v2557_v18, %v2484_v54  ;;  %v2289_v3 = vand.u32 2147483647, %v5578_v39  ;;  %v2328_v1 = vadd.f32 1.0, %v5775_v5  ;;  %vm1464_vm9 = vcmp.ne.f32.partialorder %v7207_v52, %v7207_v52 }
 0x411   : >> { %v2264_v32 = vsel %vm6203_vm8, %v2261_v33, %v2258_v14  ;;  %v7208_v37 = vmax.f32 %v7202_v19, 0.0  ;;  %3722 = vlog2.f32 %v2319_v8  ;;  %vm1473_vm10 = vcmp.ne.f32.partialorder %v5652_v30, %v5652_v30 }
 0x412   : >> { %2559 = vadd.xlane.f32.xlu1 %v2558_v25  ;;  %v7209_v55 = vmax.f32 %v7207_v52, 0.0  ;;  %v2296_v29 = vadd.f32 1.0, %v2295_v9  ;;  %v2322_v7 = vmul.f32 -0.5, %v5760_v36  ;;  %3724 = vlog2.f32 %v2328_v1 }
 0x413   : >> { %v2423_v45 = vadd.f32 %v2255_v23, %v7208_v37  ;;  %vm1474_vm11 = vcmp.ne.f32.partialorder %v5660_v60, %v5660_v60  ;;  %v2298_v43 = vand.u32 2147483647, %v5675_v58  ;;  %v2331_v2 = vmul.f32 -0.5, %v5775_v5  ;;  %v3719_v53 = vpop.eup %3718 }
 0x414   : >> { %v2424_v41 = vadd.f32 %v2264_v32, %v7209_v55  ;;  %v2493_v27 = vsel %vm1469_vm3, %v5537_v47, %v7210_v50  ;;  %v2288_v49 = vmul.f32 %v5578_v39, %v2287_v17  ;;  %vm6248_vm12 = vcmp.lt.f32.partialorder %v2289_v3, 0.0004427343  ;;  %v7221_v3 = vld [vmem:[#allocation98_spill] sm:$0xff] }
 0x415   : >> { %v2487_v20 = vsel %vm1463_vm6, %v7202_v19, %v2423_v45  ;;  %v2494_v59 = vsel %vm1470_vm5, %v5564_v40, %v5862_v42  ;;  %v3721_v11 = vpop.eup %3720  ;;  %v2285_v63 = vmul.f32 0.6931472, %v3719_v53  ;;  %v2297_v61 = vmul.f32 %v5675_v58, %v2296_v29  ;;  %v7213_v42 = vld [vmem:[#allocation107_spill] sm:$0xff]  ;;  %v7224_v45 = vld [vmem:[#allocation64_spill] sm:$0xff] }
 0x416   : >> { %v2562_v28 = vadd.f32 %v2561_v24, %v2487_v20  ;;  %v2488_v47 = vsel %vm1464_vm9, %v7207_v52, %v2424_v41  ;;  %v2325_v24 = vand.u32 2147483647, %v5760_v36  ;;  %v2571_v39 = vadd.f32 %v2494_v59, %v2493_v27  ;;  %v7222_v52 = vld [vmem:[#allocation95_spill] sm:$0xff] }
 0x417   : >> { %v2294_v15 = vmul.f32 0.6931472, %v3721_v11  ;;  %v2323_v6 = vadd.f32 1.0, %v2322_v7  ;;  %v2291_v57 = vsel %vm6248_vm12, %v2288_v49, %v2285_v63  ;;  %vm2299_vm13 = vcmp.lt.f32.partialorder %v2298_v43, 0.0004427343  ;;  %v7227_v63 = vld [vmem:[#allocation104_spill] sm:$0xff] }
 0x418   : >> { %v2563_v0 = vadd.f32 %v2562_v28, %v2488_v47  ;;  %v2332_v40 = vadd.f32 1.0, %v2331_v2  ;;  %v2355_v10 = vadd.f32 1.0, %v7213_v42  ;;  %vm1467_vm14 = vcmp.ne.f32.partialorder %v7214_v12, %v7214_v12 }
 0x419   : >> { %v2300_v34 = vsel %vm2299_vm13, %v2297_v61, %v2294_v15  ;;  %v7215_v19 = vmax.f32 %v7214_v12, 0.0  ;;  %v2364_v35 = vadd.f32 1.0, %v7216_v16  ;;  %vm1468_vm15 = vcmp.ne.f32.partialorder %v7217_v26, %v7217_v26 }
 0x41a   : >> { %2564 = vadd.xlane.f32.xlu0 %v2563_v0  ;;  %v7218_v58 = vmax.f32 %v7217_v26, 0.0  ;;  %vm6275_vm1 = vcmp.lt.f32.partialorder %v2325_v24, 0.0004427343  ;;  %3726 = vlog2.f32 %v2355_v10  ;;  %v2324_v4 = vmul.f32 %v5760_v36, %v2323_v6 }
 0x41b   : >> { %v2427_v56 = vadd.f32 %v2291_v57, %v7215_v19  ;;  %v2334_v48 = vand.u32 2147483647, %v5775_v5  ;;  %3728 = vlog2.f32 %v2364_v35  ;;  %v3723_v51 = vpop.eup %3722  ;;  %v2333_v54 = vmul.f32 %v5775_v5, %v2332_v40  ;;  %v7230_v35 = vld [vmem:[#allocation61_spill] sm:$0xff] }
 0x41c   : >> { %v2428_v44 = vadd.f32 %v2300_v34, %v7218_v58  ;;  %v2358_v62 = vmul.f32 -0.5, %v7213_v42  ;;  %v2497_v9 = vsel %vm1473_vm10, %v5652_v30, %v5945_v21  ;;  %v3725_v25 = vpop.eup %3724  ;;  %v2321_v33 = vmul.f32 0.6931472, %v3723_v51 }
 0x41d   : >> { %v2491_v18 = vsel %vm1467_vm14, %v7214_v12, %v2427_v56  ;;  %v2367_v36 = vmul.f32 -0.5, %v7216_v16  ;;  %v2498_v5 = vsel %vm1474_vm11, %v5660_v60, %v5960_v22  ;;  %v2330_v23 = vmul.f32 0.6931472, %v3725_v25  ;;  %v7228_v12 = vld [vmem:[#allocation63_spill] sm:$0xff]  ;;  %v7229_v56 = vld [vmem:[#allocation62_spill] sm:$0xff]  ;;  %v7235_v25 = vld [vmem:[#allocation57_spill] sm:$0xff] }
 0x41e   : >> { %v2567_v46 = vadd.f32 %v2566_v31, %v2491_v18  ;;  %v2492_v14 = vsel %vm1468_vm15, %v7217_v26, %v2428_v44  ;;  %v2505_v31 = vpop.xlane.xlu0 %2504  ;;  %v2576_v17 = vadd.f32 %v2498_v5, %v2497_v9  ;;  %v1408_v1 = vmax.f32 %v7221_v3, 0.0 }
 0x41f   : >> { %v2327_v30 = vsel %vm6275_vm1, %v2324_v4, %v2321_v33  ;;  %vm2335_vm2 = vcmp.lt.f32.partialorder %v2334_v48, 0.0004427343  ;;  %v7223_v32 = vmax.f32 %v7222_v52, 0.0  ;;  %v6302_v43 = vadd.f32 %v7224_v45, %v2505_v31   ;;  %v7232_v48 = vld [vmem:[#allocation59_spill] sm:$0xff] }
 0x420   : >> { %v2568_v8 = vadd.f32 %v2567_v46, %v2492_v14  ;;  %v2336_v21 = vsel %vm2335_vm2, %v2333_v54, %v2330_v23  ;;  %vm1471_vm3 = vcmp.ne.f32.partialorder %v7222_v52, %v7222_v52  ;;  %v2359_v22 = vadd.f32 1.0, %v2358_v62  ;;  %v7233_v54 = vld [vmem:[#allocation58_spill] sm:$0xff] }
 0x421   : >> { %v2431_v37 = vadd.f32 %v2327_v30, %v7223_v32  ;;  %v7225_v55 = vmov %v6302_v43  ;;  %v2432_v60 = vadd.f32 %v2336_v21, %v1408_v1  ;;  %v2361_v29 = vand.u32 2147483647, %v7213_v42  ;;  %v7241_v21 = vld [vmem:[#allocation53_spill] sm:$0xff] }
 0x422   : >> { %2569 = vadd.xlane.f32.xlu1 %v2568_v8  ;;  %v2368_v7 = vadd.f32 1.0, %v2367_v36  ;;  %vm1472_vm4 = vcmp.ne.f32.partialorder %v7221_v3, %v7221_v3  ;;  %v2370_v2 = vand.u32 2147483647, %v7216_v16  ;;  %v2360_v49 = vmul.f32 %v7213_v42, %v2359_v22  ;;  %v2510_v42 = vpop.xlane.xlu0 %2509  ;;  %v7236_v36 = vld [vmem:[#allocation56_spill] sm:$0xff]  ;;  %v7238_v8 = vld [vmem:[#allocation55_spill] sm:$0xff] }
 0x423   : >> { %v2495_v41 = vsel %vm1471_vm3, %v7222_v52, %v2431_v37  ;;  %v2496_v27 = vsel %vm1472_vm4, %v7221_v3, %v2432_v60  ;;  %v1411_v59 = vmax.f32 %v7226_v13, 0.0  ;;  %vm2362_vm5 = vcmp.lt.f32.partialorder %v2361_v29, 0.0004427343  ;;  %v7239_v3 = vld [vmem:[#allocation54_spill] sm:$0xff]  ;;  %v7243_v37 = vld [vmem:[#allocation52_spill] sm:$0xff]  ;;  %v7245_v22 = vld [vmem:[#allocation51_spill] sm:$0xff] }
 0x424   : >> { %v2572_v20 = vadd.f32 %v2571_v39, %v2495_v41  ;;  %v3727_v50 = vpop.eup %3726  ;;  %v2369_v47 = vmul.f32 %v7216_v16, %v2368_v7  ;;  %v1412_v24 = vmax.f32 %v7227_v63, 0.0  ;;  %vm2371_vm6 = vcmp.lt.f32.partialorder %v2370_v2, 0.0004427343  ;;  %v7247_v2 = vld [vmem:[#allocation50_spill] sm:$0xff] }
 0x425   : >> { %v3729_v43 = vpop.eup %3728  ;;  %v2357_v28 = vmul.f32 0.6931472, %v3727_v50  ;;  %vm1475_vm7 = vcmp.ne.f32.partialorder %v7226_v13, %v7226_v13  ;;  %vm1476_vm8 = vcmp.ne.f32.partialorder %v7227_v63, %v7227_v63  ;;  %v2582_v34 = vadd.f32 %v7228_v12, %v2510_v42  }
 0x426   : >> { %v2573_v53 = vadd.f32 %v2572_v20, %v2496_v27  ;;  %v2366_v11 = vmul.f32 0.6931472, %v3729_v43  ;;  %v7249_v43 = vld [vmem:[#allocation49_spill] sm:$0xff]  ;;  %vm2769_vm9 = vcmask (%p6354_p8), 1041409   ;;  %vm2771_vm10 = vcmask (%p6354_p8), 1042434  }
 0x427   : >> { %v2363_v39 = vsel %vm2362_vm5, %v2360_v49, %v2357_v28  ;;  %v7266_v42 = vmov %v2582_v34  ;;  %v7268_v49 = vld [vmem:[#allocation36_spill] sm:$0xff] (%p6354_p8)  ;;  %vm2773_vm11 = vcmask (%p6354_p8), 1043459   ;;  %vm2775_vm12 = vcmask (%p6354_p8), 1044484  }
 0x428   : >> { %2574 = vadd.xlane.f32.xlu0 %v2573_v53  ;;  %v2372_v0 = vsel %vm2371_vm6, %v2369_v47, %v2366_v11  ;;  %v2435_v15 = vadd.f32 %v2363_v39, %v1411_v59  ;;  %v7269_v11 = vld [vmem:[#allocation34_spill] sm:$0xff] (%p6354_p8)  ;;  %v4008_v39 = vmov (%p6354_p8), 0   ;;  %vm2777_vm13 = vcmask (%p6354_p8), 1045509  }
 0x429   : >> { %v2436_v61 = vadd.f32 %v2372_v0, %v1412_v24  ;;  %v2597_v47 = vsub.f32 (%p6354_p8), %v7269_v11, %v7225_v55  ;;  %3731 = vset.pattern.permute.xlu1 (%p6354_p8), %v4008_v39  ;;  %3730 = vset.pattern.permute.xlu0 (%p6354_p8), %v4008_v39  ;;  %v7271_v0 = vld [vmem:[#allocation33_spill] sm:$0xff] (%p6354_p8)  ;;  %vm2779_vm14 = vcmask (%p6354_p8), 1046534   ;;  %vm2781_vm15 = vcmask (%p6354_p8), 1047559  }
 0x42a   : >> { %v2499_v6 = vsel %vm1475_vm7, %v7226_v13, %v2435_v15  ;;  %v2598_v15 = vsub.f32 (%p6354_p8), %v7271_v0, %v2582_v34  ;;  %v7275_v34 = vld [vmem:[#allocation42_spill] sm:$0xff] (%p6354_p8)  ;;  %vm2784_vm1 = vcmask (%p6354_p8), 130048   ;;  %vm4009_vm3 = vmmov (%p6354_p8), 1  }
 0x42b   : >> { %v2577_v57 = vadd.f32 %v2576_v17, %v2499_v6  ;;  %v2500_v40 = vsel %vm1476_vm8, %v7227_v63, %v2436_v61  ;;  %v7270_v63 = vld [vmem:[#allocation35_spill] sm:$0xff] (%p6354_p8) }
 0x42d   : >> { %v2578_v10 = vadd.f32 %v2577_v57, %v2500_v40  ;;  %v6410_v57 = vadd.f32 (%p6354_p8), 177.44568, %v2597_v47 }
 0x42f   : >> { %2579 = vadd.xlane.f32.xlu1 %v2578_v10  ;;  %v7274_v10 = vld [vmem:[#allocation41_spill] sm:$0xff] (%p6354_p8) }
 0x439   : >> { %v2515_v19 = vpop.xlane.xlu1 %2514 }
 0x43a   : >> { %v2583_v58 = vadd.f32 %v7229_v56, %v2515_v19  }
 0x43c   : >> { %v7265_v40 = vmov %v2583_v58  ;;  %v2599_v13 = vsub.f32 (%p6354_p8), %v7268_v49, %v2583_v58 }
 0x43e   : > { %v6408_v61 = vadd.f32 (%p6354_p8), 177.44568, %v2599_v13  ;;  %2646 = vperm.xlu0 (%p6354_p8), %3730, %v6410_v57  }
 0x440   : > { %2652 = vperm.xlu1 (%p6354_p8), %3731, %v6408_v61  }
 0x44c   : >> { %v2520_v16 = vpop.xlane.xlu1 %2519 }
 0x44d   : >> { %v2584_v44 = vadd.f32 %v7230_v35, %v2520_v16  }
 0x44f   : > { %v2600_v24 = vsub.f32 (%p6354_p8), %v7270_v63, %v2584_v44 }
 0x460   : >> { %v2525_v26 = vpop.xlane.xlu0 %2524 }
 0x461   : >> { %v2585_v18 = vadd.f32 %v7231_v38, %v2525_v26  }
 0x467   : >> { %v2530_v4 = vpop.xlane.xlu1 %2529 }
 0x468   : >> { %v2586_v51 = vadd.f32 %v7232_v48, %v2530_v4   ;;  %v7278_v4 = vld [vmem:[#allocation43_spill] sm:$0xff] (%p6354_p8) }
 0x46a   : >> { %v7262_v35 = vmov %v2586_v51 }
 0x473   : >> { %v2535_v46 = vpop.xlane.xlu0 %2534 }
 0x474   : >> { %v6328_v29 = vadd.f32 %v7233_v54, %v2535_v46  }
 0x476   : >> { %v7234_v62 = vmov %v6328_v29 }
 0x477   : > { %v2603_v19 = vsub.f32 (%p6354_p8), %v7275_v34, %v7234_v62 }
 0x479   : > { %v6433_v58 = vadd.f32 (%p6354_p8), 177.44568, %v2603_v19 }
 0x47f   : >> { %v2540_v9 = vpop.xlane.xlu1 %2539 }
 0x480   : >> { %v2588_v14 = vadd.f32 %v7235_v25, %v2540_v9   ;;  %v7280_v9 = vld [vmem:[#allocation45_spill] sm:$0xff] (%p6354_p8) }
 0x482   : >> { %v7260_v28 = vmov %v2588_v14  ;;  %v2604_v12 = vsub.f32 (%p6354_p8), %v7274_v10, %v2588_v14  ;;  %v7281_v14 = vld [vmem:[#allocation46_spill] sm:$0xff] (%p6354_p8) }
 0x484   : > { %v6431_v56 = vadd.f32 (%p6354_p8), 177.44568, %v2604_v12 }
 0x485   : >> { %v2545_v33 = vpop.xlane.xlu0 %2544 }
 0x486   : >> { %v6332_v59 = vadd.f32 %v7236_v36, %v2545_v33   ;;  %v7263_v36 = vmov %v2585_v18 }
 0x488   : >> { %v7237_v31 = vmov %v6332_v59 }
 0x489   : >> { %v7259_v59 = vmov %v7237_v31 }
 0x48a   : > { %v7273_v59 = vld [vmem:[#allocation38_spill] sm:$0xff] (%p6354_p8) }
 0x48d   : >> { %v2550_v5 = vpop.xlane.xlu1 %2549 }
 0x48e   : >> { %v2590_v23 = vadd.f32 %v7238_v8, %v2550_v5  }
 0x490   : >> { %v7258_v26 = vmov %v2590_v23 }
 0x496   : >> { %v2555_v17 = vpop.xlane.xlu0 %2554 }
 0x497   : >> { %v6336_v20 = vadd.f32 %v7239_v3, %v2555_v17  }
 0x499   : >> { %v7240_v1 = vmov %v6336_v20 }
 0x49a   : >> { %v7257_v20 = vmov %v7240_v1 }
 0x49b   : > { %v6416_v20 = vadd.f32 (%p6354_p8), 177.44568, %v2598_v15 }
 0x49d   : > { %2649 = vperm.xlu0 (%p6354_p8), %3730, %v6416_v20  }
 0x49f   : >> { %v2560_v30 = vpop.xlane.xlu1 %2559 }
 0x4a0   : >> { %v6339_v17 = vadd.f32 %v7241_v21, %v2560_v30  }
 0x4a2   : >> { %v7242_v52 = vmov %v6339_v17 }
 0x4a3   : >> { %v7256_v17 = vmov %v7242_v52  ;;  %v2608_v48 = vsub.f32 (%p6354_p8), %v7278_v4, %v7242_v52 }
 0x4a5   : > { %v6450_v54 = vadd.f32 (%p6354_p8), 177.44568, %v2608_v48 }
 0x4a7   : >> { %v2565_v32 = vpop.xlane.xlu0 %2564 }
 0x4a8   : >> { %v6342_v16 = vadd.f32 %v7243_v37, %v2565_v32   ;;  %v7264_v37 = vmov %v2584_v44  ;;  %v7277_v44 = vld [vmem:[#allocation40_spill] sm:$0xff] (%p6354_p8) }
 0x4a9   : > { %v2605_v26 = vsub.f32 (%p6354_p8), %v7277_v44, %v7237_v31 }
 0x4aa   : >> { %v7244_v45 = vmov %v6342_v16 }
 0x4ab   : >> { %v7255_v16 = vmov %v7244_v45  ;;  %v2609_v33 = vsub.f32 (%p6354_p8), %v7281_v14, %v7244_v45 }
 0x4ac   : > { %v7276_v16 = vld [vmem:[#allocation39_spill] sm:$0xff] (%p6354_p8) }
 0x4ad   : > { %v2606_v35 = vsub.f32 (%p6354_p8), %v7276_v16, %v2590_v23  ;;  %v6462_v31 = vadd.f32 (%p6354_p8), 177.44568, %v2609_v33  ;;  %v7283_v23 = vld [vmem:[#allocation48_spill] sm:$0xff] (%p6354_p8) }
 0x4af   : >> { %v2570_v60 = vpop.xlane.xlu1 %2569  ;;  %v6440_v38 = vadd.f32 (%p6354_p8), 177.44568, %v2606_v35 }
 0x4b0   : >> { %v6345_v7 = vadd.f32 %v7245_v22, %v2570_v60   ;;  %v7284_v60 = vlaneseq (%p6354_p8) }
 0x4b2   : >> { %v7246_v41 = vmov %v6345_v7  ;;  %v2694_v22 = vand.u32 (%p6354_p8), 127, %v7284_v60 }
 0x4b3   : >> { %v7254_v7 = vmov %v7246_v41  ;;  %v2610_v25 = vsub.f32 (%p6354_p8), %v7280_v9, %v7246_v41 }
 0x4b4   : > { %v6414_v7 = vadd.f32 (%p6354_p8), 177.44568, %v2600_v24  ;;  %v2699_v41 = vadd.s32 (%p6354_p8), 4294967288, %v2694_v22 }
 0x4b5   : >> { %v2575_v29 = vpop.xlane.xlu0 %2574  ;;  %v6460_v36 = vadd.f32 (%p6354_p8), 177.44568, %v2610_v25 }
 0x4b6   : >> { %v6348_v6 = vadd.f32 %v7247_v2, %v2575_v29   ;;  %v7261_v29 = vmov %v7234_v62  ;;  %2655 = vperm.xlu1 (%p6354_p8), %3731, %v6414_v7  }
 0x4b8   : >> { %v7248_v50 = vmov %v6348_v6 }
 0x4b9   : >> { %v7253_v6 = vmov %v7248_v50  ;;  %v2611_v17 = vsub.f32 (%p6354_p8), %v7283_v23, %v7248_v50  ;;  %v7285_v50 = vld [vmem:[#allocation8_spill] sm:$0xff] (%p6354_p8) }
 0x4ba   : > { %917 = sbr.rel (!%p6354_p8) target bundleno = 517 (0x205), region = 100  ;;  %v2601_v6 = vsub.f32 (%p6354_p8), %v7273_v59, %v2585_v18  ;;  %v6442_v18 = vadd.f32 (%p6354_p8), 177.44568, %v2605_v26  ;;  %v6481_v49 = vsub.s32 (%p6354_p8), %v2694_v22, %v7285_v50 }
 0x4bc   : >> { %v2580_v27 = vpop.xlane.xlu1 %2579  ;;  %v6424_v42 = vadd.f32 (%p6354_p8), 177.44568, %v2601_v6 }
 0x4bd   : >> { %v6351_v5 = vadd.f32 %v7249_v43, %v2580_v27   ;;  %v7267_v43 = vmov %v7225_v55  ;;  %v7272_v55 = vld [vmem:[#allocation37_spill] sm:$0xff] (%p6354_p8)  ;;  %v2647_v21 = vpop.permute.xlu0 (%p6354_p8), %2646  ;;  %v6478_v27 = vsub.s32 (%p6354_p8), %v2699_v41, %v7285_v50  ;;  %v7286_v41 = vld [vmem:[#allocation10_spill] sm:$0xff] (%p6354_p8) }
 0x4be   : > { %v2602_v28 = vsub.f32 (%p6354_p8), %v7272_v55, %v2586_v51  ;;  %2658 = vperm.xlu0 (%p6354_p8), %3730, %v6424_v42   ;;  %v7279_v51 = vld [vmem:[#allocation44_spill] sm:$0xff] (%p6354_p8)  ;;  %v2698_v15 = vrot.slane (%p6354_p8), %v2647_v21, %v6481_v49 }
 0x4bf   : >> { %v7250_v53 = vmov %v6351_v5  ;;  %v2607_v46 = vsub.f32 (%p6354_p8), %v7279_v51, %v7240_v1  ;;  %v6472_v1 = vadd.f32 (%p6354_p8), 177.44568, %v2611_v17 }
 0x4c0   : >> { %v7252_v5 = vmov %v7250_v53  ;;  %v6422_v40 = vadd.f32 (%p6354_p8), 177.44568, %v2602_v28  ;;  %v2653_v30 = vpop.permute.xlu1 (%p6354_p8), %2652 }
 0x4c1   : > { %v6452_v62 = vadd.f32 177.44568, %v2607_v46  ;;  %v7282_v5 = vld [vmem:[#allocation47_spill] sm:$0xff]  ;;  %v2709_v0 = vrot.slane %v2653_v30, %v6481_v49 }
 0x4c2   : > { %2661 = vperm.xlu1 %3731, %v6422_v40   ;;  %2664 = vperm.xlu0 %3730, %v6433_v58   ;;  %v2612_v8 = vsub.f32 %v7282_v5, %v7250_v53 }
 0x4c4   : > { %v6470_v3 = vadd.f32 177.44568, %v2612_v8 }
 0x4c6   : > { %2667 = vperm.xlu1 %3731, %v6431_v56   ;;  %2670 = vperm.xlu0 %3730, %v6442_v18  }
 0x4ca   : > { %2673 = vperm.xlu1 %3731, %v6440_v38   ;;  %2676 = vperm.xlu0 %3730, %v6452_v62  }
 0x4ce   : > { %2679 = vperm.xlu1 %3731, %v6450_v54   ;;  %2682 = vperm.xlu0 %3730, %v6462_v31  }
 0x4d2   : > { %2685 = vperm.xlu1 %3731, %v6460_v36   ;;  %2688 = vperm.xlu0 %3730, %v6472_v1  }
 0x4d6   : > { %2691 = vperm.xlu1 %3731, %v6470_v3  }
 0x51c   : > { %v2650_v32 = vpop.permute.xlu0 %2649 }
 0x51d   : > { %v2703_v11 = vrot.slane %v2650_v32, %v6478_v27 }
 0x51f   : > { %v2705_v12 = vsel %vm2704_vm0, %v2703_v11, %v2698_v15  ;;  %v7289_v11 = vld [vmem:[#allocation9_spill] sm:$0xff] }
 0x535   : > { %v2656_v52 = vpop.permute.xlu1 %2655 }
 0x536   : > { %v2713_v13 = vrot.slane %v2656_v52, %v6478_v27 }
 0x538   : > { %v2714_v10 = vsel %vm2704_vm0, %v2713_v13, %v2709_v0 }
 0x539   : > { %v2770_v51 = vsel %vm2769_vm9, %v2714_v10, %v2705_v12 }
 0x53d   : > { %v2659_v45 = vpop.permute.xlu0 %2658 }
 0x53e   : > { %v2718_v63 = vrot.slane %v2659_v45, %v6481_v49 }
 0x541   : > { %v2662_v37 = vpop.permute.xlu1 %2661  ;;  %v2665_v2 = vpop.permute.xlu0 %2664 }
 0x542   : > { %v2722_v47 = vrot.slane %v2662_v37, %v6478_v27  ;;  %v2727_v28 = vrot.slane %v2665_v2, %v6481_v49  ;;  %v7287_v2 = vld [vmem:[#allocation13_spill] sm:$0xff] }
 0x544   : > { %v2723_v16 = vsel %vm2704_vm0, %v2722_v47, %v2718_v63 }
 0x545   : > { %v2668_v29 = vpop.permute.xlu1 %2667  ;;  %v2671_v53 = vpop.permute.xlu0 %2670  ;;  %v2772_v9 = vsel %vm2771_vm10, %v2723_v16, %v2770_v51 }
 0x546   : > { %v2731_v55 = vrot.slane %v2668_v29, %v6478_v27  ;;  %v2736_v6 = vrot.slane %v2671_v53, %v6481_v49  ;;  %v7288_v53 = vld [vmem:[#allocation16_spill] sm:$0xff] }
 0x548   : > { %v2732_v26 = vsel %vm2704_vm0, %v2731_v55, %v2727_v28 }
 0x549   : > { %v2674_v43 = vpop.permute.xlu1 %2673  ;;  %v2677_v39 = vpop.permute.xlu0 %2676  ;;  %v2774_v14 = vsel %vm2773_vm11, %v2732_v26, %v2772_v9 }
 0x54a   : > { %v2740_v59 = vrot.slane %v2674_v43, %v6478_v27  ;;  %v2745_v19 = vrot.slane %v2677_v39, %v6481_v49 }
 0x54c   : > { %v2741_v46 = vsel %vm2704_vm0, %v2740_v59, %v2736_v6  ;;  %v7290_v59 = vld [vmem:[#allocation11_spill] sm:$0xff] }
 0x54d   : > { %v2680_v24 = vpop.permute.xlu1 %2679  ;;  %v2683_v44 = vpop.permute.xlu0 %2682  ;;  %v2776_v23 = vsel %vm2775_vm12, %v2741_v46, %v2774_v14 }
 0x54e   : > { %v2749_v34 = vrot.slane %v2680_v24, %v6478_v27  ;;  %v2754_v48 = vrot.slane %v2683_v44, %v6481_v49 }
 0x550   : > { %v2750_v25 = vsel %vm2704_vm0, %v2749_v34, %v2745_v19  ;;  %v7291_v34 = vld [vmem:[#allocation12_spill] sm:$0xff] }
 0x551   : > { %v2686_v35 = vpop.permute.xlu1 %2685  ;;  %v2689_v8 = vpop.permute.xlu0 %2688  ;;  %v2778_v21 = vsel %vm2777_vm13, %v2750_v25, %v2776_v23 }
 0x552   : > { %v2758_v4 = vrot.slane %v2686_v35, %v6478_v27  ;;  %v2763_v30 = vrot.slane %v2689_v8, %v6481_v49 }
 0x554   : > { %v2759_v33 = vsel %vm2704_vm0, %v2758_v4, %v2754_v48 }
 0x555   : > { %v2692_v5 = vpop.permute.xlu1 %2691  ;;  %v2780_v32 = vsel %vm2779_vm14, %v2759_v33, %v2778_v21 }
 0x556   : > { %v2767_v17 = vrot.slane %v2692_v5, %v6478_v27 }
 0x558   : > { %v2768_v52 = vsel %vm2704_vm0, %v2767_v17, %v2763_v30 }
 0x559   : > { %v2782_v37 = vsel %vm2781_vm15, %v2768_v52, %v2780_v32 }
 0x55a   : > { %v2785_v45 = vsel %vm2784_vm1, %v2782_v37, -inf }
 0x55b   : > { %2786 = vmax.xlane.f32.xlu0 %v2785_v45 }
 0x5e8   : > { %v2787_v60 = vpop.xlane.xlu0 %2786 }
 0x5e9   : > { %vm2788_vm2 = vweird.f32 %v2787_v60 }
 0x5ea   : > { %vm2789_vm4 = vmxor %vm2788_vm2, %vm4009_vm3 }
 0x5eb   : > { %v6515_v22 = vsel %vm2789_vm4, %v2787_v60, 0.0 }
 0x5ec   : > { %v2795_v29 = vrot.slane %v6515_v22, %v7286_v41  ;;  %v2811_v50 = vrot.slane %v6515_v22, %v7287_v2  ;;  %v6524_v13 = vrot.slane %v6515_v22, %v7288_v53  ;;  %v2799_v47 = vrot.slane %v6515_v22, %v7289_v11 }
 0x5ed   : > { %v2803_v6 = vrot.slane %v6515_v22, %v7290_v59  ;;  %v2807_v19 = vrot.slane %v6515_v22, %v7291_v34 }
 0x5ee   : > { %v2832_v43 = vsub.f32 %v6410_v57, %v2795_v29  ;;  %v2833_v63 = vsub.f32 %v6416_v20, %v2795_v29  ;;  %v2840_v24 = vsub.f32 %v6442_v18, %v2811_v50  ;;  %v2847_v0 = vsub.f32 %v6470_v3, %v6524_v13 }
 0x5ef   : > { %v2834_v15 = vsub.f32 %v6408_v61, %v2799_v47  ;;  %v2835_v10 = vsub.f32 %v6414_v7, %v2799_v47  ;;  %v2836_v20 = vsub.f32 %v6424_v42, %v2803_v6  ;;  %v2837_v16 = vsub.f32 %v6422_v40, %v2803_v6  ;;  %v7292_v40 = vld [vmem:[#allocation14_spill] sm:$0xff] }
 0x5f0   : > { %v2848_v39 = vmul.f32 1.442695, %v2832_v43  ;;  %v2850_v55 = vmul.f32 1.442695, %v2833_v63  ;;  %v2864_v28 = vmul.f32 1.442695, %v2840_v24  ;;  %v2838_v26 = vsub.f32 %v6433_v58, %v2807_v19 }
 0x5f1   : > { %v2878_v57 = vmul.f32 1.442695, %v2847_v0  ;;  %v2852_v12 = vmul.f32 1.442695, %v2834_v15  ;;  %v2854_v18 = vmul.f32 1.442695, %v2835_v10  ;;  %v2839_v48 = vsub.f32 %v6431_v56, %v2807_v19 }
 0x5f2   : > { %3732 = vpow2.f32 %v2848_v39  ;;  %v2856_v35 = vmul.f32 1.442695, %v2836_v20  ;;  %v2858_v4 = vmul.f32 1.442695, %v2837_v16  ;;  %v2860_v51 = vmul.f32 1.442695, %v2838_v26 }
 0x5f3   : > { %3734 = vpow2.f32 %v2864_v28  ;;  %v2815_v9 = vrot.slane %v6515_v22, %v7292_v40  ;;  %v2841_v25 = vsub.f32 %v6440_v38, %v2811_v50  ;;  %v2862_v14 = vmul.f32 1.442695, %v2839_v48  ;;  %v7293_v56 = vld [vmem:[#allocation15_spill] sm:$0xff] }
 0x5f4   : > { %3736 = vpow2.f32 %v2850_v55  ;;  %v2819_v23 = vrot.slane %v6515_v22, %v7293_v56  ;;  %v2846_v60 = vsub.f32 %v6472_v1, %v6524_v13 }
 0x5f5   : > { %3738 = vpow2.f32 %v2878_v57  ;;  %v2842_v58 = vsub.f32 %v6452_v62, %v2815_v9  ;;  %v2866_v5 = vmul.f32 1.442695, %v2841_v25  ;;  %v2843_v17 = vsub.f32 %v6450_v54, %v2815_v9 }
 0x5f6   : > { %3740 = vpow2.f32 %v2852_v12  ;;  %v2844_v38 = vsub.f32 %v6462_v31, %v2819_v23  ;;  %v2845_v62 = vsub.f32 %v6460_v36, %v2819_v23  ;;  %v2876_v29 = vmul.f32 1.442695, %v2846_v60 }
 0x5f7   : > { %3742 = vpow2.f32 %v2854_v18  ;;  %v2868_v30 = vmul.f32 1.442695, %v2842_v58  ;;  %v2870_v52 = vmul.f32 1.442695, %v2843_v17 }
 0x5f8   : > { %3744 = vpow2.f32 %v2856_v35  ;;  %v2872_v37 = vmul.f32 1.442695, %v2844_v38  ;;  %v2874_v54 = vmul.f32 1.442695, %v2845_v62 }
 0x5f9   : > { %3746 = vpow2.f32 %v2858_v4 }
 0x5fa   : > { %3748 = vpow2.f32 %v2860_v51 }
 0x5fb   : > { %3750 = vpow2.f32 %v2862_v14 }
 0x5fc   : > { %v3733_v3 = vpop.eup %3732  ;;  %3752 = vpow2.f32 %v2866_v5 }
 0x5fd   : > { %2897 = vperm.xlu1 %3731, %v3733_v3   ;;  %v3735_v61 = vpop.eup %3734  ;;  %3754 = vpow2.f32 %v2868_v30 }
 0x5fe   : > { %2921 = vperm.xlu0 %3730, %v3735_v61   ;;  %v3737_v44 = vpop.eup %3736  ;;  %3756 = vpow2.f32 %v2870_v52 }
 0x5ff   : > { %v3739_v7 = vpop.eup %3738  ;;  %3758 = vpow2.f32 %v2872_v37 }
 0x600   : > { %v3741_v42 = vpop.eup %3740  ;;  %3760 = vpow2.f32 %v2874_v54 }
 0x601   : > { %2900 = vperm.xlu1 %3731, %v3737_v44   ;;  %v3743_v46 = vpop.eup %3742  ;;  %3762 = vpow2.f32 %v2876_v29 }
 0x602   : > { %2942 = vperm.xlu0 %3730, %v3739_v7   ;;  %v3745_v33 = vpop.eup %3744 }
 0x603   : > { %v3747_v8 = vpop.eup %3746 }
 0x604   : > { %v3749_v21 = vpop.eup %3748 }
 0x605   : > { %2903 = vperm.xlu1 %3731, %v3741_v42   ;;  %v3751_v32 = vpop.eup %3750 }
 0x606   : > { %v3753_v45 = vpop.eup %3752 }
 0x607   : > { %v3755_v41 = vpop.eup %3754 }
 0x608   : > { %v3757_v31 = vpop.eup %3756 }
 0x609   : > { %2906 = vperm.xlu1 %3731, %v3743_v46   ;;  %v3759_v2 = vpop.eup %3758 }
 0x60a   : > { %v3761_v50 = vpop.eup %3760 }
 0x60b   : > { %v3763_v36 = vpop.eup %3762 }
 0x60d   : > { %2909 = vperm.xlu1 %3731, %v3745_v33  }
 0x611   : > { %2912 = vperm.xlu1 %3731, %v3747_v8  }
 0x615   : > { %2915 = vperm.xlu1 %3731, %v3749_v21  }
 0x619   : > { %2918 = vperm.xlu1 %3731, %v3751_v32  }
 0x61d   : > { %2924 = vperm.xlu1 %3731, %v3753_v45  }
 0x621   : > { %2927 = vperm.xlu1 %3731, %v3755_v41  }
 0x625   : > { %2930 = vperm.xlu1 %3731, %v3757_v31  }
 0x629   : > { %2933 = vperm.xlu1 %3731, %v3759_v2  }
 0x62d   : > { %2936 = vperm.xlu1 %3731, %v3761_v50  }
 0x631   : > { %2939 = vperm.xlu1 %3731, %v3763_v36  }
 0x67c   : > { %v2898_v43 = vpop.permute.xlu1 %2897 }
 0x67d   : > { %v2922_v28 = vpop.permute.xlu0 %2921  ;;  %v2947_v3 = vrot.slane %v2898_v43, %v6481_v49 }
 0x67e   : > { %v2983_v16 = vrot.slane %v2922_v28, %v6481_v49 }
 0x680   : > { %v2901_v53 = vpop.permute.xlu1 %2900 }
 0x681   : > { %v2951_v6 = vrot.slane %v2901_v53, %v6478_v27  ;;  %v2943_v48 = vpop.permute.xlu0 %2942 }
 0x682   : > { %v3014_v5 = vrot.slane %v2943_v48, %v6478_v27 }
 0x683   : > { %v2952_v7 = vsel %vm2704_vm0, %v2951_v6, %v2947_v3 }
 0x684   : > { %v2904_v11 = vpop.permute.xlu1 %2903 }
 0x685   : > { %v2956_v10 = vrot.slane %v2904_v11, %v6481_v49 }
 0x688   : > { %v2907_v47 = vpop.permute.xlu1 %2906 }
 0x689   : > { %v2960_v55 = vrot.slane %v2907_v47, %v6478_v27 }
 0x68b   : > { %v2961_v61 = vsel %vm2704_vm0, %v2960_v55, %v2956_v10 }
 0x68c   : > { %v2910_v1 = vpop.permute.xlu1 %2909  ;;  %v3016_v51 = vsel %vm2769_vm9, %v2961_v61, %v2952_v7 }
 0x68d   : > { %v2965_v20 = vrot.slane %v2910_v1, %v6481_v49 }
 0x690   : > { %v2913_v13 = vpop.permute.xlu1 %2912 }
 0x691   : > { %v2969_v57 = vrot.slane %v2913_v13, %v6478_v27 }
 0x693   : > { %v2970_v35 = vsel %vm2704_vm0, %v2969_v57, %v2965_v20 }
 0x694   : > { %v2916_v63 = vpop.permute.xlu1 %2915  ;;  %v3017_v9 = vsel %vm2771_vm10, %v2970_v35, %v3016_v51 }
 0x695   : > { %v2974_v34 = vrot.slane %v2916_v63, %v6481_v49 }
 0x698   : > { %v2919_v24 = vpop.permute.xlu1 %2918 }
 0x699   : > { %v2978_v12 = vrot.slane %v2919_v24, %v6478_v27 }
 0x69b   : > { %v2979_v26 = vsel %vm2704_vm0, %v2978_v12, %v2974_v34 }
 0x69c   : > { %v2925_v39 = vpop.permute.xlu1 %2924  ;;  %v3018_v14 = vsel %vm2773_vm11, %v2979_v26, %v3017_v9 }
 0x69d   : > { %v2987_v18 = vrot.slane %v2925_v39, %v6478_v27 }
 0x69f   : > { %v2988_v46 = vsel %vm2704_vm0, %v2987_v18, %v2983_v16 }
 0x6a0   : > { %v2928_v0 = vpop.permute.xlu1 %2927  ;;  %v3019_v8 = vsel %vm2775_vm12, %v2988_v46, %v3018_v14 }
 0x6a1   : > { %v2992_v4 = vrot.slane %v2928_v0, %v6481_v49 }
 0x6a4   : > { %v2931_v15 = vpop.permute.xlu1 %2930 }
 0x6a5   : > { %v2996_v19 = vrot.slane %v2931_v15, %v6478_v27 }
 0x6a7   : > { %v2997_v25 = vsel %vm2704_vm0, %v2996_v19, %v2992_v4 }
 0x6a8   : > { %v2934_v59 = vpop.permute.xlu1 %2933  ;;  %v3020_v23 = vsel %vm2777_vm13, %v2997_v25, %v3019_v8 }
 0x6a9   : > { %v3001_v40 = vrot.slane %v2934_v59, %v6481_v49 }
 0x6ac   : > { %v2937_v44 = vpop.permute.xlu1 %2936 }
 0x6ad   : > { %v3005_v42 = vrot.slane %v2937_v44, %v6478_v27 }
 0x6af   : > { %v3006_v33 = vsel %vm2704_vm0, %v3005_v42, %v3001_v40 }
 0x6b0   : > { %v2940_v58 = vpop.permute.xlu1 %2939  ;;  %v3021_v30 = vsel %vm2779_vm14, %v3006_v33, %v3020_v23 }
 0x6b1   : > { %v3010_v56 = vrot.slane %v2940_v58, %v6481_v49 }
 0x6b3   : > { %v3015_v17 = vsel %vm2704_vm0, %v3014_v5, %v3010_v56 }
 0x6b4   : > { %v3022_v21 = vsel %vm2781_vm15, %v3015_v17, %v3021_v30 }
 0x6b5   : > { %v3024_v38 = vsel %vm2784_vm1, %v3022_v21, 0.0 }
 0x6b6   : > { %3025 = vadd.xlane.f32.xlu1 %v3024_v38 }
 0x743   : > { %v3026_v52 = vpop.xlane.xlu1 %3025 }
 0x744   : > { %3764 = vlog2.f32 %v3026_v52 }
 0x74e   : > { %v3765_v32 = vpop.eup %3764 }
 0x74f   : > { %v3028_v62 = vmul.f32 0.6931472, %v3765_v32 }
 0x751   : > { %v3029_v27 = vadd.f32 %v3028_v62, %v6515_v22 }
 0x753   : > { %v3222_v37 = vadd.f32 -2.7725887, %v3029_v27 }
 0x755   : > { %3031 = vst [vmem:[%s4176_s30] sm:$0xff] %v3222_v37 }
 0x756 PF: > { %p17_p9 = scmp.ge.s32.totalorder %s4089_s29, 4   ;;  %s7294_s21 = smov %s3922_s22 }
 0x757   : > { %s7295_s22 = smov %s3926_s23  ;;  %s7296_s23 = smov %s4115_s20 }
 0x758   : > { %s7297_s24 = smov %s4089_s29  ;;  %19 = sbr.rel (!%p17_p9) target bundleno = 4 (0x4), region = 111 }
 0x75f   :  { %3051 = vsyncpa [#allocation3], 1 }
 0x760   :  { %3053 = vsyncpa [#allocation3 + $0x1], 1 }
 0x761   :  { %3054 = vsyncpa [#allocation5], 1 }

</bundles_post_ra>
